<compile_context>
chip_gen: v7x
topology: tpu7x:2x2x1
jax: 0.10.0
libtpu: 0.0.40
codegen_flags: <defaults>
</compile_context>

<pallas_src>
import numpy as np
import jax
import jax.numpy as jnp
from jax import lax
from jax.experimental import pallas as pl
from jax.experimental.pallas import tpu as pltpu


# ------------------------------- small helpers -------------------------------

def _gelu_tanh(y):
    # TODO(synk): PyTorch nn.GELU() defaults to exact erf; tanh approximation is used
    # for guaranteed Mosaic lowering (~1e-3 level difference).
    return 0.5 * y * (1.0 + jnp.tanh(0.7978845608028654 * (y + 0.044715 * y * y * y)))


def _pick_ngroups(nW, T, target_tokens=1024):
    """Largest divisor g of nW keeping >= target_tokens tokens per grid step."""
    best = 1
    for g in range(2, nW + 1):
        if nW % g:
            continue
        tok = (nW // g) * T
        if tok >= target_tokens and tok % 16 == 0:
            best = g
    return best


def _maybe_take(x, idx_np):
    if np.array_equal(idx_np, np.arange(idx_np.size)):
        return x
    return jnp.take(x, jnp.asarray(idx_np, jnp.int32), axis=1)


# ------------------------------- fused Swin block -------------------------------

def _fused_swin_block(x_win, p, bias, mask, heads, nW, T, ngroups, eps=1e-5):
    """One full Swin block (LN1 -> QKV -> block-diagonal windowed MHSA w/ rel-pos bias
    + shift mask -> proj -> residual -> LN2 -> MLP -> residual) as ONE pallas_call.

    x_win: (B, N, C) bf16 tokens already permuted to (shifted-)window order.
    bias:  (heads, T, T) f32 relative-position bias.
    mask:  (nW, T, T) f32 shift mask (zeros when the block is unshifted).
    """
    B, N, C = x_win.shape
    hd = C // heads
    nWg = nW // ngroups
    Ng = N // ngroups

    def kernel(x_ref, bias_ref, mask_ref, ln1g_ref, ln1b_ref, qkvw_ref, qkvb_ref,
               projw_ref, projb_ref, ln2g_ref, ln2b_ref,
               fc1w_ref, fc1b_ref, fc2w_ref, fc2b_ref, o_ref):
        x = x_ref[0].astype(jnp.float32)                                  # (Ng, C)

        def ln(v, g_ref, b_ref):
            mu = jnp.mean(v, axis=-1, keepdims=True)
            var = jnp.mean((v - mu) ** 2, axis=-1, keepdims=True)
            return (v - mu) * lax.rsqrt(var + eps) * g_ref[...] + b_ref[...]

        def mm(a, w):                       # MXU: bf16 x bf16 -> f32 accumulate
            return jnp.dot(a.astype(jnp.bfloat16), w,
                           preferred_element_type=jnp.float32)

        # ------------- block-diagonal windowed multi-head self-attention -------------
        h = ln(x, ln1g_ref, ln1b_ref)
        qkv = mm(h, qkvw_ref[...]) + qkvb_ref[...]       # (Ng, 3C); Q already *scale
        msk = mask_ref[...]                               # (nWg, T, T)
        y = jnp.zeros((Ng, C), jnp.float32)
        for hh in range(heads):                           # static unroll (heads small)
            qh = qkv[:, hh * hd:(hh + 1) * hd].reshape(nWg, T, hd)
            kh = qkv[:, C + hh * hd:C + (hh + 1) * hd].reshape(nWg, T, hd)
            vh = qkv[:, 2 * C + hh * hd:2 * C + (hh + 1) * hd].reshape(nWg, T, hd)
            # per-window scores, no K transpose materialized (NT-form dot_general)
            s = lax.dot_general(qh.astype(jnp.bfloat16), kh.astype(jnp.bfloat16),
                                (((2,), (2,)), ((0,), (0,))),
                                preferred_element_type=jnp.float32)       # (nWg, T, T)
            s = s + bias_ref[hh] + msk
            s = s - jnp.max(s, axis=-1, keepdims=True)
            e = jnp.exp(s)
            pattn = e * pl.reciprocal(jnp.sum(e, axis=-1, keepdims=True), approx=True)
            oh = lax.dot_general(pattn.astype(jnp.bfloat16), vh.astype(jnp.bfloat16),
                                 (((2,), (1,)), ((0,), (0,))),
                                 preferred_element_type=jnp.float32)      # (nWg, T, hd)
            # accumulate this head's contribution to the output projection:
            # (Ng, hd) @ (hd, C) -- lane-dense, no narrow column store, no scratch.
            y = y + mm(oh.reshape(Ng, hd), projw_ref[hh])
        x = x + y + projb_ref[...]

        # ------------------------------------ MLP ------------------------------------
        h2 = ln(x, ln2g_ref, ln2b_ref)
        h2 = _gelu_tanh(mm(h2, fc1w_ref[...]) + fc1b_ref[...])
        h2 = mm(h2, fc2w_ref[...]) + fc2b_ref[...]
        o_ref[0] = (x + h2).astype(o_ref.dtype)

    args = (x_win, bias, mask, p["ln1g"], p["ln1b"], p["qkvw"], p["qkvb"],
            p["projw"], p["projb"], p["ln2g"], p["ln2b"],
            p["fc1w"], p["fc1b"], p["fc2w"], p["fc2b"])

    def _const(a):
        nd = a.ndim
        return pl.BlockSpec(a.shape, lambda b, g, _nd=nd: (0,) * _nd)

    in_specs = [pl.BlockSpec((1, Ng, C), lambda b, g: (b, g, 0)),
                _const(bias),
                pl.BlockSpec((nWg, T, T), lambda b, g: (g, 0, 0))] + \
               [_const(a) for a in args[3:]]

    return pl.pallas_call(
        kernel,
        out_shape=jax.ShapeDtypeStruct((B, N, C), x_win.dtype),
        grid=(B, ngroups),
        in_specs=in_specs,
        out_specs=pl.BlockSpec((1, Ng, C), lambda b, g: (b, g, 0)),
        compiler_params=pltpu.CompilerParams(
            dimension_semantics=("parallel", "parallel")),
    )(*args)


# ----------------------- fused token-wise (LN +) Linear -----------------------

def _fused_token_linear(x3, w_bf16, b, ln_g=None, ln_b=None, eps=1e-5):
    """(optional LayerNorm) -> x @ w + b.  x3: (B, N, Cin) -> (B, N, Cout)."""
    B, N, Cin = x3.shape
    Cout = w_bf16.shape[1]
    has_ln = ln_g is not None
    g2 = (ln_g if has_ln else jnp.ones((Cin,), jnp.float32)).reshape(1, Cin)
    be2 = (ln_b if has_ln else jnp.zeros((Cin,), jnp.float32)).reshape(1, Cin)
    b2 = b.reshape(1, Cout)

    def kernel(x_ref, g_ref, be_ref, w_ref, b_ref, o_ref):
        xv = x_ref[0].astype(jnp.float32)
        if has_ln:
            mu = jnp.mean(xv, axis=-1, keepdims=True)
            var = jnp.mean((xv - mu) ** 2, axis=-1, keepdims=True)
            xv = (xv - mu) * lax.rsqrt(var + eps) * g_ref[...] + be_ref[...]
        y = jnp.dot(xv.astype(jnp.bfloat16), w_ref[...],
                    preferred_element_type=jnp.float32) + b_ref[...]
        o_ref[0] = y.astype(o_ref.dtype)

    args = (x3, g2, be2, w_bf16, b2)

    def _const(a):
        nd = a.ndim
        return pl.BlockSpec(a.shape, lambda i, _nd=nd: (0,) * _nd)

    in_specs = [pl.BlockSpec((1, N, Cin), lambda i: (i, 0, 0))] + \
               [_const(a) for a in args[1:]]
    return pl.pallas_call(
        kernel,
        out_shape=jax.ShapeDtypeStruct((B, N, Cout), x3.dtype),
        grid=(B,),
        in_specs=in_specs,
        out_specs=pl.BlockSpec((1, N, Cout), lambda i: (i, 0, 0)),
        compiler_params=pltpu.CompilerParams(dimension_semantics=("parallel",)),
    )(*args)


def _fused_linear_lanedense(x3, w_t_bf16, b, out_dtype=jnp.float32):
    """Lane-dense linear: y[b, o, n] = sum_i x[b, n, i] * w_t[o, i] + b[o].
    Output stored as (B, Cout, N) so the last (lane) dim is the long token axis."""
    B, N, Cin = x3.shape
    Cout = w_t_bf16.shape[0]
    bcol = b.reshape(Cout, 1)

    def kernel(x_ref, w_ref, b_ref, o_ref):
        y = lax.dot_general(w_ref[...], x_ref[0].astype(jnp.bfloat16),
                            (((1,), (1,)), ((), ())),
                            preferred_element_type=jnp.float32)          # (Cout, N)
        o_ref[0] = (y + b_ref[...]).astype(o_ref.dtype)

    def _const(a):
        nd = a.ndim
        return pl.BlockSpec(a.shape, lambda i, _nd=nd: (0,) * _nd)

    return pl.pallas_call(
        kernel,
        out_shape=jax.ShapeDtypeStruct((B, Cout, N), out_dtype),
        grid=(B,),
        in_specs=[pl.BlockSpec((1, N, Cin), lambda i: (i, 0, 0)),
                  _const(w_t_bf16), _const(bcol)],
        out_specs=pl.BlockSpec((1, Cout, N), lambda i: (i, 0, 0)),
        compiler_params=pltpu.CompilerParams(dimension_semantics=("parallel",)),
    )(x3, w_t_bf16, bcol)


# ------------------------------- parameters -------------------------------

def _init_linear(key, din, dout):
    return {"w": 0.02 * jax.random.normal(key, (din, dout), jnp.float32),
            "b": jnp.zeros((dout,), jnp.float32)}


def _relative_position_index(ws):
    coords = np.stack(np.meshgrid(np.arange(ws), np.arange(ws), indexing="ij"))
    flat = coords.reshape(2, -1)
    rel = (flat[:, :, None] - flat[:, None, :]).transpose(1, 2, 0).astype(np.int64)
    rel[..., 0] += ws - 1
    rel[..., 1] += ws - 1
    rel[..., 0] *= 2 * ws - 1
    return rel.sum(-1)  # (T, T)


def _init_swin_block(key, dim, heads, ws, mlp_ratio):
    """Init + kernel-prep: bf16 matmul weights, scale folded into Q, rel-pos bias dense."""
    k = jax.random.split(key, 5)
    hidden = int(dim * mlp_ratio)
    hd = dim // heads
    scale = float(hd) ** -0.5
    T = ws * ws
    qkv = _init_linear(k[0], dim, 3 * dim)
    proj = _init_linear(k[1], dim, dim)
    fc1 = _init_linear(k[2], dim, hidden)
    fc2 = _init_linear(k[3], hidden, dim)
    table = 0.02 * jax.random.normal(k[4], ((2 * ws - 1) ** 2, heads), jnp.float32)
    rel_idx = _relative_position_index(ws).reshape(-1)
    rel_dense = table[rel_idx].reshape(T, T, heads).transpose(2, 0, 1)    # (heads, T, T)
    qsc = jnp.concatenate([jnp.full((dim,), scale, jnp.float32),
                           jnp.ones((2 * dim,), jnp.float32)])
    return {
        "ln1g": jnp.ones((1, dim), jnp.float32), "ln1b": jnp.zeros((1, dim), jnp.float32),
        "qkvw": (qkv["w"] * qsc[None, :]).astype(jnp.bfloat16),
        "qkvb": (qkv["b"] * qsc).reshape(1, 3 * dim),
        "projw": proj["w"].reshape(heads, hd, dim).astype(jnp.bfloat16),
        "projb": proj["b"].reshape(1, dim),
        "ln2g": jnp.ones((1, dim), jnp.float32), "ln2b": jnp.zeros((1, dim), jnp.float32),
        "fc1w": fc1["w"].astype(jnp.bfloat16), "fc1b": fc1["b"].reshape(1, hidden),
        "fc2w": fc2["w"].astype(jnp.bfloat16), "fc2b": fc2["b"].reshape(1, dim),
        "rel_table": table, "rel_dense": rel_dense, "nominal_ws": ws,
    }


def _init_transformer_layer(key, in_dim, out_dim, heads, depth, ws, mlp_ratio,
                            scale, scale_factor):
    keys = jax.random.split(key, depth + 1)
    lp = {"blocks": [_init_swin_block(keys[d], in_dim, heads, ws, mlp_ratio)
                     for d in range(depth)]}
    if scale == "up":
        sfh, sfw = scale_factor
        proj = _init_linear(keys[-1], in_dim, out_dim * sfh * sfw)
        lp["up_ng"] = jnp.ones((in_dim,), jnp.float32)
        lp["up_nb"] = jnp.zeros((in_dim,), jnp.float32)
        lp["up_w"] = proj["w"].astype(jnp.bfloat16)
        lp["up_b"] = proj["b"]
    return lp


# ------------------------------- static helpers -------------------------------

def _shift_attention_mask(wh, ww, ws, shift):
    img = np.zeros((wh, ww), np.float32)
    cnt = 0
    for hs in (slice(0, -ws), slice(-ws, -shift), slice(-shift, None)):
        for wsl in (slice(0, -ws), slice(-ws, -shift), slice(-shift, None)):
            img[hs, wsl] = cnt
            cnt += 1
    mw = img.reshape(wh // ws, ws, ww // ws, ws).transpose(0, 2, 1, 3).reshape(-1, ws * ws)
    diff = mw[:, None, :] - mw[:, :, None]
    return np.where(diff != 0, -1e9, 0.0).astype(np.float32)   # (nW, T, T)


def _window_permutation(wh, ww, ws, shift):
    """Token permutation canonical order -> (cyclic-shifted, window-partitioned) order."""
    nwh, nww = wh // ws, ww // ws
    T = ws * ws
    perm = np.empty((nwh * nww * T,), np.int64)
    idx = 0
    for wr in range(nwh):
        for wc in range(nww):
            for i in range(ws):
                for j in range(ws):
                    r = (wr * ws + i + shift) % wh
                    c = (wc * ws + j + shift) % ww
                    perm[idx] = r * ww + c
                    idx += 1
    inv = np.empty_like(perm)
    inv[perm] = np.arange(perm.size)
    return perm, inv


def _block_bias_mask(pb, wh, ww, ws_eff, shift, heads):
    T = ws_eff * ws_eff
    nW = (wh // ws_eff) * (ww // ws_eff)
    if ws_eff == pb["nominal_ws"]:
        bias = pb["rel_dense"]
    else:
        # TODO(synk): shrunken-window rel-pos indexing reuses the nominal table
        # approximately (reference builds a table for the shrunken window at init).
        idx = _relative_position_index(ws_eff).reshape(-1)
        bias = pb["rel_table"][idx].reshape(T, T, heads).transpose(2, 0, 1)
    if shift > 0:
        mask = jnp.asarray(_shift_attention_mask(wh, ww, ws_eff, shift))
    else:
        mask = jnp.zeros((nW, T, T), jnp.float32)
    return bias, mask


# ------------------------------- model application -------------------------------

def _transformer_layer_apply(x, wh, ww, lp, heads, depth, ws, scale, scale_factor):
    ws_eff = min(ws, wh, ww)                      # shrink window if the grid is smaller
    small = min(wh, ww) <= ws
    # TODO(synk): add padding support for resolutions not divisible by the window size.
    assert wh % ws_eff == 0 and ww % ws_eff == 0
    T = ws_eff * ws_eff
    nW = (wh // ws_eff) * (ww // ws_eff)
    ngroups = _pick_ngroups(nW, T)

    shifts, perms, invs = [], [], []
    for d in range(depth):
        shift = 0 if (d % 2 == 0 or small or ws_eff < 2) else ws_eff // 2
        shifts.append(shift)
        pm, iv = _window_permutation(wh, ww, ws_eff, shift)
        perms.append(pm)
        invs.append(iv)

    # One gather into the first block's window order, composed permutations between
    # consecutive blocks, one gather back to canonical order at the end.
    x = _maybe_take(x, perms[0])
    for d in range(depth):
        bias, mask = _block_bias_mask(lp["blocks"][d], wh, ww, ws_eff, shifts[d], heads)
        x = _fused_swin_block(x, lp["blocks"][d], bias, mask, heads, nW, T, ngroups)
        nxt = invs[d][perms[d + 1]] if d + 1 < depth else invs[d]
        x = _maybe_take(x, nxt)

    if scale == "up":
        sfh, sfw = scale_factor
        B = x.shape[0]
        cout = lp["up_w"].shape[1] // (sfh * sfw)
        h = _fused_token_linear(x, lp["up_w"], lp["up_b"],
                                ln_g=lp["up_ng"], ln_b=lp["up_nb"])
        h = h.reshape(B, wh, ww, sfh, sfw, cout).transpose(0, 1, 3, 2, 4, 5)
        wh, ww = wh * sfh, ww * sfw
        x = h.reshape(B, wh * ww, cout)
    return x, wh, ww


def _patch_deembed_apply(x, wh, ww, w_t, b, in_dim, patch_size):
    # ConvTranspose2d(C, in_dim, kernel=patch, stride=patch) == per-token linear
    # (computed lane-dense as (Cout, N)) followed by a pixel-unshuffle into NCHW.
    B, N, C = x.shape
    ph, pw = patch_size
    h = _fused_linear_lanedense(x, w_t, b)                       # (B, ph*pw*in_dim, N)
    h = h.reshape(B, ph, pw, in_dim, wh, ww)
    h = h.transpose(0, 3, 4, 1, 5, 2).reshape(B, in_dim, wh * ph, ww * pw)
    return h


class SwinTDecoderPallas:
    def __init__(self, in_freq, in_dim, h_dims, patch_size, swin_heads,
                 swin_depth, window_size, mlp_ratio, key):
        self.in_freq = in_freq
        self.in_dim = in_dim
        self.patch_size = tuple(patch_size)
        self.window_size = window_size
        self.swin_depth = swin_depth
        self.swin_heads = list(swin_heads)
        self.h_dims = list(h_dims)

        in_dims, out_dims = h_dims[:-1], h_dims[1:]
        n = len(in_dims)
        keys = jax.random.split(key, n + 2)
        self.block_params = [
            _init_transformer_layer(keys[i], in_dims[i], out_dims[i], swin_heads[i],
                                    swin_depth, window_size, mlp_ratio, "up", (2, 1))
            for i in range(n)
        ]
        self.post_params = _init_transformer_layer(keys[n], h_dims[-1], h_dims[-1],
                                                   swin_heads[-1], swin_depth,
                                                   window_size, mlp_ratio, None, None)
        de = _init_linear(keys[n + 1], h_dims[-1],
                          in_dim * patch_size[0] * patch_size[1])
        self.deembed_w_t = jnp.transpose(de["w"]).astype(jnp.bfloat16)   # (Cout, Cin)
        self.deembed_b = de["b"]

    def __call__(self, z_q, feat_shape):
        wh, ww = feat_shape
        x = z_q.astype(jnp.bfloat16)               # bf16 inter-kernel activations
        for i, lp in enumerate(self.block_params):
            x, wh, ww = _transformer_layer_apply(x, wh, ww, lp, self.swin_heads[i],
                                                 self.swin_depth, self.window_size,
                                                 "up", (2, 1))
        x, wh, ww = _transformer_layer_apply(x, wh, ww, self.post_params,
                                             self.swin_heads[-1], self.swin_depth,
                                             self.window_size, None, None)
        return _patch_deembed_apply(x, wh, ww, self.deembed_w_t, self.deembed_b,
                                    self.in_dim, self.patch_size)


if __name__ == "__main__":
    key = jax.random.PRNGKey(0)
    k_params, k_input = jax.random.split(key)

    # Small but consistent config:
    in_freq, in_dim = 32, 2          # reconstructed spectrogram: 2 channels x 32 freq bins
    h_dims = [32, 16]                # one up-block 32->16, post_swin at 16
    patch_size = (4, 1)
    swin_heads = [4, 2]
    swin_depth = 2
    window_size = 4
    mlp_ratio = 2.0

    B = 2
    Wh0, Ww0 = 4, 8                  # after one (2,1) up-block: Wh = 8 = in_freq // patch[0]
    T_time = Ww0 * patch_size[1]

    model = SwinTDecoderPallas(in_freq, in_dim, h_dims, patch_size, swin_heads,
                               swin_depth, window_size, mlp_ratio, k_params)
    z_q = jax.random.normal(k_input, (B, Wh0 * Ww0, h_dims[0]), jnp.float32)

    fwd = jax.jit(lambda z: model(z, (Wh0, Ww0)))
    recon = jax.block_until_ready(fwd(z_q))
    assert recon.shape == (B, in_dim, in_freq, T_time), recon.shape
    assert bool(jnp.all(jnp.isfinite(recon)))
    print("KERNEL_OK")
</pallas_src>

<mosaic_0001>
module attributes {stable_mosaic.version = 11 : i64} {
  func.func @kernel(%arg0: i32, %arg1: memref<1x32x32xbf16, #tpu.memory_space<vmem>>, %arg2: memref<1x32xf32, #tpu.memory_space<vmem>>, %arg3: memref<1x32xf32, #tpu.memory_space<vmem>>, %arg4: memref<32x32xbf16, #tpu.memory_space<vmem>>, %arg5: memref<1x32xf32, #tpu.memory_space<vmem>>, %arg6: memref<1x32x32xbf16, #tpu.memory_space<vmem>>) attributes {dimension_semantics = [#tpu.dimension_semantics<parallel>], iteration_bounds = array<i64: 2>, scalar_prefetch = 0 : i64, scratch_operands = 0 : i64, tpu.core_type = #tpu.core_type<tc>, window_params = [{transform_indices = @transform_0, window_bounds = array<i64: 1, 32, 32>}, {pipeline_mode = #tpu.pipeline_mode<synchronous>, transform_indices = @transform_1, window_bounds = array<i64: 1, 32>}, {pipeline_mode = #tpu.pipeline_mode<synchronous>, transform_indices = @transform_2, window_bounds = array<i64: 1, 32>}, {pipeline_mode = #tpu.pipeline_mode<synchronous>, transform_indices = @transform_3, window_bounds = array<i64: 32, 32>}, {pipeline_mode = #tpu.pipeline_mode<synchronous>, transform_indices = @transform_4, window_bounds = array<i64: 1, 32>}, {transform_indices = @transform_5, window_bounds = array<i64: 1, 32, 32>}]} {
    %c0 = arith.constant 0 : index
    %c0_0 = arith.constant 0 : index
    %c0_1 = arith.constant 0 : index
    %0 = vector.load %arg1[%c0, %c0_0, %c0_1] : memref<1x32x32xbf16, #tpu.memory_space<vmem>>, vector<1x32x32xbf16>
    %1 = vector.shape_cast %0 : vector<1x32x32xbf16> to vector<32x32xbf16>
    %2 = arith.extf %1 : vector<32x32xbf16> to vector<32x32xf32>
    %cst = arith.constant dense<0.000000e+00> : vector<32xf32>
    %3 = vector.multi_reduction <add>, %2, %cst [1] : vector<32x32xf32> to vector<32xf32>
    %4 = vector.shape_cast %3 : vector<32xf32> to vector<32x1xf32>
    %cst_2 = arith.constant 3.200000e+01 : f32
    %5 = vector.broadcast %cst_2 : f32 to vector<32x1xf32>
    %6 = arith.divf %4, %5 : vector<32x1xf32>
    %7 = vector.broadcast %6 : vector<32x1xf32> to vector<32x32xf32>
    %8 = arith.subf %2, %7 : vector<32x32xf32>
    %9 = arith.mulf %8, %8 : vector<32x32xf32>
    %cst_3 = arith.constant dense<0.000000e+00> : vector<32xf32>
    %10 = vector.multi_reduction <add>, %9, %cst_3 [1] : vector<32x32xf32> to vector<32xf32>
    %11 = vector.shape_cast %10 : vector<32xf32> to vector<32x1xf32>
    %cst_4 = arith.constant 3.200000e+01 : f32
    %12 = vector.broadcast %cst_4 : f32 to vector<32x1xf32>
    %13 = arith.divf %11, %12 : vector<32x1xf32>
    %14 = vector.broadcast %6 : vector<32x1xf32> to vector<32x32xf32>
    %15 = arith.subf %2, %14 : vector<32x32xf32>
    %cst_5 = arith.constant 9.99999974E-6 : f32
    %16 = vector.broadcast %cst_5 : f32 to vector<32x1xf32>
    %17 = arith.addf %13, %16 : vector<32x1xf32>
    %18 = math.rsqrt %17 : vector<32x1xf32>
    %19 = vector.broadcast %18 : vector<32x1xf32> to vector<32x32xf32>
    %20 = arith.mulf %15, %19 : vector<32x32xf32>
    %c0_6 = arith.constant 0 : index
    %c0_7 = arith.constant 0 : index
    %21 = vector.load %arg2[%c0_6, %c0_7] : memref<1x32xf32, #tpu.memory_space<vmem>>, vector<1x32xf32>
    %22 = vector.broadcast %21 : vector<1x32xf32> to vector<32x32xf32>
    %23 = arith.mulf %20, %22 : vector<32x32xf32>
    %c0_8 = arith.constant 0 : index
    %c0_9 = arith.constant 0 : index
    %24 = vector.load %arg3[%c0_8, %c0_9] : memref<1x32xf32, #tpu.memory_space<vmem>>, vector<1x32xf32>
    %25 = vector.broadcast %24 : vector<1x32xf32> to vector<32x32xf32>
    %26 = arith.addf %23, %25 : vector<32x32xf32>
    %27 = arith.truncf %26 : vector<32x32xf32> to vector<32x32xbf16>
    %c0_10 = arith.constant 0 : index
    %c0_11 = arith.constant 0 : index
    %28 = vector.load %arg4[%c0_10, %c0_11] : memref<32x32xbf16, #tpu.memory_space<vmem>>, vector<32x32xbf16>
    %cst_12 = arith.constant dense<0.000000e+00> : vector<32x32xf32>
    %29 = tpu.matmul %27, %28, %cst_12 {dimension_numbers = #tpu.dot_dimension_numbers<[1], [0], [0], [1], [0, 0, 1, 1], [], []>} : vector<32x32xbf16>, vector<32x32xbf16>, vector<32x32xf32> -> vector<32x32xf32>
    %c0_13 = arith.constant 0 : index
    %c0_14 = arith.constant 0 : index
    %30 = vector.load %arg5[%c0_13, %c0_14] : memref<1x32xf32, #tpu.memory_space<vmem>>, vector<1x32xf32>
    %31 = vector.broadcast %30 : vector<1x32xf32> to vector<32x32xf32>
    %32 = arith.addf %29, %31 : vector<32x32xf32>
    %33 = arith.truncf %32 : vector<32x32xf32> to vector<32x32xbf16>
    %c0_15 = arith.constant 0 : index
    %c0_16 = arith.constant 0 : index
    %c0_17 = arith.constant 0 : index
    %34 = vector.load %arg6[%c0_15, %c0_16, %c0_17] : memref<1x32x32xbf16, #tpu.memory_space<vmem>>, vector<1x32x32xbf16>
    %35 = vector.shape_cast %34 : vector<1x32x32xbf16> to vector<32x32xbf16>
    %36 = vector.shape_cast %33 : vector<32x32xbf16> to vector<1x32x32xbf16>
    tpu.vector_store %arg6[%c0_15, %c0_16, %c0_17], %36 {strides = array<i32>} : memref<1x32x32xbf16, #tpu.memory_space<vmem>>, vector<1x32x32xbf16>,
    return
  }
  func.func @transform_0(%arg0: i32) -> (i32, i32, i32) {
    %c0_i32 = arith.constant 0 : i32
    %c0_i32_0 = arith.constant 0 : i32
    %c0_i32_1 = arith.constant 0 : i32
    return %arg0, %c0_i32, %c0_i32_0 : i32, i32, i32
  }
  func.func @transform_1(%arg0: i32) -> (i32, i32) {
    %c0_i32 = arith.constant 0 : i32
    %c0_i32_0 = arith.constant 0 : i32
    %c0_i32_1 = arith.constant 0 : i32
    return %c0_i32, %c0_i32_0 : i32, i32
  }
  func.func @transform_2(%arg0: i32) -> (i32, i32) {
    %c0_i32 = arith.constant 0 : i32
    %c0_i32_0 = arith.constant 0 : i32
    %c0_i32_1 = arith.constant 0 : i32
    return %c0_i32, %c0_i32_0 : i32, i32
  }
  func.func @transform_3(%arg0: i32) -> (i32, i32) {
    %c0_i32 = arith.constant 0 : i32
    %c0_i32_0 = arith.constant 0 : i32
    %c0_i32_1 = arith.constant 0 : i32
    return %c0_i32, %c0_i32_0 : i32, i32
  }
  func.func @transform_4(%arg0: i32) -> (i32, i32) {
    %c0_i32 = arith.constant 0 : i32
    %c0_i32_0 = arith.constant 0 : i32
    %c0_i32_1 = arith.constant 0 : i32
    return %c0_i32, %c0_i32_0 : i32, i32
  }
  func.func @transform_5(%arg0: i32) -> (i32, i32, i32) {
    %c0_i32 = arith.constant 0 : i32
    %c0_i32_0 = arith.constant 0 : i32
    %c0_i32_1 = arith.constant 0 : i32
    return %arg0, %c0_i32, %c0_i32_0 : i32, i32, i32
  }
}

module attributes {stable_mosaic.version = 11 : i64} {
  func.func @kernel(%arg0: i32, %arg1: i32, %arg2: memref<1x32x32xbf16, #tpu.memory_space<vmem>>, %arg3: memref<4x16x16xf32, #tpu.memory_space<vmem>>, %arg4: memref<2x16x16xf32, #tpu.memory_space<vmem>>, %arg5: memref<1x32xf32, #tpu.memory_space<vmem>>, %arg6: memref<1x32xf32, #tpu.memory_space<vmem>>, %arg7: memref<32x96xbf16, #tpu.memory_space<vmem>>, %arg8: memref<1x96xf32, #tpu.memory_space<vmem>>, %arg9: memref<4x8x32xbf16, #tpu.memory_space<vmem>>, %arg10: memref<1x32xf32, #tpu.memory_space<vmem>>, %arg11: memref<1x32xf32, #tpu.memory_space<vmem>>, %arg12: memref<1x32xf32, #tpu.memory_space<vmem>>, %arg13: memref<32x64xbf16, #tpu.memory_space<vmem>>, %arg14: memref<1x64xf32, #tpu.memory_space<vmem>>, %arg15: memref<64x32xbf16, #tpu.memory_space<vmem>>, %arg16: memref<1x32xf32, #tpu.memory_space<vmem>>, %arg17: memref<1x32x32xbf16, #tpu.memory_space<vmem>>) attributes {dimension_semantics = [#tpu.dimension_semantics<parallel>, #tpu.dimension_semantics<parallel>], iteration_bounds = array<i64: 2, 1>, scalar_prefetch = 0 : i64, scratch_operands = 0 : i64, tpu.core_type = #tpu.core_type<tc>, window_params = [{transform_indices = @transform_0, window_bounds = array<i64: 1, 32, 32>}, {pipeline_mode = #tpu.pipeline_mode<synchronous>, transform_indices = @transform_1, window_bounds = array<i64: 4, 16, 16>}, {transform_indices = @transform_2, window_bounds = array<i64: 2, 16, 16>}, {pipeline_mode = #tpu.pipeline_mode<synchronous>, transform_indices = @transform_3, window_bounds = array<i64: 1, 32>}, {pipeline_mode = #tpu.pipeline_mode<synchronous>, transform_indices = @transform_4, window_bounds = array<i64: 1, 32>}, {pipeline_mode = #tpu.pipeline_mode<synchronous>, transform_indices = @transform_5, window_bounds = array<i64: 32, 96>}, {pipeline_mode = #tpu.pipeline_mode<synchronous>, transform_indices = @transform_6, window_bounds = array<i64: 1, 96>}, {pipeline_mode = #tpu.pipeline_mode<synchronous>, transform_indices = @transform_7, window_bounds = array<i64: 4, 8, 32>}, {pipeline_mode = #tpu.pipeline_mode<synchronous>, transform_indices = @transform_8, window_bounds = array<i64: 1, 32>}, {pipeline_mode = #tpu.pipeline_mode<synchronous>, transform_indices = @transform_9, window_bounds = array<i64: 1, 32>}, {pipeline_mode = #tpu.pipeline_mode<synchronous>, transform_indices = @transform_10, window_bounds = array<i64: 1, 32>}, {pipeline_mode = #tpu.pipeline_mode<synchronous>, transform_indices = @transform_11, window_bounds = array<i64: 32, 64>}, {pipeline_mode = #tpu.pipeline_mode<synchronous>, transform_indices = @transform_12, window_bounds = array<i64: 1, 64>}, {pipeline_mode = #tpu.pipeline_mode<synchronous>, transform_indices = @transform_13, window_bounds = array<i64: 64, 32>}, {pipeline_mode = #tpu.pipeline_mode<synchronous>, transform_indices = @transform_14, window_bounds = array<i64: 1, 32>}, {transform_indices = @transform_15, window_bounds = array<i64: 1, 32, 32>}]} {
    %c0 = arith.constant 0 : index
    %c0_0 = arith.constant 0 : index
    %c0_1 = arith.constant 0 : index
    %0 = vector.load %arg2[%c0, %c0_0, %c0_1] : memref<1x32x32xbf16, #tpu.memory_space<vmem>>, vector<1x32x32xbf16>
    %1 = vector.shape_cast %0 : vector<1x32x32xbf16> to vector<32x32xbf16>
    %2 = arith.extf %1 : vector<32x32xbf16> to vector<32x32xf32>
    %cst = arith.constant dense<0.000000e+00> : vector<32xf32>
    %3 = vector.multi_reduction <add>, %2, %cst [1] : vector<32x32xf32> to vector<32xf32>
    %4 = vector.shape_cast %3 : vector<32xf32> to vector<32x1xf32>
    %cst_2 = arith.constant 3.200000e+01 : f32
    %5 = vector.broadcast %cst_2 : f32 to vector<32x1xf32>
    %6 = arith.divf %4, %5 : vector<32x1xf32>
    %7 = vector.broadcast %6 : vector<32x1xf32> to vector<32x32xf32>
    %8 = arith.subf %2, %7 : vector<32x32xf32>
    %9 = arith.mulf %8, %8 : vector<32x32xf32>
    %cst_3 = arith.constant dense<0.000000e+00> : vector<32xf32>
    %10 = vector.multi_reduction <add>, %9, %cst_3 [1] : vector<32x32xf32> to vector<32xf32>
    %11 = vector.shape_cast %10 : vector<32xf32> to vector<32x1xf32>
    %cst_4 = arith.constant 3.200000e+01 : f32
    %12 = vector.broadcast %cst_4 : f32 to vector<32x1xf32>
    %13 = arith.divf %11, %12 : vector<32x1xf32>
    %14 = vector.broadcast %6 : vector<32x1xf32> to vector<32x32xf32>
    %15 = arith.subf %2, %14 : vector<32x32xf32>
    %cst_5 = arith.constant 9.99999974E-6 : f32
    %16 = vector.broadcast %cst_5 : f32 to vector<32x1xf32>
    %17 = arith.addf %13, %16 : vector<32x1xf32>
    %18 = math.rsqrt %17 : vector<32x1xf32>
    %19 = vector.broadcast %18 : vector<32x1xf32> to vector<32x32xf32>
    %20 = arith.mulf %15, %19 : vector<32x32xf32>
    %c0_6 = arith.constant 0 : index
    %c0_7 = arith.constant 0 : index
    %21 = vector.load %arg5[%c0_6, %c0_7] : memref<1x32xf32, #tpu.memory_space<vmem>>, vector<1x32xf32>
    %22 = vector.broadcast %21 : vector<1x32xf32> to vector<32x32xf32>
    %23 = arith.mulf %20, %22 : vector<32x32xf32>
    %c0_8 = arith.constant 0 : index
    %c0_9 = arith.constant 0 : index
    %24 = vector.load %arg6[%c0_8, %c0_9] : memref<1x32xf32, #tpu.memory_space<vmem>>, vector<1x32xf32>
    %25 = vector.broadcast %24 : vector<1x32xf32> to vector<32x32xf32>
    %26 = arith.addf %23, %25 : vector<32x32xf32>
    %c0_10 = arith.constant 0 : index
    %c0_11 = arith.constant 0 : index
    %27 = vector.load %arg7[%c0_10, %c0_11] : memref<32x96xbf16, #tpu.memory_space<vmem>>, vector<32x96xbf16>
    %28 = arith.truncf %26 : vector<32x32xf32> to vector<32x32xbf16>
    %cst_12 = arith.constant dense<0.000000e+00> : vector<32x96xf32>
    %29 = tpu.matmul %28, %27, %cst_12 {dimension_numbers = #tpu.dot_dimension_numbers<[1], [0], [0], [1], [0, 0, 1, 1], [], []>} : vector<32x32xbf16>, vector<32x96xbf16>, vector<32x96xf32> -> vector<32x96xf32>
    %c0_13 = arith.constant 0 : index
    %c0_14 = arith.constant 0 : index
    %30 = vector.load %arg8[%c0_13, %c0_14] : memref<1x96xf32, #tpu.memory_space<vmem>>, vector<1x96xf32>
    %31 = vector.broadcast %30 : vector<1x96xf32> to vector<32x96xf32>
    %32 = arith.addf %29, %31 : vector<32x96xf32>
    %c0_15 = arith.constant 0 : index
    %c0_16 = arith.constant 0 : index
    %c0_17 = arith.constant 0 : index
    %33 = vector.load %arg4[%c0_15, %c0_16, %c0_17] : memref<2x16x16xf32, #tpu.memory_space<vmem>>, vector<2x16x16xf32>
    %cst_18 = arith.constant 0.000000e+00 : f32
    %34 = vector.broadcast %cst_18 : f32 to vector<32x32xf32>
    %35 = vector.extract_strided_slice %32 {offsets = [0, 0], sizes = [32, 8], strides = [1, 1]} : vector<32x96xf32> to vector<32x8xf32>
    %36 = vector.shape_cast %35 : vector<32x8xf32> to vector<2x16x8xf32>
    %37 = vector.extract_strided_slice %32 {offsets = [0, 32], sizes = [32, 8], strides = [1, 1]} : vector<32x96xf32> to vector<32x8xf32>
    %38 = vector.shape_cast %37 : vector<32x8xf32> to vector<2x16x8xf32>
    %39 = vector.extract_strided_slice %32 {offsets = [0, 64], sizes = [32, 8], strides = [1, 1]} : vector<32x96xf32> to vector<32x8xf32>
    %40 = vector.shape_cast %39 : vector<32x8xf32> to vector<2x16x8xf32>
    %41 = arith.truncf %36 : vector<2x16x8xf32> to vector<2x16x8xbf16>
    %42 = arith.truncf %38 : vector<2x16x8xf32> to vector<2x16x8xbf16>
    %cst_19 = arith.constant dense<0.000000e+00> : vector<2x16x16xf32>
    %43 = tpu.matmul %41, %42, %cst_19 {dimension_numbers = #tpu.dot_dimension_numbers<[2], [2], [1], [1], [0, 0, 0, 1, 1, 1], [0], [0]>} : vector<2x16x8xbf16>, vector<2x16x8xbf16>, vector<2x16x16xf32> -> vector<2x16x16xf32>
    %c0_20 = arith.constant 0 : index
    %c0_21 = arith.constant 0 : index
    %c0_22 = arith.constant 0 : index
    %44 = vector.load %arg3[%c0_20, %c0_21, %c0_22] : memref<4x16x16xf32, #tpu.memory_space<vmem>>, vector<1x16x16xf32>
    %45 = vector.shape_cast %44 : vector<1x16x16xf32> to vector<16x16xf32>
    %46 = vector.shape_cast %45 : vector<16x16xf32> to vector<1x16x16xf32>
    %47 = vector.broadcast %46 : vector<1x16x16xf32> to vector<2x16x16xf32>
    %48 = arith.addf %43, %47 : vector<2x16x16xf32>
    %49 = arith.addf %48, %33 : vector<2x16x16xf32>
    %cst_23 = arith.constant dense<0xFF800000> : vector<2x16xf32>
    %50 = vector.multi_reduction <maximumf>, %49, %cst_23 [2] : vector<2x16x16xf32> to vector<2x16xf32>
    %51 = vector.shape_cast %50 : vector<2x16xf32> to vector<2x16x1xf32>
    %52 = vector.broadcast %51 : vector<2x16x1xf32> to vector<2x16x16xf32>
    %53 = arith.subf %49, %52 : vector<2x16x16xf32>
    %54 = math.exp %53 : vector<2x16x16xf32>
    %cst_24 = arith.constant dense<0.000000e+00> : vector<2x16xf32>
    %55 = vector.multi_reduction <add>, %54, %cst_24 [2] : vector<2x16x16xf32> to vector<2x16xf32>
    %56 = vector.shape_cast %55 : vector<2x16xf32> to vector<2x16x1xf32>
    %57 = tpu.reciprocal %56 {approx = true} : vector<2x16x1xf32> -> vector<2x16x1xf32>
    %58 = vector.broadcast %57 : vector<2x16x1xf32> to vector<2x16x16xf32>
    %59 = arith.mulf %54, %58 : vector<2x16x16xf32>
    %60 = arith.truncf %59 : vector<2x16x16xf32> to vector<2x16x16xbf16>
    %61 = arith.truncf %40 : vector<2x16x8xf32> to vector<2x16x8xbf16>
    %cst_25 = arith.constant dense<0.000000e+00> : vector<2x16x8xf32>
    %62 = tpu.matmul %60, %61, %cst_25 {dimension_numbers = #tpu.dot_dimension_numbers<[2], [1], [1], [2], [0, 0, 0, 1, 1, 2], [0], [0]>} : vector<2x16x16xbf16>, vector<2x16x8xbf16>, vector<2x16x8xf32> -> vector<2x16x8xf32>
    %63 = vector.shape_cast %62 : vector<2x16x8xf32> to vector<32x8xf32>
    %c0_26 = arith.constant 0 : index
    %c0_27 = arith.constant 0 : index
    %c0_28 = arith.constant 0 : index
    %64 = vector.load %arg9[%c0_26, %c0_27, %c0_28] : memref<4x8x32xbf16, #tpu.memory_space<vmem>>, vector<1x8x32xbf16>
    %65 = vector.shape_cast %64 : vector<1x8x32xbf16> to vector<8x32xbf16>
    %66 = arith.truncf %63 : vector<32x8xf32> to vector<32x8xbf16>
    %cst_29 = arith.constant dense<0.000000e+00> : vector<32x32xf32>
    %67 = tpu.matmul %66, %65, %cst_29 {dimension_numbers = #tpu.dot_dimension_numbers<[1], [0], [0], [1], [0, 0, 1, 1], [], []>} : vector<32x8xbf16>, vector<8x32xbf16>, vector<32x32xf32> -> vector<32x32xf32>
    %68 = arith.addf %34, %67 : vector<32x32xf32>
    %69 = vector.extract_strided_slice %32 {offsets = [0, 8], sizes = [32, 8], strides = [1, 1]} : vector<32x96xf32> to vector<32x8xf32>
    %70 = vector.shape_cast %69 : vector<32x8xf32> to vector<2x16x8xf32>
    %71 = vector.extract_strided_slice %32 {offsets = [0, 40], sizes = [32, 8], strides = [1, 1]} : vector<32x96xf32> to vector<32x8xf32>
    %72 = vector.shape_cast %71 : vector<32x8xf32> to vector<2x16x8xf32>
    %73 = vector.extract_strided_slice %32 {offsets = [0, 72], sizes = [32, 8], strides = [1, 1]} : vector<32x96xf32> to vector<32x8xf32>
    %74 = vector.shape_cast %73 : vector<32x8xf32> to vector<2x16x8xf32>
    %75 = arith.truncf %70 : vector<2x16x8xf32> to vector<2x16x8xbf16>
    %76 = arith.truncf %72 : vector<2x16x8xf32> to vector<2x16x8xbf16>
    %cst_30 = arith.constant dense<0.000000e+00> : vector<2x16x16xf32>
    %77 = tpu.matmul %75, %76, %cst_30 {dimension_numbers = #tpu.dot_dimension_numbers<[2], [2], [1], [1], [0, 0, 0, 1, 1, 1], [0], [0]>} : vector<2x16x8xbf16>, vector<2x16x8xbf16>, vector<2x16x16xf32> -> vector<2x16x16xf32>
    %c1 = arith.constant 1 : index
    %c0_31 = arith.constant 0 : index
    %c0_32 = arith.constant 0 : index
    %78 = vector.load %arg3[%c1, %c0_31, %c0_32] : memref<4x16x16xf32, #tpu.memory_space<vmem>>, vector<1x16x16xf32>
    %79 = vector.shape_cast %78 : vector<1x16x16xf32> to vector<16x16xf32>
    %80 = vector.shape_cast %79 : vector<16x16xf32> to vector<1x16x16xf32>
    %81 = vector.broadcast %80 : vector<1x16x16xf32> to vector<2x16x16xf32>
    %82 = arith.addf %77, %81 : vector<2x16x16xf32>
    %83 = arith.addf %82, %33 : vector<2x16x16xf32>
    %cst_33 = arith.constant dense<0xFF800000> : vector<2x16xf32>
    %84 = vector.multi_reduction <maximumf>, %83, %cst_33 [2] : vector<2x16x16xf32> to vector<2x16xf32>
    %85 = vector.shape_cast %84 : vector<2x16xf32> to vector<2x16x1xf32>
    %86 = vector.broadcast %85 : vector<2x16x1xf32> to vector<2x16x16xf32>
    %87 = arith.subf %83, %86 : vector<2x16x16xf32>
    %88 = math.exp %87 : vector<2x16x16xf32>
    %cst_34 = arith.constant dense<0.000000e+00> : vector<2x16xf32>
    %89 = vector.multi_reduction <add>, %88, %cst_34 [2] : vector<2x16x16xf32> to vector<2x16xf32>
    %90 = vector.shape_cast %89 : vector<2x16xf32> to vector<2x16x1xf32>
    %91 = tpu.reciprocal %90 {approx = true} : vector<2x16x1xf32> -> vector<2x16x1xf32>
    %92 = vector.broadcast %91 : vector<2x16x1xf32> to vector<2x16x16xf32>
    %93 = arith.mulf %88, %92 : vector<2x16x16xf32>
    %94 = arith.truncf %93 : vector<2x16x16xf32> to vector<2x16x16xbf16>
    %95 = arith.truncf %74 : vector<2x16x8xf32> to vector<2x16x8xbf16>
    %cst_35 = arith.constant dense<0.000000e+00> : vector<2x16x8xf32>
    %96 = tpu.matmul %94, %95, %cst_35 {dimension_numbers = #tpu.dot_dimension_numbers<[2], [1], [1], [2], [0, 0, 0, 1, 1, 2], [0], [0]>} : vector<2x16x16xbf16>, vector<2x16x8xbf16>, vector<2x16x8xf32> -> vector<2x16x8xf32>
    %97 = vector.shape_cast %96 : vector<2x16x8xf32> to vector<32x8xf32>
    %c1_36 = arith.constant 1 : index
    %c0_37 = arith.constant 0 : index
    %c0_38 = arith.constant 0 : index
    %98 = vector.load %arg9[%c1_36, %c0_37, %c0_38] : memref<4x8x32xbf16, #tpu.memory_space<vmem>>, vector<1x8x32xbf16>
    %99 = vector.shape_cast %98 : vector<1x8x32xbf16> to vector<8x32xbf16>
    %100 = arith.truncf %97 : vector<32x8xf32> to vector<32x8xbf16>
    %cst_39 = arith.constant dense<0.000000e+00> : vector<32x32xf32>
    %101 = tpu.matmul %100, %99, %cst_39 {dimension_numbers = #tpu.dot_dimension_numbers<[1], [0], [0], [1], [0, 0, 1, 1], [], []>} : vector<32x8xbf16>, vector<8x32xbf16>, vector<32x32xf32> -> vector<32x32xf32>
    %102 = arith.addf %68, %101 : vector<32x32xf32>
    %103 = vector.extract_strided_slice %32 {offsets = [0, 16], sizes = [32, 8], strides = [1, 1]} : vector<32x96xf32> to vector<32x8xf32>
    %104 = vector.shape_cast %103 : vector<32x8xf32> to vector<2x16x8xf32>
    %105 = vector.extract_strided_slice %32 {offsets = [0, 48], sizes = [32, 8], strides = [1, 1]} : vector<32x96xf32> to vector<32x8xf32>
    %106 = vector.shape_cast %105 : vector<32x8xf32> to vector<2x16x8xf32>
    %107 = vector.extract_strided_slice %32 {offsets = [0, 80], sizes = [32, 8], strides = [1, 1]} : vector<32x96xf32> to vector<32x8xf32>
    %108 = vector.shape_cast %107 : vector<32x8xf32> to vector<2x16x8xf32>
    %109 = arith.truncf %104 : vector<2x16x8xf32> to vector<2x16x8xbf16>
    %110 = arith.truncf %106 : vector<2x16x8xf32> to vector<2x16x8xbf16>
    %cst_40 = arith.constant dense<0.000000e+00> : vector<2x16x16xf32>
    %111 = tpu.matmul %109, %110, %cst_40 {dimension_numbers = #tpu.dot_dimension_numbers<[2], [2], [1], [1], [0, 0, 0, 1, 1, 1], [0], [0]>} : vector<2x16x8xbf16>, vector<2x16x8xbf16>, vector<2x16x16xf32> -> vector<2x16x16xf32>
    %c2 = arith.constant 2 : index
    %c0_41 = arith.constant 0 : index
    %c0_42 = arith.constant 0 : index
    %112 = vector.load %arg3[%c2, %c0_41, %c0_42] : memref<4x16x16xf32, #tpu.memory_space<vmem>>, vector<1x16x16xf32>
    %113 = vector.shape_cast %112 : vector<1x16x16xf32> to vector<16x16xf32>
    %114 = vector.shape_cast %113 : vector<16x16xf32> to vector<1x16x16xf32>
    %115 = vector.broadcast %114 : vector<1x16x16xf32> to vector<2x16x16xf32>
    %116 = arith.addf %111, %115 : vector<2x16x16xf32>
    %117 = arith.addf %116, %33 : vector<2x16x16xf32>
    %cst_43 = arith.constant dense<0xFF800000> : vector<2x16xf32>
    %118 = vector.multi_reduction <maximumf>, %117, %cst_43 [2] : vector<2x16x16xf32> to vector<2x16xf32>
    %119 = vector.shape_cast %118 : vector<2x16xf32> to vector<2x16x1xf32>
    %120 = vector.broadcast %119 : vector<2x16x1xf32> to vector<2x16x16xf32>
    %121 = arith.subf %117, %120 : vector<2x16x16xf32>
    %122 = math.exp %121 : vector<2x16x16xf32>
    %cst_44 = arith.constant dense<0.000000e+00> : vector<2x16xf32>
    %123 = vector.multi_reduction <add>, %122, %cst_44 [2] : vector<2x16x16xf32> to vector<2x16xf32>
    %124 = vector.shape_cast %123 : vector<2x16xf32> to vector<2x16x1xf32>
    %125 = tpu.reciprocal %124 {approx = true} : vector<2x16x1xf32> -> vector<2x16x1xf32>
    %126 = vector.broadcast %125 : vector<2x16x1xf32> to vector<2x16x16xf32>
    %127 = arith.mulf %122, %126 : vector<2x16x16xf32>
    %128 = arith.truncf %127 : vector<2x16x16xf32> to vector<2x16x16xbf16>
    %129 = arith.truncf %108 : vector<2x16x8xf32> to vector<2x16x8xbf16>
    %cst_45 = arith.constant dense<0.000000e+00> : vector<2x16x8xf32>
    %130 = tpu.matmul %128, %129, %cst_45 {dimension_numbers = #tpu.dot_dimension_numbers<[2], [1], [1], [2], [0, 0, 0, 1, 1, 2], [0], [0]>} : vector<2x16x16xbf16>, vector<2x16x8xbf16>, vector<2x16x8xf32> -> vector<2x16x8xf32>
    %131 = vector.shape_cast %130 : vector<2x16x8xf32> to vector<32x8xf32>
    %c2_46 = arith.constant 2 : index
    %c0_47 = arith.constant 0 : index
    %c0_48 = arith.constant 0 : index
    %132 = vector.load %arg9[%c2_46, %c0_47, %c0_48] : memref<4x8x32xbf16, #tpu.memory_space<vmem>>, vector<1x8x32xbf16>
    %133 = vector.shape_cast %132 : vector<1x8x32xbf16> to vector<8x32xbf16>
    %134 = arith.truncf %131 : vector<32x8xf32> to vector<32x8xbf16>
    %cst_49 = arith.constant dense<0.000000e+00> : vector<32x32xf32>
    %135 = tpu.matmul %134, %133, %cst_49 {dimension_numbers = #tpu.dot_dimension_numbers<[1], [0], [0], [1], [0, 0, 1, 1], [], []>} : vector<32x8xbf16>, vector<8x32xbf16>, vector<32x32xf32> -> vector<32x32xf32>
    %136 = arith.addf %102, %135 : vector<32x32xf32>
    %137 = vector.extract_strided_slice %32 {offsets = [0, 24], sizes = [32, 8], strides = [1, 1]} : vector<32x96xf32> to vector<32x8xf32>
    %138 = vector.shape_cast %137 : vector<32x8xf32> to vector<2x16x8xf32>
    %139 = vector.extract_strided_slice %32 {offsets = [0, 56], sizes = [32, 8], strides = [1, 1]} : vector<32x96xf32> to vector<32x8xf32>
    %140 = vector.shape_cast %139 : vector<32x8xf32> to vector<2x16x8xf32>
    %141 = vector.extract_strided_slice %32 {offsets = [0, 88], sizes = [32, 8], strides = [1, 1]} : vector<32x96xf32> to vector<32x8xf32>
    %142 = vector.shape_cast %141 : vector<32x8xf32> to vector<2x16x8xf32>
    %143 = arith.truncf %138 : vector<2x16x8xf32> to vector<2x16x8xbf16>
    %144 = arith.truncf %140 : vector<2x16x8xf32> to vector<2x16x8xbf16>
    %cst_50 = arith.constant dense<0.000000e+00> : vector<2x16x16xf32>
    %145 = tpu.matmul %143, %144, %cst_50 {dimension_numbers = #tpu.dot_dimension_numbers<[2], [2], [1], [1], [0, 0, 0, 1, 1, 1], [0], [0]>} : vector<2x16x8xbf16>, vector<2x16x8xbf16>, vector<2x16x16xf32> -> vector<2x16x16xf32>
    %c3 = arith.constant 3 : index
    %c0_51 = arith.constant 0 : index
    %c0_52 = arith.constant 0 : index
    %146 = vector.load %arg3[%c3, %c0_51, %c0_52] : memref<4x16x16xf32, #tpu.memory_space<vmem>>, vector<1x16x16xf32>
    %147 = vector.shape_cast %146 : vector<1x16x16xf32> to vector<16x16xf32>
    %148 = vector.shape_cast %147 : vector<16x16xf32> to vector<1x16x16xf32>
    %149 = vector.broadcast %148 : vector<1x16x16xf32> to vector<2x16x16xf32>
    %150 = arith.addf %145, %149 : vector<2x16x16xf32>
    %151 = arith.addf %150, %33 : vector<2x16x16xf32>
    %cst_53 = arith.constant dense<0xFF800000> : vector<2x16xf32>
    %152 = vector.multi_reduction <maximumf>, %151, %cst_53 [2] : vector<2x16x16xf32> to vector<2x16xf32>
    %153 = vector.shape_cast %152 : vector<2x16xf32> to vector<2x16x1xf32>
    %154 = vector.broadcast %153 : vector<2x16x1xf32> to vector<2x16x16xf32>
    %155 = arith.subf %151, %154 : vector<2x16x16xf32>
    %156 = math.exp %155 : vector<2x16x16xf32>
    %cst_54 = arith.constant dense<0.000000e+00> : vector<2x16xf32>
    %157 = vector.multi_reduction <add>, %156, %cst_54 [2] : vector<2x16x16xf32> to vector<2x16xf32>
    %158 = vector.shape_cast %157 : vector<2x16xf32> to vector<2x16x1xf32>
    %159 = tpu.reciprocal %158 {approx = true} : vector<2x16x1xf32> -> vector<2x16x1xf32>
    %160 = vector.broadcast %159 : vector<2x16x1xf32> to vector<2x16x16xf32>
    %161 = arith.mulf %156, %160 : vector<2x16x16xf32>
    %162 = arith.truncf %161 : vector<2x16x16xf32> to vector<2x16x16xbf16>
    %163 = arith.truncf %142 : vector<2x16x8xf32> to vector<2x16x8xbf16>
    %cst_55 = arith.constant dense<0.000000e+00> : vector<2x16x8xf32>
    %164 = tpu.matmul %162, %163, %cst_55 {dimension_numbers = #tpu.dot_dimension_numbers<[2], [1], [1], [2], [0, 0, 0, 1, 1, 2], [0], [0]>} : vector<2x16x16xbf16>, vector<2x16x8xbf16>, vector<2x16x8xf32> -> vector<2x16x8xf32>
    %165 = vector.shape_cast %164 : vector<2x16x8xf32> to vector<32x8xf32>
    %c3_56 = arith.constant 3 : index
    %c0_57 = arith.constant 0 : index
    %c0_58 = arith.constant 0 : index
    %166 = vector.load %arg9[%c3_56, %c0_57, %c0_58] : memref<4x8x32xbf16, #tpu.memory_space<vmem>>, vector<1x8x32xbf16>
    %167 = vector.shape_cast %166 : vector<1x8x32xbf16> to vector<8x32xbf16>
    %168 = arith.truncf %165 : vector<32x8xf32> to vector<32x8xbf16>
    %cst_59 = arith.constant dense<0.000000e+00> : vector<32x32xf32>
    %169 = tpu.matmul %168, %167, %cst_59 {dimension_numbers = #tpu.dot_dimension_numbers<[1], [0], [0], [1], [0, 0, 1, 1], [], []>} : vector<32x8xbf16>, vector<8x32xbf16>, vector<32x32xf32> -> vector<32x32xf32>
    %170 = arith.addf %136, %169 : vector<32x32xf32>
    %171 = arith.addf %2, %170 : vector<32x32xf32>
    %c0_60 = arith.constant 0 : index
    %c0_61 = arith.constant 0 : index
    %172 = vector.load %arg10[%c0_60, %c0_61] : memref<1x32xf32, #tpu.memory_space<vmem>>, vector<1x32xf32>
    %173 = vector.broadcast %172 : vector<1x32xf32> to vector<32x32xf32>
    %174 = arith.addf %171, %173 : vector<32x32xf32>
    %cst_62 = arith.constant dense<0.000000e+00> : vector<32xf32>
    %175 = vector.multi_reduction <add>, %174, %cst_62 [1] : vector<32x32xf32> to vector<32xf32>
    %176 = vector.shape_cast %175 : vector<32xf32> to vector<32x1xf32>
    %cst_63 = arith.constant 3.200000e+01 : f32
    %177 = vector.broadcast %cst_63 : f32 to vector<32x1xf32>
    %178 = arith.divf %176, %177 : vector<32x1xf32>
    %179 = vector.broadcast %178 : vector<32x1xf32> to vector<32x32xf32>
    %180 = arith.subf %174, %179 : vector<32x32xf32>
    %181 = arith.mulf %180, %180 : vector<32x32xf32>
    %cst_64 = arith.constant dense<0.000000e+00> : vector<32xf32>
    %182 = vector.multi_reduction <add>, %181, %cst_64 [1] : vector<32x32xf32> to vector<32xf32>
    %183 = vector.shape_cast %182 : vector<32xf32> to vector<32x1xf32>
    %cst_65 = arith.constant 3.200000e+01 : f32
    %184 = vector.broadcast %cst_65 : f32 to vector<32x1xf32>
    %185 = arith.divf %183, %184 : vector<32x1xf32>
    %186 = vector.broadcast %178 : vector<32x1xf32> to vector<32x32xf32>
    %187 = arith.subf %174, %186 : vector<32x32xf32>
    %cst_66 = arith.constant 9.99999974E-6 : f32
    %188 = vector.broadcast %cst_66 : f32 to vector<32x1xf32>
    %189 = arith.addf %185, %188 : vector<32x1xf32>
    %190 = math.rsqrt %189 : vector<32x1xf32>
    %191 = vector.broadcast %190 : vector<32x1xf32> to vector<32x32xf32>
    %192 = arith.mulf %187, %191 : vector<32x32xf32>
    %c0_67 = arith.constant 0 : index
    %c0_68 = arith.constant 0 : index
    %193 = vector.load %arg11[%c0_67, %c0_68] : memref<1x32xf32, #tpu.memory_space<vmem>>, vector<1x32xf32>
    %194 = vector.broadcast %193 : vector<1x32xf32> to vector<32x32xf32>
    %195 = arith.mulf %192, %194 : vector<32x32xf32>
    %c0_69 = arith.constant 0 : index
    %c0_70 = arith.constant 0 : index
    %196 = vector.load %arg12[%c0_69, %c0_70] : memref<1x32xf32, #tpu.memory_space<vmem>>, vector<1x32xf32>
    %197 = vector.broadcast %196 : vector<1x32xf32> to vector<32x32xf32>
    %198 = arith.addf %195, %197 : vector<32x32xf32>
    %c0_71 = arith.constant 0 : index
    %c0_72 = arith.constant 0 : index
    %199 = vector.load %arg13[%c0_71, %c0_72] : memref<32x64xbf16, #tpu.memory_space<vmem>>, vector<32x64xbf16>
    %200 = arith.truncf %198 : vector<32x32xf32> to vector<32x32xbf16>
    %cst_73 = arith.constant dense<0.000000e+00> : vector<32x64xf32>
    %201 = tpu.matmul %200, %199, %cst_73 {dimension_numbers = #tpu.dot_dimension_numbers<[1], [0], [0], [1], [0, 0, 1, 1], [], []>} : vector<32x32xbf16>, vector<32x64xbf16>, vector<32x64xf32> -> vector<32x64xf32>
    %c0_74 = arith.constant 0 : index
    %c0_75 = arith.constant 0 : index
    %202 = vector.load %arg14[%c0_74, %c0_75] : memref<1x64xf32, #tpu.memory_space<vmem>>, vector<1x64xf32>
    %203 = vector.broadcast %202 : vector<1x64xf32> to vector<32x64xf32>
    %204 = arith.addf %201, %203 : vector<32x64xf32>
    %cst_76 = arith.constant 5.000000e-01 : f32
    %205 = vector.broadcast %cst_76 : f32 to vector<32x64xf32>
    %206 = arith.mulf %205, %204 : vector<32x64xf32>
    %cst_77 = arith.constant 4.471500e-02 : f32
    %207 = vector.broadcast %cst_77 : f32 to vector<32x64xf32>
    %208 = arith.mulf %207, %204 : vector<32x64xf32>
    %209 = arith.mulf %208, %204 : vector<32x64xf32>
    %210 = arith.mulf %209, %204 : vector<32x64xf32>
    %211 = arith.addf %204, %210 : vector<32x64xf32>
    %cst_78 = arith.constant 0.797884583 : f32
    %212 = vector.broadcast %cst_78 : f32 to vector<32x64xf32>
    %213 = arith.mulf %212, %211 : vector<32x64xf32>
    %214 = math.tanh %213 : vector<32x64xf32>
    %cst_79 = arith.constant 1.000000e+00 : f32
    %215 = vector.broadcast %cst_79 : f32 to vector<32x64xf32>
    %216 = arith.addf %215, %214 : vector<32x64xf32>
    %217 = arith.mulf %206, %216 : vector<32x64xf32>
    %c0_80 = arith.constant 0 : index
    %c0_81 = arith.constant 0 : index
    %218 = vector.load %arg15[%c0_80, %c0_81] : memref<64x32xbf16, #tpu.memory_space<vmem>>, vector<64x32xbf16>
    %219 = arith.truncf %217 : vector<32x64xf32> to vector<32x64xbf16>
    %cst_82 = arith.constant dense<0.000000e+00> : vector<32x32xf32>
    %220 = tpu.matmul %219, %218, %cst_82 {dimension_numbers = #tpu.dot_dimension_numbers<[1], [0], [0], [1], [0, 0, 1, 1], [], []>} : vector<32x64xbf16>, vector<64x32xbf16>, vector<32x32xf32> -> vector<32x32xf32>
    %c0_83 = arith.constant 0 : index
    %c0_84 = arith.constant 0 : index
    %221 = vector.load %arg16[%c0_83, %c0_84] : memref<1x32xf32, #tpu.memory_space<vmem>>, vector<1x32xf32>
    %222 = vector.broadcast %221 : vector<1x32xf32> to vector<32x32xf32>
    %223 = arith.addf %220, %222 : vector<32x32xf32>
    %224 = arith.addf %174, %223 : vector<32x32xf32>
    %225 = arith.truncf %224 : vector<32x32xf32> to vector<32x32xbf16>
    %c0_85 = arith.constant 0 : index
    %c0_86 = arith.constant 0 : index
    %c0_87 = arith.constant 0 : index
    %226 = vector.load %arg17[%c0_85, %c0_86, %c0_87] : memref<1x32x32xbf16, #tpu.memory_space<vmem>>, vector<1x32x32xbf16>
    %227 = vector.shape_cast %226 : vector<1x32x32xbf16> to vector<32x32xbf16>
    %228 = vector.shape_cast %225 : vector<32x32xbf16> to vector<1x32x32xbf16>
    tpu.vector_store %arg17[%c0_85, %c0_86, %c0_87], %228 {strides = array<i32>} : memref<1x32x32xbf16, #tpu.memory_space<vmem>>, vector<1x32x32xbf16>,
    return
  }
  func.func @transform_0(%arg0: i32, %arg1: i32) -> (i32, i32, i32) {
    %c0_i32 = arith.constant 0 : i32
    %c0_i32_0 = arith.constant 0 : i32
    return %arg0, %arg1, %c0_i32 : i32, i32, i32
  }
  func.func @transform_1(%arg0: i32, %arg1: i32) -> (i32, i32, i32) {
    %c0_i32 = arith.constant 0 : i32
    %c0_i32_0 = arith.constant 0 : i32
    %c0_i32_1 = arith.constant 0 : i32
    %c0_i32_2 = arith.constant 0 : i32
    return %c0_i32, %c0_i32_0, %c0_i32_1 : i32, i32, i32
  }
  func.func @transform_2(%arg0: i32, %arg1: i32) -> (i32, i32, i32) {
    %c0_i32 = arith.constant 0 : i32
    %c0_i32_0 = arith.constant 0 : i32
    %c0_i32_1 = arith.constant 0 : i32
    return %arg1, %c0_i32, %c0_i32_0 : i32, i32, i32
  }
  func.func @transform_3(%arg0: i32, %arg1: i32) -> (i32, i32) {
    %c0_i32 = arith.constant 0 : i32
    %c0_i32_0 = arith.constant 0 : i32
    %c0_i32_1 = arith.constant 0 : i32
    return %c0_i32, %c0_i32_0 : i32, i32
  }
  func.func @transform_4(%arg0: i32, %arg1: i32) -> (i32, i32) {
    %c0_i32 = arith.constant 0 : i32
    %c0_i32_0 = arith.constant 0 : i32
    %c0_i32_1 = arith.constant 0 : i32
    return %c0_i32, %c0_i32_0 : i32, i32
  }
  func.func @transform_5(%arg0: i32, %arg1: i32) -> (i32, i32) {
    %c0_i32 = arith.constant 0 : i32
    %c0_i32_0 = arith.constant 0 : i32
    %c0_i32_1 = arith.constant 0 : i32
    return %c0_i32, %c0_i32_0 : i32, i32
  }
  func.func @transform_6(%arg0: i32, %arg1: i32) -> (i32, i32) {
    %c0_i32 = arith.constant 0 : i32
    %c0_i32_0 = arith.constant 0 : i32
    %c0_i32_1 = arith.constant 0 : i32
    return %c0_i32, %c0_i32_0 : i32, i32
  }
  func.func @transform_7(%arg0: i32, %arg1: i32) -> (i32, i32, i32) {
    %c0_i32 = arith.constant 0 : i32
    %c0_i32_0 = arith.constant 0 : i32
    %c0_i32_1 = arith.constant 0 : i32
    %c0_i32_2 = arith.constant 0 : i32
    return %c0_i32, %c0_i32_0, %c0_i32_1 : i32, i32, i32
  }
  func.func @transform_8(%arg0: i32, %arg1: i32) -> (i32, i32) {
    %c0_i32 = arith.constant 0 : i32
    %c0_i32_0 = arith.constant 0 : i32
    %c0_i32_1 = arith.constant 0 : i32
    return %c0_i32, %c0_i32_0 : i32, i32
  }
  func.func @transform_9(%arg0: i32, %arg1: i32) -> (i32, i32) {
    %c0_i32 = arith.constant 0 : i32
    %c0_i32_0 = arith.constant 0 : i32
    %c0_i32_1 = arith.constant 0 : i32
    return %c0_i32, %c0_i32_0 : i32, i32
  }
  func.func @transform_10(%arg0: i32, %arg1: i32) -> (i32, i32) {
    %c0_i32 = arith.constant 0 : i32
    %c0_i32_0 = arith.constant 0 : i32
    %c0_i32_1 = arith.constant 0 : i32
    return %c0_i32, %c0_i32_0 : i32, i32
  }
  func.func @transform_11(%arg0: i32, %arg1: i32) -> (i32, i32) {
    %c0_i32 = arith.constant 0 : i32
    %c0_i32_0 = arith.constant 0 : i32
    %c0_i32_1 = arith.constant 0 : i32
    return %c0_i32, %c0_i32_0 : i32, i32
  }
  func.func @transform_12(%arg0: i32, %arg1: i32) -> (i32, i32) {
    %c0_i32 = arith.constant 0 : i32
    %c0_i32_0 = arith.constant 0 : i32
    %c0_i32_1 = arith.constant 0 : i32
    return %c0_i32, %c0_i32_0 : i32, i32
  }
  func.func @transform_13(%arg0: i32, %arg1: i32) -> (i32, i32) {
    %c0_i32 = arith.constant 0 : i32
    %c0_i32_0 = arith.constant 0 : i32
    %c0_i32_1 = arith.constant 0 : i32
    return %c0_i32, %c0_i32_0 : i32, i32
  }
  func.func @transform_14(%arg0: i32, %arg1: i32) -> (i32, i32) {
    %c0_i32 = arith.constant 0 : i32
    %c0_i32_0 = arith.constant 0 : i32
    %c0_i32_1 = arith.constant 0 : i32
    return %c0_i32, %c0_i32_0 : i32, i32
  }
  func.func @transform_15(%arg0: i32, %arg1: i32) -> (i32, i32, i32) {
    %c0_i32 = arith.constant 0 : i32
    %c0_i32_0 = arith.constant 0 : i32
    return %arg0, %arg1, %c0_i32 : i32, i32, i32
  }
}

module attributes {stable_mosaic.version = 11 : i64} {
  func.func @kernel(%arg0: i32, %arg1: i32, %arg2: memref<1x64x16xbf16, #tpu.memory_space<vmem>>, %arg3: memref<2x16x16xf32, #tpu.memory_space<vmem>>, %arg4: memref<4x16x16xf32, #tpu.memory_space<vmem>>, %arg5: memref<1x16xf32, #tpu.memory_space<vmem>>, %arg6: memref<1x16xf32, #tpu.memory_space<vmem>>, %arg7: memref<16x48xbf16, #tpu.memory_space<vmem>>, %arg8: memref<1x48xf32, #tpu.memory_space<vmem>>, %arg9: memref<2x8x16xbf16, #tpu.memory_space<vmem>>, %arg10: memref<1x16xf32, #tpu.memory_space<vmem>>, %arg11: memref<1x16xf32, #tpu.memory_space<vmem>>, %arg12: memref<1x16xf32, #tpu.memory_space<vmem>>, %arg13: memref<16x32xbf16, #tpu.memory_space<vmem>>, %arg14: memref<1x32xf32, #tpu.memory_space<vmem>>, %arg15: memref<32x16xbf16, #tpu.memory_space<vmem>>, %arg16: memref<1x16xf32, #tpu.memory_space<vmem>>, %arg17: memref<1x64x16xbf16, #tpu.memory_space<vmem>>) attributes {dimension_semantics = [#tpu.dimension_semantics<parallel>, #tpu.dimension_semantics<parallel>], iteration_bounds = array<i64: 2, 1>, scalar_prefetch = 0 : i64, scratch_operands = 0 : i64, tpu.core_type = #tpu.core_type<tc>, window_params = [{transform_indices = @transform_0, window_bounds = array<i64: 1, 64, 16>}, {pipeline_mode = #tpu.pipeline_mode<synchronous>, transform_indices = @transform_1, window_bounds = array<i64: 2, 16, 16>}, {transform_indices = @transform_2, window_bounds = array<i64: 4, 16, 16>}, {pipeline_mode = #tpu.pipeline_mode<synchronous>, transform_indices = @transform_3, window_bounds = array<i64: 1, 16>}, {pipeline_mode = #tpu.pipeline_mode<synchronous>, transform_indices = @transform_4, window_bounds = array<i64: 1, 16>}, {pipeline_mode = #tpu.pipeline_mode<synchronous>, transform_indices = @transform_5, window_bounds = array<i64: 16, 48>}, {pipeline_mode = #tpu.pipeline_mode<synchronous>, transform_indices = @transform_6, window_bounds = array<i64: 1, 48>}, {pipeline_mode = #tpu.pipeline_mode<synchronous>, transform_indices = @transform_7, window_bounds = array<i64: 2, 8, 16>}, {pipeline_mode = #tpu.pipeline_mode<synchronous>, transform_indices = @transform_8, window_bounds = array<i64: 1, 16>}, {pipeline_mode = #tpu.pipeline_mode<synchronous>, transform_indices = @transform_9, window_bounds = array<i64: 1, 16>}, {pipeline_mode = #tpu.pipeline_mode<synchronous>, transform_indices = @transform_10, window_bounds = array<i64: 1, 16>}, {pipeline_mode = #tpu.pipeline_mode<synchronous>, transform_indices = @transform_11, window_bounds = array<i64: 16, 32>}, {pipeline_mode = #tpu.pipeline_mode<synchronous>, transform_indices = @transform_12, window_bounds = array<i64: 1, 32>}, {pipeline_mode = #tpu.pipeline_mode<synchronous>, transform_indices = @transform_13, window_bounds = array<i64: 32, 16>}, {pipeline_mode = #tpu.pipeline_mode<synchronous>, transform_indices = @transform_14, window_bounds = array<i64: 1, 16>}, {transform_indices = @transform_15, window_bounds = array<i64: 1, 64, 16>}]} {
    %c0 = arith.constant 0 : index
    %c0_0 = arith.constant 0 : index
    %c0_1 = arith.constant 0 : index
    %0 = vector.load %arg2[%c0, %c0_0, %c0_1] : memref<1x64x16xbf16, #tpu.memory_space<vmem>>, vector<1x64x16xbf16>
    %1 = vector.shape_cast %0 : vector<1x64x16xbf16> to vector<64x16xbf16>
    %2 = arith.extf %1 : vector<64x16xbf16> to vector<64x16xf32>
    %cst = arith.constant dense<0.000000e+00> : vector<64xf32>
    %3 = vector.multi_reduction <add>, %2, %cst [1] : vector<64x16xf32> to vector<64xf32>
    %4 = vector.shape_cast %3 : vector<64xf32> to vector<64x1xf32>
    %cst_2 = arith.constant 1.600000e+01 : f32
    %5 = vector.broadcast %cst_2 : f32 to vector<64x1xf32>
    %6 = arith.divf %4, %5 : vector<64x1xf32>
    %7 = vector.broadcast %6 : vector<64x1xf32> to vector<64x16xf32>
    %8 = arith.subf %2, %7 : vector<64x16xf32>
    %9 = arith.mulf %8, %8 : vector<64x16xf32>
    %cst_3 = arith.constant dense<0.000000e+00> : vector<64xf32>
    %10 = vector.multi_reduction <add>, %9, %cst_3 [1] : vector<64x16xf32> to vector<64xf32>
    %11 = vector.shape_cast %10 : vector<64xf32> to vector<64x1xf32>
    %cst_4 = arith.constant 1.600000e+01 : f32
    %12 = vector.broadcast %cst_4 : f32 to vector<64x1xf32>
    %13 = arith.divf %11, %12 : vector<64x1xf32>
    %14 = vector.broadcast %6 : vector<64x1xf32> to vector<64x16xf32>
    %15 = arith.subf %2, %14 : vector<64x16xf32>
    %cst_5 = arith.constant 9.99999974E-6 : f32
    %16 = vector.broadcast %cst_5 : f32 to vector<64x1xf32>
    %17 = arith.addf %13, %16 : vector<64x1xf32>
    %18 = math.rsqrt %17 : vector<64x1xf32>
    %19 = vector.broadcast %18 : vector<64x1xf32> to vector<64x16xf32>
    %20 = arith.mulf %15, %19 : vector<64x16xf32>
    %c0_6 = arith.constant 0 : index
    %c0_7 = arith.constant 0 : index
    %21 = vector.load %arg5[%c0_6, %c0_7] : memref<1x16xf32, #tpu.memory_space<vmem>>, vector<1x16xf32>
    %22 = vector.broadcast %21 : vector<1x16xf32> to vector<64x16xf32>
    %23 = arith.mulf %20, %22 : vector<64x16xf32>
    %c0_8 = arith.constant 0 : index
    %c0_9 = arith.constant 0 : index
    %24 = vector.load %arg6[%c0_8, %c0_9] : memref<1x16xf32, #tpu.memory_space<vmem>>, vector<1x16xf32>
    %25 = vector.broadcast %24 : vector<1x16xf32> to vector<64x16xf32>
    %26 = arith.addf %23, %25 : vector<64x16xf32>
    %c0_10 = arith.constant 0 : index
    %c0_11 = arith.constant 0 : index
    %27 = vector.load %arg7[%c0_10, %c0_11] : memref<16x48xbf16, #tpu.memory_space<vmem>>, vector<16x48xbf16>
    %28 = arith.truncf %26 : vector<64x16xf32> to vector<64x16xbf16>
    %cst_12 = arith.constant dense<0.000000e+00> : vector<64x48xf32>
    %29 = tpu.matmul %28, %27, %cst_12 {dimension_numbers = #tpu.dot_dimension_numbers<[1], [0], [0], [1], [0, 0, 1, 1], [], []>} : vector<64x16xbf16>, vector<16x48xbf16>, vector<64x48xf32> -> vector<64x48xf32>
    %c0_13 = arith.constant 0 : index
    %c0_14 = arith.constant 0 : index
    %30 = vector.load %arg8[%c0_13, %c0_14] : memref<1x48xf32, #tpu.memory_space<vmem>>, vector<1x48xf32>
    %31 = vector.broadcast %30 : vector<1x48xf32> to vector<64x48xf32>
    %32 = arith.addf %29, %31 : vector<64x48xf32>
    %c0_15 = arith.constant 0 : index
    %c0_16 = arith.constant 0 : index
    %c0_17 = arith.constant 0 : index
    %33 = vector.load %arg4[%c0_15, %c0_16, %c0_17] : memref<4x16x16xf32, #tpu.memory_space<vmem>>, vector<4x16x16xf32>
    %cst_18 = arith.constant 0.000000e+00 : f32
    %34 = vector.broadcast %cst_18 : f32 to vector<64x16xf32>
    %35 = vector.extract_strided_slice %32 {offsets = [0, 0], sizes = [64, 8], strides = [1, 1]} : vector<64x48xf32> to vector<64x8xf32>
    %36 = vector.shape_cast %35 : vector<64x8xf32> to vector<4x16x8xf32>
    %37 = vector.extract_strided_slice %32 {offsets = [0, 16], sizes = [64, 8], strides = [1, 1]} : vector<64x48xf32> to vector<64x8xf32>
    %38 = vector.shape_cast %37 : vector<64x8xf32> to vector<4x16x8xf32>
    %39 = vector.extract_strided_slice %32 {offsets = [0, 32], sizes = [64, 8], strides = [1, 1]} : vector<64x48xf32> to vector<64x8xf32>
    %40 = vector.shape_cast %39 : vector<64x8xf32> to vector<4x16x8xf32>
    %41 = arith.truncf %36 : vector<4x16x8xf32> to vector<4x16x8xbf16>
    %42 = arith.truncf %38 : vector<4x16x8xf32> to vector<4x16x8xbf16>
    %cst_19 = arith.constant dense<0.000000e+00> : vector<4x16x16xf32>
    %43 = tpu.matmul %41, %42, %cst_19 {dimension_numbers = #tpu.dot_dimension_numbers<[2], [2], [1], [1], [0, 0, 0, 1, 1, 1], [0], [0]>} : vector<4x16x8xbf16>, vector<4x16x8xbf16>, vector<4x16x16xf32> -> vector<4x16x16xf32>
    %c0_20 = arith.constant 0 : index
    %c0_21 = arith.constant 0 : index
    %c0_22 = arith.constant 0 : index
    %44 = vector.load %arg3[%c0_20, %c0_21, %c0_22] : memref<2x16x16xf32, #tpu.memory_space<vmem>>, vector<1x16x16xf32>
    %45 = vector.shape_cast %44 : vector<1x16x16xf32> to vector<16x16xf32>
    %46 = vector.shape_cast %45 : vector<16x16xf32> to vector<1x16x16xf32>
    %47 = vector.broadcast %46 : vector<1x16x16xf32> to vector<4x16x16xf32>
    %48 = arith.addf %43, %47 : vector<4x16x16xf32>
    %49 = arith.addf %48, %33 : vector<4x16x16xf32>
    %cst_23 = arith.constant dense<0xFF800000> : vector<4x16xf32>
    %50 = vector.multi_reduction <maximumf>, %49, %cst_23 [2] : vector<4x16x16xf32> to vector<4x16xf32>
    %51 = vector.shape_cast %50 : vector<4x16xf32> to vector<4x16x1xf32>
    %52 = vector.broadcast %51 : vector<4x16x1xf32> to vector<4x16x16xf32>
    %53 = arith.subf %49, %52 : vector<4x16x16xf32>
    %54 = math.exp %53 : vector<4x16x16xf32>
    %cst_24 = arith.constant dense<0.000000e+00> : vector<4x16xf32>
    %55 = vector.multi_reduction <add>, %54, %cst_24 [2] : vector<4x16x16xf32> to vector<4x16xf32>
    %56 = vector.shape_cast %55 : vector<4x16xf32> to vector<4x16x1xf32>
    %57 = tpu.reciprocal %56 {approx = true} : vector<4x16x1xf32> -> vector<4x16x1xf32>
    %58 = vector.broadcast %57 : vector<4x16x1xf32> to vector<4x16x16xf32>
    %59 = arith.mulf %54, %58 : vector<4x16x16xf32>
    %60 = arith.truncf %59 : vector<4x16x16xf32> to vector<4x16x16xbf16>
    %61 = arith.truncf %40 : vector<4x16x8xf32> to vector<4x16x8xbf16>
    %cst_25 = arith.constant dense<0.000000e+00> : vector<4x16x8xf32>
    %62 = tpu.matmul %60, %61, %cst_25 {dimension_numbers = #tpu.dot_dimension_numbers<[2], [1], [1], [2], [0, 0, 0, 1, 1, 2], [0], [0]>} : vector<4x16x16xbf16>, vector<4x16x8xbf16>, vector<4x16x8xf32> -> vector<4x16x8xf32>
    %63 = vector.shape_cast %62 : vector<4x16x8xf32> to vector<64x8xf32>
    %c0_26 = arith.constant 0 : index
    %c0_27 = arith.constant 0 : index
    %c0_28 = arith.constant 0 : index
    %64 = vector.load %arg9[%c0_26, %c0_27, %c0_28] : memref<2x8x16xbf16, #tpu.memory_space<vmem>>, vector<1x8x16xbf16>
    %65 = vector.shape_cast %64 : vector<1x8x16xbf16> to vector<8x16xbf16>
    %66 = arith.truncf %63 : vector<64x8xf32> to vector<64x8xbf16>
    %cst_29 = arith.constant dense<0.000000e+00> : vector<64x16xf32>
    %67 = tpu.matmul %66, %65, %cst_29 {dimension_numbers = #tpu.dot_dimension_numbers<[1], [0], [0], [1], [0, 0, 1, 1], [], []>} : vector<64x8xbf16>, vector<8x16xbf16>, vector<64x16xf32> -> vector<64x16xf32>
    %68 = arith.addf %34, %67 : vector<64x16xf32>
    %69 = vector.extract_strided_slice %32 {offsets = [0, 8], sizes = [64, 8], strides = [1, 1]} : vector<64x48xf32> to vector<64x8xf32>
    %70 = vector.shape_cast %69 : vector<64x8xf32> to vector<4x16x8xf32>
    %71 = vector.extract_strided_slice %32 {offsets = [0, 24], sizes = [64, 8], strides = [1, 1]} : vector<64x48xf32> to vector<64x8xf32>
    %72 = vector.shape_cast %71 : vector<64x8xf32> to vector<4x16x8xf32>
    %73 = vector.extract_strided_slice %32 {offsets = [0, 40], sizes = [64, 8], strides = [1, 1]} : vector<64x48xf32> to vector<64x8xf32>
    %74 = vector.shape_cast %73 : vector<64x8xf32> to vector<4x16x8xf32>
    %75 = arith.truncf %70 : vector<4x16x8xf32> to vector<4x16x8xbf16>
    %76 = arith.truncf %72 : vector<4x16x8xf32> to vector<4x16x8xbf16>
    %cst_30 = arith.constant dense<0.000000e+00> : vector<4x16x16xf32>
    %77 = tpu.matmul %75, %76, %cst_30 {dimension_numbers = #tpu.dot_dimension_numbers<[2], [2], [1], [1], [0, 0, 0, 1, 1, 1], [0], [0]>} : vector<4x16x8xbf16>, vector<4x16x8xbf16>, vector<4x16x16xf32> -> vector<4x16x16xf32>
    %c1 = arith.constant 1 : index
    %c0_31 = arith.constant 0 : index
    %c0_32 = arith.constant 0 : index
    %78 = vector.load %arg3[%c1, %c0_31, %c0_32] : memref<2x16x16xf32, #tpu.memory_space<vmem>>, vector<1x16x16xf32>
    %79 = vector.shape_cast %78 : vector<1x16x16xf32> to vector<16x16xf32>
    %80 = vector.shape_cast %79 : vector<16x16xf32> to vector<1x16x16xf32>
    %81 = vector.broadcast %80 : vector<1x16x16xf32> to vector<4x16x16xf32>
    %82 = arith.addf %77, %81 : vector<4x16x16xf32>
    %83 = arith.addf %82, %33 : vector<4x16x16xf32>
    %cst_33 = arith.constant dense<0xFF800000> : vector<4x16xf32>
    %84 = vector.multi_reduction <maximumf>, %83, %cst_33 [2] : vector<4x16x16xf32> to vector<4x16xf32>
    %85 = vector.shape_cast %84 : vector<4x16xf32> to vector<4x16x1xf32>
    %86 = vector.broadcast %85 : vector<4x16x1xf32> to vector<4x16x16xf32>
    %87 = arith.subf %83, %86 : vector<4x16x16xf32>
    %88 = math.exp %87 : vector<4x16x16xf32>
    %cst_34 = arith.constant dense<0.000000e+00> : vector<4x16xf32>
    %89 = vector.multi_reduction <add>, %88, %cst_34 [2] : vector<4x16x16xf32> to vector<4x16xf32>
    %90 = vector.shape_cast %89 : vector<4x16xf32> to vector<4x16x1xf32>
    %91 = tpu.reciprocal %90 {approx = true} : vector<4x16x1xf32> -> vector<4x16x1xf32>
    %92 = vector.broadcast %91 : vector<4x16x1xf32> to vector<4x16x16xf32>
    %93 = arith.mulf %88, %92 : vector<4x16x16xf32>
    %94 = arith.truncf %93 : vector<4x16x16xf32> to vector<4x16x16xbf16>
    %95 = arith.truncf %74 : vector<4x16x8xf32> to vector<4x16x8xbf16>
    %cst_35 = arith.constant dense<0.000000e+00> : vector<4x16x8xf32>
    %96 = tpu.matmul %94, %95, %cst_35 {dimension_numbers = #tpu.dot_dimension_numbers<[2], [1], [1], [2], [0, 0, 0, 1, 1, 2], [0], [0]>} : vector<4x16x16xbf16>, vector<4x16x8xbf16>, vector<4x16x8xf32> -> vector<4x16x8xf32>
    %97 = vector.shape_cast %96 : vector<4x16x8xf32> to vector<64x8xf32>
    %c1_36 = arith.constant 1 : index
    %c0_37 = arith.constant 0 : index
    %c0_38 = arith.constant 0 : index
    %98 = vector.load %arg9[%c1_36, %c0_37, %c0_38] : memref<2x8x16xbf16, #tpu.memory_space<vmem>>, vector<1x8x16xbf16>
    %99 = vector.shape_cast %98 : vector<1x8x16xbf16> to vector<8x16xbf16>
    %100 = arith.truncf %97 : vector<64x8xf32> to vector<64x8xbf16>
    %cst_39 = arith.constant dense<0.000000e+00> : vector<64x16xf32>
    %101 = tpu.matmul %100, %99, %cst_39 {dimension_numbers = #tpu.dot_dimension_numbers<[1], [0], [0], [1], [0, 0, 1, 1], [], []>} : vector<64x8xbf16>, vector<8x16xbf16>, vector<64x16xf32> -> vector<64x16xf32>
    %102 = arith.addf %68, %101 : vector<64x16xf32>
    %103 = arith.addf %2, %102 : vector<64x16xf32>
    %c0_40 = arith.constant 0 : index
    %c0_41 = arith.constant 0 : index
    %104 = vector.load %arg10[%c0_40, %c0_41] : memref<1x16xf32, #tpu.memory_space<vmem>>, vector<1x16xf32>
    %105 = vector.broadcast %104 : vector<1x16xf32> to vector<64x16xf32>
    %106 = arith.addf %103, %105 : vector<64x16xf32>
    %cst_42 = arith.constant dense<0.000000e+00> : vector<64xf32>
    %107 = vector.multi_reduction <add>, %106, %cst_42 [1] : vector<64x16xf32> to vector<64xf32>
    %108 = vector.shape_cast %107 : vector<64xf32> to vector<64x1xf32>
    %cst_43 = arith.constant 1.600000e+01 : f32
    %109 = vector.broadcast %cst_43 : f32 to vector<64x1xf32>
    %110 = arith.divf %108, %109 : vector<64x1xf32>
    %111 = vector.broadcast %110 : vector<64x1xf32> to vector<64x16xf32>
    %112 = arith.subf %106, %111 : vector<64x16xf32>
    %113 = arith.mulf %112, %112 : vector<64x16xf32>
    %cst_44 = arith.constant dense<0.000000e+00> : vector<64xf32>
    %114 = vector.multi_reduction <add>, %113, %cst_44 [1] : vector<64x16xf32> to vector<64xf32>
    %115 = vector.shape_cast %114 : vector<64xf32> to vector<64x1xf32>
    %cst_45 = arith.constant 1.600000e+01 : f32
    %116 = vector.broadcast %cst_45 : f32 to vector<64x1xf32>
    %117 = arith.divf %115, %116 : vector<64x1xf32>
    %118 = vector.broadcast %110 : vector<64x1xf32> to vector<64x16xf32>
    %119 = arith.subf %106, %118 : vector<64x16xf32>
    %cst_46 = arith.constant 9.99999974E-6 : f32
    %120 = vector.broadcast %cst_46 : f32 to vector<64x1xf32>
    %121 = arith.addf %117, %120 : vector<64x1xf32>
    %122 = math.rsqrt %121 : vector<64x1xf32>
    %123 = vector.broadcast %122 : vector<64x1xf32> to vector<64x16xf32>
    %124 = arith.mulf %119, %123 : vector<64x16xf32>
    %c0_47 = arith.constant 0 : index
    %c0_48 = arith.constant 0 : index
    %125 = vector.load %arg11[%c0_47, %c0_48] : memref<1x16xf32, #tpu.memory_space<vmem>>, vector<1x16xf32>
    %126 = vector.broadcast %125 : vector<1x16xf32> to vector<64x16xf32>
    %127 = arith.mulf %124, %126 : vector<64x16xf32>
    %c0_49 = arith.constant 0 : index
    %c0_50 = arith.constant 0 : index
    %128 = vector.load %arg12[%c0_49, %c0_50] : memref<1x16xf32, #tpu.memory_space<vmem>>, vector<1x16xf32>
    %129 = vector.broadcast %128 : vector<1x16xf32> to vector<64x16xf32>
    %130 = arith.addf %127, %129 : vector<64x16xf32>
    %c0_51 = arith.constant 0 : index
    %c0_52 = arith.constant 0 : index
    %131 = vector.load %arg13[%c0_51, %c0_52] : memref<16x32xbf16, #tpu.memory_space<vmem>>, vector<16x32xbf16>
    %132 = arith.truncf %130 : vector<64x16xf32> to vector<64x16xbf16>
    %cst_53 = arith.constant dense<0.000000e+00> : vector<64x32xf32>
    %133 = tpu.matmul %132, %131, %cst_53 {dimension_numbers = #tpu.dot_dimension_numbers<[1], [0], [0], [1], [0, 0, 1, 1], [], []>} : vector<64x16xbf16>, vector<16x32xbf16>, vector<64x32xf32> -> vector<64x32xf32>
    %c0_54 = arith.constant 0 : index
    %c0_55 = arith.constant 0 : index
    %134 = vector.load %arg14[%c0_54, %c0_55] : memref<1x32xf32, #tpu.memory_space<vmem>>, vector<1x32xf32>
    %135 = vector.broadcast %134 : vector<1x32xf32> to vector<64x32xf32>
    %136 = arith.addf %133, %135 : vector<64x32xf32>
    %cst_56 = arith.constant 5.000000e-01 : f32
    %137 = vector.broadcast %cst_56 : f32 to vector<64x32xf32>
    %138 = arith.mulf %137, %136 : vector<64x32xf32>
    %cst_57 = arith.constant 4.471500e-02 : f32
    %139 = vector.broadcast %cst_57 : f32 to vector<64x32xf32>
    %140 = arith.mulf %139, %136 : vector<64x32xf32>
    %141 = arith.mulf %140, %136 : vector<64x32xf32>
    %142 = arith.mulf %141, %136 : vector<64x32xf32>
    %143 = arith.addf %136, %142 : vector<64x32xf32>
    %cst_58 = arith.constant 0.797884583 : f32
    %144 = vector.broadcast %cst_58 : f32 to vector<64x32xf32>
    %145 = arith.mulf %144, %143 : vector<64x32xf32>
    %146 = math.tanh %145 : vector<64x32xf32>
    %cst_59 = arith.constant 1.000000e+00 : f32
    %147 = vector.broadcast %cst_59 : f32 to vector<64x32xf32>
    %148 = arith.addf %147, %146 : vector<64x32xf32>
    %149 = arith.mulf %138, %148 : vector<64x32xf32>
    %c0_60 = arith.constant 0 : index
    %c0_61 = arith.constant 0 : index
    %150 = vector.load %arg15[%c0_60, %c0_61] : memref<32x16xbf16, #tpu.memory_space<vmem>>, vector<32x16xbf16>
    %151 = arith.truncf %149 : vector<64x32xf32> to vector<64x32xbf16>
    %cst_62 = arith.constant dense<0.000000e+00> : vector<64x16xf32>
    %152 = tpu.matmul %151, %150, %cst_62 {dimension_numbers = #tpu.dot_dimension_numbers<[1], [0], [0], [1], [0, 0, 1, 1], [], []>} : vector<64x32xbf16>, vector<32x16xbf16>, vector<64x16xf32> -> vector<64x16xf32>
    %c0_63 = arith.constant 0 : index
    %c0_64 = arith.constant 0 : index
    %153 = vector.load %arg16[%c0_63, %c0_64] : memref<1x16xf32, #tpu.memory_space<vmem>>, vector<1x16xf32>
    %154 = vector.broadcast %153 : vector<1x16xf32> to vector<64x16xf32>
    %155 = arith.addf %152, %154 : vector<64x16xf32>
    %156 = arith.addf %106, %155 : vector<64x16xf32>
    %157 = arith.truncf %156 : vector<64x16xf32> to vector<64x16xbf16>
    %c0_65 = arith.constant 0 : index
    %c0_66 = arith.constant 0 : index
    %c0_67 = arith.constant 0 : index
    %158 = vector.load %arg17[%c0_65, %c0_66, %c0_67] : memref<1x64x16xbf16, #tpu.memory_space<vmem>>, vector<1x64x16xbf16>
    %159 = vector.shape_cast %158 : vector<1x64x16xbf16> to vector<64x16xbf16>
    %160 = vector.shape_cast %157 : vector<64x16xbf16> to vector<1x64x16xbf16>
    tpu.vector_store %arg17[%c0_65, %c0_66, %c0_67], %160 {strides = array<i32>} : memref<1x64x16xbf16, #tpu.memory_space<vmem>>, vector<1x64x16xbf16>,
    return
  }
  func.func @transform_0(%arg0: i32, %arg1: i32) -> (i32, i32, i32) {
    %c0_i32 = arith.constant 0 : i32
    %c0_i32_0 = arith.constant 0 : i32
    return %arg0, %arg1, %c0_i32 : i32, i32, i32
  }
  func.func @transform_1(%arg0: i32, %arg1: i32) -> (i32, i32, i32) {
    %c0_i32 = arith.constant 0 : i32
    %c0_i32_0 = arith.constant 0 : i32
    %c0_i32_1 = arith.constant 0 : i32
    %c0_i32_2 = arith.constant 0 : i32
    return %c0_i32, %c0_i32_0, %c0_i32_1 : i32, i32, i32
  }
  func.func @transform_2(%arg0: i32, %arg1: i32) -> (i32, i32, i32) {
    %c0_i32 = arith.constant 0 : i32
    %c0_i32_0 = arith.constant 0 : i32
    %c0_i32_1 = arith.constant 0 : i32
    return %arg1, %c0_i32, %c0_i32_0 : i32, i32, i32
  }
  func.func @transform_3(%arg0: i32, %arg1: i32) -> (i32, i32) {
    %c0_i32 = arith.constant 0 : i32
    %c0_i32_0 = arith.constant 0 : i32
    %c0_i32_1 = arith.constant 0 : i32
    return %c0_i32, %c0_i32_0 : i32, i32
  }
  func.func @transform_4(%arg0: i32, %arg1: i32) -> (i32, i32) {
    %c0_i32 = arith.constant 0 : i32
    %c0_i32_0 = arith.constant 0 : i32
    %c0_i32_1 = arith.constant 0 : i32
    return %c0_i32, %c0_i32_0 : i32, i32
  }
  func.func @transform_5(%arg0: i32, %arg1: i32) -> (i32, i32) {
    %c0_i32 = arith.constant 0 : i32
    %c0_i32_0 = arith.constant 0 : i32
    %c0_i32_1 = arith.constant 0 : i32
    return %c0_i32, %c0_i32_0 : i32, i32
  }
  func.func @transform_6(%arg0: i32, %arg1: i32) -> (i32, i32) {
    %c0_i32 = arith.constant 0 : i32
    %c0_i32_0 = arith.constant 0 : i32
    %c0_i32_1 = arith.constant 0 : i32
    return %c0_i32, %c0_i32_0 : i32, i32
  }
  func.func @transform_7(%arg0: i32, %arg1: i32) -> (i32, i32, i32) {
    %c0_i32 = arith.constant 0 : i32
    %c0_i32_0 = arith.constant 0 : i32
    %c0_i32_1 = arith.constant 0 : i32
    %c0_i32_2 = arith.constant 0 : i32
    return %c0_i32, %c0_i32_0, %c0_i32_1 : i32, i32, i32
  }
  func.func @transform_8(%arg0: i32, %arg1: i32) -> (i32, i32) {
    %c0_i32 = arith.constant 0 : i32
    %c0_i32_0 = arith.constant 0 : i32
    %c0_i32_1 = arith.constant 0 : i32
    return %c0_i32, %c0_i32_0 : i32, i32
  }
  func.func @transform_9(%arg0: i32, %arg1: i32) -> (i32, i32) {
    %c0_i32 = arith.constant 0 : i32
    %c0_i32_0 = arith.constant 0 : i32
    %c0_i32_1 = arith.constant 0 : i32
    return %c0_i32, %c0_i32_0 : i32, i32
  }
  func.func @transform_10(%arg0: i32, %arg1: i32) -> (i32, i32) {
    %c0_i32 = arith.constant 0 : i32
    %c0_i32_0 = arith.constant 0 : i32
    %c0_i32_1 = arith.constant 0 : i32
    return %c0_i32, %c0_i32_0 : i32, i32
  }
  func.func @transform_11(%arg0: i32, %arg1: i32) -> (i32, i32) {
    %c0_i32 = arith.constant 0 : i32
    %c0_i32_0 = arith.constant 0 : i32
    %c0_i32_1 = arith.constant 0 : i32
    return %c0_i32, %c0_i32_0 : i32, i32
  }
  func.func @transform_12(%arg0: i32, %arg1: i32) -> (i32, i32) {
    %c0_i32 = arith.constant 0 : i32
    %c0_i32_0 = arith.constant 0 : i32
    %c0_i32_1 = arith.constant 0 : i32
    return %c0_i32, %c0_i32_0 : i32, i32
  }
  func.func @transform_13(%arg0: i32, %arg1: i32) -> (i32, i32) {
    %c0_i32 = arith.constant 0 : i32
    %c0_i32_0 = arith.constant 0 : i32
    %c0_i32_1 = arith.constant 0 : i32
    return %c0_i32, %c0_i32_0 : i32, i32
  }
  func.func @transform_14(%arg0: i32, %arg1: i32) -> (i32, i32) {
    %c0_i32 = arith.constant 0 : i32
    %c0_i32_0 = arith.constant 0 : i32
    %c0_i32_1 = arith.constant 0 : i32
    return %c0_i32, %c0_i32_0 : i32, i32
  }
  func.func @transform_15(%arg0: i32, %arg1: i32) -> (i32, i32, i32) {
    %c0_i32 = arith.constant 0 : i32
    %c0_i32_0 = arith.constant 0 : i32
    return %arg0, %arg1, %c0_i32 : i32, i32, i32
  }
}

module attributes {stable_mosaic.version = 11 : i64} {
  func.func @kernel(%arg0: i32, %arg1: memref<1x64x16xbf16, #tpu.memory_space<vmem>>, %arg2: memref<8x16xbf16, #tpu.memory_space<vmem>>, %arg3: memref<8x1xf32, #tpu.memory_space<vmem>>, %arg4: memref<1x8x64xf32, #tpu.memory_space<vmem>>) attributes {dimension_semantics = [#tpu.dimension_semantics<parallel>], iteration_bounds = array<i64: 2>, scalar_prefetch = 0 : i64, scratch_operands = 0 : i64, tpu.core_type = #tpu.core_type<tc>, window_params = [{transform_indices = @transform_0, window_bounds = array<i64: 1, 64, 16>}, {pipeline_mode = #tpu.pipeline_mode<synchronous>, transform_indices = @transform_1, window_bounds = array<i64: 8, 16>}, {pipeline_mode = #tpu.pipeline_mode<synchronous>, transform_indices = @transform_2, window_bounds = array<i64: 8, 1>}, {transform_indices = @transform_3, window_bounds = array<i64: 1, 8, 64>}]} {
    %c0 = arith.constant 0 : index
    %c0_0 = arith.constant 0 : index
    %0 = vector.load %arg2[%c0, %c0_0] : memref<8x16xbf16, #tpu.memory_space<vmem>>, vector<8x16xbf16>
    %c0_1 = arith.constant 0 : index
    %c0_2 = arith.constant 0 : index
    %c0_3 = arith.constant 0 : index
    %1 = vector.load %arg1[%c0_1, %c0_2, %c0_3] : memref<1x64x16xbf16, #tpu.memory_space<vmem>>, vector<1x64x16xbf16>
    %2 = vector.shape_cast %1 : vector<1x64x16xbf16> to vector<64x16xbf16>
    %cst = arith.constant dense<0.000000e+00> : vector<8x64xf32>
    %3 = tpu.matmul %0, %2, %cst {dimension_numbers = #tpu.dot_dimension_numbers<[1], [1], [0], [0], [0, 0, 1, 0], [], []>} : vector<8x16xbf16>, vector<64x16xbf16>, vector<8x64xf32> -> vector<8x64xf32>
    %c0_4 = arith.constant 0 : index
    %c0_5 = arith.constant 0 : index
    %4 = vector.load %arg3[%c0_4, %c0_5] : memref<8x1xf32, #tpu.memory_space<vmem>>, vector<8x1xf32>
    %5 = vector.broadcast %4 : vector<8x1xf32> to vector<8x64xf32>
    %6 = arith.addf %3, %5 : vector<8x64xf32>
    %c0_6 = arith.constant 0 : index
    %c0_7 = arith.constant 0 : index
    %c0_8 = arith.constant 0 : index
    %7 = vector.load %arg4[%c0_6, %c0_7, %c0_8] : memref<1x8x64xf32, #tpu.memory_space<vmem>>, vector<1x8x64xf32>
    %8 = vector.shape_cast %7 : vector<1x8x64xf32> to vector<8x64xf32>
    %9 = vector.shape_cast %6 : vector<8x64xf32> to vector<1x8x64xf32>
    tpu.vector_store %arg4[%c0_6, %c0_7, %c0_8], %9 {strides = array<i32>} : memref<1x8x64xf32, #tpu.memory_space<vmem>>, vector<1x8x64xf32>,
    return
  }
  func.func @transform_0(%arg0: i32) -> (i32, i32, i32) {
    %c0_i32 = arith.constant 0 : i32
    %c0_i32_0 = arith.constant 0 : i32
    %c0_i32_1 = arith.constant 0 : i32
    return %arg0, %c0_i32, %c0_i32_0 : i32, i32, i32
  }
  func.func @transform_1(%arg0: i32) -> (i32, i32) {
    %c0_i32 = arith.constant 0 : i32
    %c0_i32_0 = arith.constant 0 : i32
    %c0_i32_1 = arith.constant 0 : i32
    return %c0_i32, %c0_i32_0 : i32, i32
  }
  func.func @transform_2(%arg0: i32) -> (i32, i32) {
    %c0_i32 = arith.constant 0 : i32
    %c0_i32_0 = arith.constant 0 : i32
    %c0_i32_1 = arith.constant 0 : i32
    return %c0_i32, %c0_i32_0 : i32, i32
  }
  func.func @transform_3(%arg0: i32) -> (i32, i32, i32) {
    %c0_i32 = arith.constant 0 : i32
    %c0_i32_0 = arith.constant 0 : i32
    %c0_i32_1 = arith.constant 0 : i32
    return %arg0, %c0_i32, %c0_i32_0 : i32, i32, i32
  }
}

</mosaic_0001>

<bundles_post_ra>
// kernel: _lambda_.8
= control target key start
LH: loop header
LB: loop body
LE: loop exit
PB: predicated region body
PF: predicated region fallthrough
CT: control target
= control target key end

     0   :  { %s571_s18 = smov 0   ;;  %s620_s0 = inlined_call_operand.vmem [shape: bf16[2,32,32], index: 0, kind: input, shape index: {}]   ;;  %s621_s1 = inlined_call_operand.vmem [shape: f32[1,32], index: 1, kind: input, shape index: {}]   ;;  %s622_s2 = inlined_call_operand.vmem [shape: f32[1,32], index: 2, kind: input, shape index: {}, may-alias: {2,4}]   ;;  %s623_s3 = inlined_call_operand.vmem [shape: bf16[32,32], index: 3, kind: input, shape index: {}]   ;;  %s624_s4 = inlined_call_operand.vmem [shape: f32[1,32], index: 4, kind: input, shape index: {}, may-alias: {2,4}]   ;;  %s625_s5 = inlined_call_operand.vmem [shape: bf16[2,32,32], index: 5, kind: output, shape index: {}]  }
   0x1 LB: > { %s466_s19 = sadd.s32 4294967295, %s539_s18   ;;  %p470_p0 = scmp.ge.s32.totalorder %s539_s18, 1  ;;  %s539_s18 = sphi %s571_s18, %s15_s18  }
   0x2   : > { %p187_p1 = scmp.lt.s32.totalorder %s539_s18, 3 }
   0x4   : > { %p188_p2 = pnand %p470_p0, %p187_p1 }
   0x5   : > { %p215_p3 = scmp.lt.s32.totalorder (!%p188_p2), %s466_s19, 1  ;;  %vm234_vm0 = vcmask (!%p188_p2), 261120   ;;  %v523_v30 = vld [vmem:[%s623_s3] sm:$0xff] (!%p188_p2)   ;;  %v524_v31 = vld [vmem:[%s623_s3 + $0x8] sm:$0xff] (!%p188_p2)   ;;  %vm406_vm1 = vcmask (!%p188_p2), 257024  }
   0x6   : > { %191 = sbr.rel (%p188_p2) target bundleno = 562 (0x232), region = 40  ;;  %507 = vmatprep.subr.bf16.mxu0 (!%p188_p2), %v523_v30  ;;  %v475_v46 = vld [vmem:[%s621_s1] ss:$0 sm:$0xff] (!%p188_p2) }
   0x7   : > { %508 = vmatpush3.bf16.msra.mxu0 (!%p188_p2), %v523_v30  ;;  %v476_v52 = vld [vmem:[%s622_s2] ss:$0 sm:$0xff] (!%p188_p2) }
   0x8   : > { %509 = vmatprep.subr.bf16.mxu0 (!%p188_p2), %v524_v31 }
   0xb   : > { %510 = vmatpush3.bf16.msra.mxu0 (!%p188_p2), %v524_v31 }
   0xd   : > { %s627_s19 = smov (!%p215_p3, %s466_s19), 1 }
   0xe   : > { %s488_s20 = sshll.u32 %s627_s19, 4 }
   0xf   : > { %s219_s23 = scalar_lea.vmem %s620_s0, %s488_s20  ;;  %s224_s11 = scalar_lea.vmem %s625_s5, %s488_s20 }
  0x10   : > { %v495_v0 = vld [vmem:[%s219_s23] sm:$0xff]   ;;  %v502_v1 = vld [vmem:[%s219_s23 + $0x8] sm:$0xff]  }
  0x11   : > { %v496_v2 = vunpack.c.l.bf16 %v495_v0  ;;  %v500_v3 = vunpack.c.l.bf16 %v502_v1  ;;  %v497_v4 = vunpack.c.h.bf16 %v495_v0  ;;  %v501_v5 = vunpack.c.h.bf16 %v502_v1  ;;  %v477_v0 = vld [vmem:[%s624_s4] ss:$0 sm:$0xff] }
  0x13   : > { %v235_v6 = vsel %vm234_vm0, %v496_v2, 0.0  ;;  %v241_v7 = vsel %vm234_vm0, %v500_v3, 0.0  ;;  %v238_v8 = vsel %vm234_vm0, %v497_v4, 0.0  ;;  %v244_v9 = vsel %vm234_vm0, %v501_v5, 0.0 }
  0x14   : > { %236 = vadd.xlane.f32.xlu0 %v235_v6  ;;  %242 = vadd.xlane.f32.xlu1 %v241_v7 }
  0x18   : > { %239 = vadd.xlane.f32.xlu0 %v238_v8  ;;  %245 = vadd.xlane.f32.xlu1 %v244_v9 }
  0xa1   : > { %v237_v10 = vpop.xlane.xlu0 %236  ;;  %v243_v11 = vpop.xlane.xlu1 %242 }
  0xa2   : > { %v248_v12 = vmul.f32 0.03125, %v237_v10  ;;  %v250_v13 = vmul.f32 0.03125, %v243_v11 }
  0xa4   : > { %v252_v14 = vsub.f32 %v496_v2, %v248_v12  ;;  %v254_v15 = vsub.f32 %v500_v3, %v250_v13 }
  0xa5   : > { %v240_v16 = vpop.xlane.xlu0 %239  ;;  %v246_v17 = vpop.xlane.xlu1 %245 }
  0xa6   : > { %v249_v18 = vmul.f32 0.03125, %v240_v16  ;;  %v251_v19 = vmul.f32 0.03125, %v246_v17  ;;  %v256_v20 = vmul.f32 %v252_v14, %v252_v14  ;;  %v258_v21 = vmul.f32 %v254_v15, %v254_v15 }
  0xa8   : > { %v253_v22 = vsub.f32 %v497_v4, %v249_v18  ;;  %v255_v23 = vsub.f32 %v501_v5, %v251_v19  ;;  %v260_v24 = vsel %vm234_vm0, %v256_v20, 0.0  ;;  %v266_v25 = vsel %vm234_vm0, %v258_v21, 0.0 }
  0xa9   : > { %261 = vadd.xlane.f32.xlu0 %v260_v24 }
  0xaa   : > { %v257_v26 = vmul.f32 %v253_v22, %v253_v22  ;;  %v259_v27 = vmul.f32 %v255_v23, %v255_v23 }
  0xac   : > { %v263_v28 = vsel %vm234_vm0, %v257_v26, 0.0  ;;  %v269_v29 = vsel %vm234_vm0, %v259_v27, 0.0 }
  0xad   : > { %267 = vadd.xlane.f32.xlu0 %v266_v25  ;;  %264 = vadd.xlane.f32.xlu1 %v263_v28 }
  0xb1   : > { %270 = vadd.xlane.f32.xlu1 %v269_v29 }
 0x136   : > { %v262_v32 = vpop.xlane.xlu0 %261 }
 0x137   : > { %v272_v33 = vmul.f32 0.03125, %v262_v32 }
 0x139   : > { %v276_v34 = vadd.f32 1e-05, %v272_v33 }
 0x13a   : > { %v265_v35 = vpop.xlane.xlu1 %264  ;;  %v268_v36 = vpop.xlane.xlu0 %267 }
 0x13b   : > { %525 = vrsqrt.f32 %v276_v34  ;;  %v273_v37 = vmul.f32 0.03125, %v265_v35  ;;  %v274_v38 = vmul.f32 0.03125, %v268_v36 }
 0x13d   : > { %v277_v39 = vadd.f32 1e-05, %v273_v37  ;;  %v278_v40 = vadd.f32 1e-05, %v274_v38 }
 0x13e   : > { %v271_v41 = vpop.xlane.xlu1 %270 }
 0x13f   : > { %527 = vrsqrt.f32 %v277_v39  ;;  %v275_v42 = vmul.f32 0.03125, %v271_v41 }
 0x140   : > { %529 = vrsqrt.f32 %v278_v40 }
 0x141   : > { %v279_v43 = vadd.f32 1e-05, %v275_v42 }
 0x143   : > { %531 = vrsqrt.f32 %v279_v43 }
 0x145   : > { %v526_v44 = vpop.eup %525 }
 0x146   : > { %v284_v45 = vmul.f32 %v526_v44, %v252_v14 }
 0x148   : > { %v295_v50 = vmul.f32 %v475_v46, %v284_v45 }
 0x149   : > { %v528_v47 = vpop.eup %527 }
 0x14a   : > { %v530_v48 = vpop.eup %529  ;;  %v285_v49 = vmul.f32 %v528_v47, %v253_v22  ;;  %v306_v56 = vadd.f32 %v476_v52, %v295_v50 }
 0x14b   : > { %v286_v51 = vmul.f32 %v530_v48, %v254_v15 }
 0x14c   : > { %v296_v53 = vmul.f32 %v475_v46, %v285_v49 }
 0x14d   : > { %v532_v54 = vpop.eup %531  ;;  %v297_v58 = vmul.f32 %v475_v46, %v286_v51 }
 0x14e   : > { %v287_v55 = vmul.f32 %v532_v54, %v255_v23  ;;  %v307_v57 = vadd.f32 %v476_v52, %v296_v53 }
 0x14f   : > { %v308_v61 = vadd.f32 %v476_v52, %v297_v58 }
 0x150   : > { %v310_v59 = vpack.c.bf16 %v307_v57, %v306_v56  ;;  %v298_v60 = vmul.f32 %v475_v46, %v287_v55 }
 0x152   : > { %511 = vmatprep.mubr.msk.bf16.mxu0 %vm234_vm0, %v310_v59  ;;  %v309_v62 = vadd.f32 %v476_v52, %v298_v60 }
 0x154   : > { %v311_v63 = vpack.c.bf16 %v309_v62, %v308_v61 }
 0x156   : > { %512 = vmatmul.mubr.msk.bf16.vlgmr.msra.gmra.mrb[0].mxu0 %vm234_vm0, %v311_v63 }
 0x229   : > { %v513_v1 = vpop.f32.mrb[0].mxu0 }
 0x22a   : > { %v384_v2 = vadd.f32 %v513_v1, %v477_v0  ;;  %v375_v3 = vpop.f32.mrb[1].mxu0 }
 0x22b   : > { %v376_v4 = vadd.f32 %v477_v0, %v375_v3  ;;  %v514_v5 = vpop.f32.mrb[2].mxu0 }
 0x22c   : > { %v492_v6 = vpack.c.bf16 %v384_v2, %v384_v2  ;;  %v387_v7 = vadd.f32 %v514_v5, %v477_v0  ;;  %v378_v8 = vpop.f32.mrb[3].mxu0 }
 0x22d   : > { %v490_v9 = vpack.c.bf16 %v376_v4, %v376_v4  ;;  %v379_v10 = vadd.f32 %v477_v0, %v378_v8 }
 0x22e   : > { %409 = vst.msk [vmem:[%s224_s11 + $0x8] sm:$0xf] %vm406_vm1, %v492_v6  ;;  %v493_v11 = vpack.c.bf16 %v387_v7, %v387_v7 }
 0x22f   : > { %407 = vst.msk [vmem:[%s224_s11] sm:$0xf] %vm406_vm1, %v490_v9  ;;  %v491_v12 = vpack.c.bf16 %v379_v10, %v379_v10 }
 0x230   : > { %410 = vst.msk [vmem:[%s224_s11 + $0xc] sm:$0xf] %vm406_vm1, %v493_v11 }
 0x231   : > { %408 = vst.msk [vmem:[%s224_s11 + $0x4] sm:$0xf] %vm406_vm1, %v491_v12 }
 0x232 PF: > { %s15_s18 = sadd.s32 1, %s539_s18  }
 0x233   : > { %p12_p4 = scmp.ge.s32.totalorder %s15_s18, 4  }
 0x235   :  { %14 = sbr.rel (!%p12_p4) target bundleno = 1 (0x1), region = 70 }

// kernel: _lambda_.11
= control target key start
LH: loop header
LB: loop body
LE: loop exit
PB: predicated region body
PF: predicated region fallthrough
CT: control target
= control target key end

     0   :  { %s396_s12 = smov 0   ;;  %s424_s0 = inlined_call_operand.vmem [shape: bf16[2,64,16], index: 0, kind: input, shape index: {}]   ;;  %s425_s1 = inlined_call_operand.vmem [shape: bf16[8,16], index: 1, kind: input, shape index: {}]   ;;  %s426_s2 = inlined_call_operand.vmem [shape: f32[8,1], index: 2, kind: input, shape index: {}]   ;;  %s427_s3 = inlined_call_operand.vmem [shape: f32[2,8,64], index: 3, kind: output, shape index: {}]  }
   0x1 LB: > { %s316_s13 = sadd.s32 4294967295, %s371_s12   ;;  %p320_p0 = scmp.ge.s32.totalorder %s371_s12, 1  ;;  %s371_s12 = sphi %s396_s12, %s13_s12  }
   0x2   : > { %p137_p1 = scmp.lt.s32.totalorder %s371_s12, 3 }
   0x4   : > { %p138_p2 = pnand %p320_p0, %p137_p1 }
   0x5   : > { %p160_p3 = scmp.lt.s32.totalorder (!%p138_p2), %s316_s13, 1  ;;  %v373_v0 = vmov (!%p138_p2), 0.0   ;;  %vm374_vm0 = vmmov (!%p138_p2), 0   ;;  %v179_v1 = vld [vmem:[%s426_s2] sm:$0xff] (!%p138_p2)  ;;  %v375_v2 = vmov (!%p138_p2), 0   ;;  %vm205_vm1 = vcmask (!%p138_p2), 130048  }
   0x6   : > { %141 = sbr.rel (%p138_p2) target bundleno = 264 (0x108), region = 32  ;;  %337 = vmatprep.subr.bf16.mxu0 (!%p138_p2), %v373_v0  ;;  %345 = vmatprep.mubr.msk.bf16.mxu0 (!%p138_p2), %vm374_vm0, %v373_v0  ;;  %v170_v11 = vld [vmem:[%s425_s1] sm:$0xf] (!%p138_p2)  ;;  %vm261_vm2 = vcmask (!%p138_p2), 523264  }
   0x7   : > { %360 = vset.pattern.permute.xlu0 (!%p138_p2), %v375_v2 }
   0x8   : > { %182 = vperm.xlu0 (!%p138_p2), %360, %v179_v1  }
   0xd   : > { %s429_s13 = smov (!%p160_p3, %s316_s13), 1 }
   0xe   : > { %s331_s16 = sshll.u32 %s429_s13, 5  ;;  %s323_s22 = sshll.u32 %s429_s13, 3 }
   0xf   : > { %s164_s19 = scalar_lea.vmem %s424_s0, %s331_s16  ;;  %s168_s25 = scalar_lea.vmem %s427_s3, %s323_s22 }
  0x10   : > { %v361_v3 = vld [vmem:[%s164_s19] sm:$0xff]   ;;  %v362_v5 = vld [vmem:[%s164_s19 + $0x8] sm:$0xff]   ;;  %v363_v7 = vld [vmem:[%s164_s19 + $0x10] sm:$0xff]  }
  0x11   : > { %v210_v4 = vsel %vm205_vm1, %v361_v3, 0  ;;  %v213_v6 = vsel %vm205_vm1, %v362_v5, 0  ;;  %v216_v8 = vsel %vm205_vm1, %v363_v7, 0  ;;  %v364_v9 = vld [vmem:[%s164_s19 + $0x18] sm:$0xff]  }
  0x12   : > { %338 = vmatpush3.bf16.xpose.msra.mxu0 %v210_v4  ;;  %v219_v10 = vsel %vm205_vm1, %v364_v9, 0 }
  0x13   : > { %339 = vmatprep.subr.bf16.mxu0 %v373_v0 }
  0x1a   : > { %340 = vmatpush3.bf16.xpose.msra.mxu0 %v213_v6 }
  0x1b   : > { %341 = vmatprep.subr.bf16.mxu0 %v373_v0 }
  0x22   : > { %342 = vmatpush3.bf16.xpose.msra.mxu0 %v216_v8 }
  0x23   : > { %343 = vmatprep.subr.bf16.mxu0 %v373_v0 }
  0x2a   : > { %344 = vmatpush3.bf16.xpose.msra.mxu0 %v219_v10 }
  0x31   : > { %346 = vmatmul.mubr.msk.bf16.vlgmr.msra.gmra.mrb[0].mxu0 %vm205_vm1, %v170_v11 }
  0x87   : > { %v183_v12 = vpop.permute.xlu0 %182 }
 0x104   : > { %v255_v13 = vpop.f32.mrb[0].mxu0 }
 0x105   : > { %v256_v14 = vadd.f32 %v255_v13, %v183_v12  ;;  %v347_v15 = vpop.f32.mrb[1].mxu0 }
 0x106   : > { %v258_v16 = vpop.f32.mrb[2].mxu0 }
 0x107   : > { %262 = vst.msk [vmem:[%s168_s25] sm:$0xff] %vm261_vm2, %v256_v14  ;;  %v348_v17 = vpop.f32.mrb[3].mxu0 }
 0x108 PF: > { %s13_s12 = sadd.s32 1, %s371_s12  }
 0x109   : > { %p10_p4 = scmp.ge.s32.totalorder %s13_s12, 4  }
 0x10b   :  { %12 = sbr.rel (!%p10_p4) target bundleno = 1 (0x1), region = 62 }

// kernel: _lambda_.6
= control target key start
LH: loop header
LB: loop body
LE: loop exit
PB: predicated region body
PF: predicated region fallthrough
CT: control target
= control target key end

     0   :  { %s2968_s18 = smov 0   ;;  %s2970_s19 = smov 0   ;;  %s3365_s0 = inlined_call_operand.vmem [shape: bf16[2,32,32], index: 0, kind: input, shape index: {}]   ;;  %s3366_s1 = inlined_call_operand.vmem [shape: f32[4,16,16], index: 1, kind: input, shape index: {}]   ;;  %s3367_s2 = inlined_call_operand.vmem [shape: f32[2,16,16], index: 2, kind: input, shape index: {}]   ;;  %s3368_s3 = inlined_call_operand.vmem [shape: f32[1,32], index: 3, kind: input, shape index: {}, may-alias: {3,9}]   ;;  %s3369_s4 = inlined_call_operand.vmem [shape: f32[1,32], index: 4, kind: input, shape index: {}, may-alias: {4,8,10,14}]   ;;  %s3370_s5 = inlined_call_operand.vmem [shape: bf16[32,96], index: 5, kind: input, shape index: {}]   ;;  %s3371_s6 = inlined_call_operand.vmem [shape: f32[1,96], index: 6, kind: input, shape index: {}]   ;;  %s3372_s7 = inlined_call_operand.vmem [shape: bf16[4,8,32], index: 7, kind: input, shape index: {}]   ;;  %s3373_s8 = inlined_call_operand.vmem [shape: f32[1,32], index: 8, kind: input, shape index: {}, may-alias: {4,8,10,14}]   ;;  %s3374_s9 = inlined_call_operand.vmem [shape: f32[1,32], index: 9, kind: input, shape index: {}, may-alias: {3,9}]   ;;  %s3375_s10 = inlined_call_operand.vmem [shape: f32[1,32], index: 10, kind: input, shape index: {}, may-alias: {4,8,10,14}]   ;;  %s3376_s11 = inlined_call_operand.vmem [shape: bf16[32,64], index: 11, kind: input, shape index: {}]   ;;  %s3377_s12 = inlined_call_operand.vmem [shape: f32[1,64], index: 12, kind: input, shape index: {}]   ;;  %s3378_s13 = inlined_call_operand.vmem [shape: bf16[64,32], index: 13, kind: input, shape index: {}]   ;;  %s3379_s14 = inlined_call_operand.vmem [shape: f32[1,32], index: 14, kind: input, shape index: {}, may-alias: {4,8,10,14}]   ;;  %s3380_s15 = inlined_call_operand.vmem [shape: bf16[2,32,32], index: 15, kind: output, shape index: {}]  }
   0x1   :  { %s2972_s20 = smov 0  }
   0x2 LB: > { %s37_s21 = sadd.s32 1, %s2869_s19  ;;  %p2415_p0 = scmp.ge.s32.totalorder %s2873_s20, 1  ;;  %s2873_s20 = sphi %s2972_s20, %s25_s20   ;;  %s2869_s19 = sphi %s2970_s19, %s3382_s19   ;;  %s2865_s18 = sphi %s2968_s18, %s3381_s18  }
   0x3   : > { %p39_p1 = scmp.ge.s32.totalorder %s37_s21, 2  ;;  %p470_p2 = scmp.lt.s32.totalorder %s2873_s20, 3 }
   0x5   : > { %s3384_s21 = smov (%p39_p1, %s37_s21), 0  ;;  %p471_p3 = pnand %p2415_p0, %p470_p2 }
   0x6   : > { %p533_p4 = scmp.lt.s32.totalorder (!%p471_p3), %s2865_s18, 1  ;;  %vm568_vm0 = vcmask (!%p471_p3), 261120   ;;  %v2755_v30 = vld [vmem:[%s3370_s5] sm:$0xff] (!%p471_p3)   ;;  %v2756_v31 = vld [vmem:[%s3370_s5 + $0x8] sm:$0xff] (!%p471_p3)   ;;  %vm2876_vm1 = vmmov (!%p471_p3), 0   ;;  %s2877_s26 = smov (!%p471_p3), 96  }
   0x7   : > { %474 = sbr.rel (%p471_p3) target bundleno = 4293 (0x10c5), region = 80  ;;  %2554 = vmatprep.subr.bf16.mxu1 (!%p471_p3), %v2755_v30  ;;  %v2420_v46 = vld [vmem:[%s3368_s3] ss:$0 sm:$0xff] (!%p471_p3)  ;;  %vm735_vm2 = vcmask (!%p471_p3), 64512   ;;  %vm837_vm3 = vcmask (!%p471_p3), 130048   ;;  %s2880_s27 = smov (!%p471_p3), 120  }
   0x8   : > { %2555 = vmatpush3.bf16.msra.mxu1 (!%p471_p3), %v2755_v30  ;;  %v2421_v52 = vld [vmem:[%s3369_s4] ss:$0 sm:$0xff] (!%p471_p3)  ;;  %v3073_v30 = vld [vmem:[%s3367_s2 + $0x18] sm:$0xff] (!%p471_p3)  ;;  %s2883_s28 = smov (!%p471_p3), 56   ;;  %vm1240_vm4 = vcmask (!%p471_p3), 1043456   ;;  %s2886_s29 = smov (!%p471_p3), 104  }
   0x9   : > { %2556 = vmatprep.subr.bf16.mxu1 (!%p471_p3), %v2756_v31  ;;  %vm2227_vm5 = vcmask (!%p471_p3), 523264   ;;  %vm2303_vm6 = vcmask (!%p471_p3), 257024  }
   0xc   : > { %2557 = vmatpush3.bf16.msra.mxu1 (!%p471_p3), %v2756_v31 }
   0xe   : > { %s3386_s18 = smov (!%p533_p4, %s2865_s18), 1 }
   0xf   : > { %s2481_s22 = sshll.u32 %s3386_s18, 4 }
  0x10   : > { %s540_s25 = scalar_lea.vmem %s3365_s0, %s2481_s22  ;;  %s557_s23 = scalar_lea.vmem %s3380_s15, %s2481_s22 }
  0x11   : > { %v2488_v0 = vld [vmem:[%s540_s25] sm:$0xff]   ;;  %v2495_v1 = vld [vmem:[%s540_s25 + $0x8] sm:$0xff]   ;;  %s2878_s25 = smov 88  }
  0x12   : > { %v2994_v2 = vunpack.c.l.bf16 %v2488_v0  ;;  %v2996_v3 = vunpack.c.l.bf16 %v2495_v1  ;;  %v2998_v4 = vunpack.c.h.bf16 %v2488_v0  ;;  %v3000_v5 = vunpack.c.h.bf16 %v2495_v1 }
  0x13   : > { %v2875_v0 = vmov 0.0  }
  0x14   : > { %v569_v6 = vsel %vm568_vm0, %v2994_v2, 0.0  ;;  %v575_v7 = vsel %vm568_vm0, %v2996_v3, 0.0  ;;  %v572_v8 = vsel %vm568_vm0, %v2998_v4, 0.0  ;;  %v578_v9 = vsel %vm568_vm0, %v3000_v5, 0.0  ;;  %2568 = vmatprep.subr.bf16.mxu0 %v2875_v0  ;;  %2562 = vmatprep.subr.bf16.mxu1 %v2875_v0 }
  0x15   : > { %570 = vadd.xlane.f32.xlu0 %v569_v6  ;;  %576 = vadd.xlane.f32.xlu1 %v575_v7  ;;  %v2422_v6 = vld [vmem:[%s3371_s6] ss:$0 sm:$0xff] }
  0x16   : > { %2570 = vmatprep.mubr.msk.bf16.mxu0 %vm2876_vm1, %v2875_v0 }
  0x19   : > { %573 = vadd.xlane.f32.xlu0 %v572_v8  ;;  %579 = vadd.xlane.f32.xlu1 %v578_v9 }
  0xa2   : > { %v571_v10 = vpop.xlane.xlu0 %570  ;;  %v577_v11 = vpop.xlane.xlu1 %576 }
  0xa3   : > { %v582_v12 = vmul.f32 0.03125, %v571_v10  ;;  %v584_v13 = vmul.f32 0.03125, %v577_v11 }
  0xa5   : > { %v586_v14 = vsub.f32 %v2994_v2, %v582_v12  ;;  %v588_v15 = vsub.f32 %v2996_v3, %v584_v13 }
  0xa6   : > { %v574_v16 = vpop.xlane.xlu0 %573  ;;  %v580_v17 = vpop.xlane.xlu1 %579 }
  0xa7   : > { %v583_v18 = vmul.f32 0.03125, %v574_v16  ;;  %v585_v19 = vmul.f32 0.03125, %v580_v17  ;;  %v590_v20 = vmul.f32 %v586_v14, %v586_v14  ;;  %v592_v21 = vmul.f32 %v588_v15, %v588_v15 }
  0xa9   : > { %v587_v22 = vsub.f32 %v2998_v4, %v583_v18  ;;  %v589_v23 = vsub.f32 %v3000_v5, %v585_v19  ;;  %v594_v24 = vsel %vm568_vm0, %v590_v20, 0.0  ;;  %v600_v25 = vsel %vm568_vm0, %v592_v21, 0.0  ;;  %v730_v20 = vld [vmem:[%s3366_s1] sm:$0xff] }
  0xaa   : > { %595 = vadd.xlane.f32.xlu0 %v594_v24 }
  0xab   : > { %v591_v26 = vmul.f32 %v587_v22, %v587_v22  ;;  %v593_v27 = vmul.f32 %v589_v23, %v589_v23 }
  0xad   : > { %v597_v28 = vsel %vm568_vm0, %v591_v26, 0.0  ;;  %v603_v29 = vsel %vm568_vm0, %v593_v27, 0.0 }
  0xae   : > { %601 = vadd.xlane.f32.xlu0 %v600_v25  ;;  %598 = vadd.xlane.f32.xlu1 %v597_v28 }
  0xb2   : > { %604 = vadd.xlane.f32.xlu1 %v603_v29 }
 0x137   : > { %v596_v32 = vpop.xlane.xlu0 %595 }
 0x138   : > { %v606_v33 = vmul.f32 0.03125, %v596_v32 }
 0x13a   : > { %v610_v34 = vadd.f32 1e-05, %v606_v33 }
 0x13b   : > { %v599_v35 = vpop.xlane.xlu1 %598  ;;  %v602_v36 = vpop.xlane.xlu0 %601 }
 0x13c   : > { %2763 = vrsqrt.f32 %v610_v34  ;;  %v607_v37 = vmul.f32 0.03125, %v599_v35  ;;  %v608_v38 = vmul.f32 0.03125, %v602_v36 }
 0x13e   : > { %v611_v39 = vadd.f32 1e-05, %v607_v37  ;;  %v612_v40 = vadd.f32 1e-05, %v608_v38 }
 0x13f   : > { %v605_v41 = vpop.xlane.xlu1 %604 }
 0x140   : > { %2765 = vrsqrt.f32 %v611_v39  ;;  %v609_v42 = vmul.f32 0.03125, %v605_v41 }
 0x141   : > { %2767 = vrsqrt.f32 %v612_v40 }
 0x142   : > { %v613_v43 = vadd.f32 1e-05, %v609_v42 }
 0x144   : > { %2769 = vrsqrt.f32 %v613_v43 }
 0x146   : > { %v2764_v44 = vpop.eup %2763 }
 0x147   : > { %v618_v45 = vmul.f32 %v2764_v44, %v586_v14 }
 0x149   : > { %v629_v50 = vmul.f32 %v2420_v46, %v618_v45 }
 0x14a   : > { %v2766_v47 = vpop.eup %2765 }
 0x14b   : > { %v2768_v48 = vpop.eup %2767  ;;  %v619_v49 = vmul.f32 %v2766_v47, %v587_v22  ;;  %v640_v56 = vadd.f32 %v2421_v52, %v629_v50  ;;  %v731_v22 = vld [vmem:[%s3366_s1 + $0x8] sm:$0xff] }
 0x14c   : > { %v620_v51 = vmul.f32 %v2768_v48, %v588_v15  ;;  %v3088_v50 = vld [vmem:[%s3367_s2 + $0x8] sm:$0xff] }
 0x14d   : > { %v630_v53 = vmul.f32 %v2420_v46, %v619_v49 }
 0x14e   : > { %v2770_v54 = vpop.eup %2769  ;;  %v631_v58 = vmul.f32 %v2420_v46, %v620_v51 }
 0x14f   : > { %v621_v55 = vmul.f32 %v2770_v54, %v589_v23  ;;  %v641_v57 = vadd.f32 %v2421_v52, %v630_v53  ;;  %v3068_v23 = vld [vmem:[%s3367_s2 + $0x10] sm:$0xff] }
 0x150   : > { %v642_v61 = vadd.f32 %v2421_v52, %v631_v58 }
 0x151   : > { %v648_v59 = vpack.c.bf16 %v641_v57, %v640_v56  ;;  %v632_v60 = vmul.f32 %v2420_v46, %v621_v55 }
 0x153   : > { %2558 = vmatprep.mubr.msk.bf16.mxu1 %vm568_vm0, %v648_v59  ;;  %v643_v62 = vadd.f32 %v2421_v52, %v632_v60  ;;  %v3094_v52 = vld [vmem:[%s3367_s2] sm:$0xff] }
 0x155   : > { %v649_v63 = vpack.c.bf16 %v643_v62, %v642_v61 }
 0x157   : > { %2559 = vmatmul.mubr.msk.bf16.vlgmr.msra.gmra.mrb[0].mxu1 %vm568_vm0, %v649_v63 }
 0x158   : > { %2564 = vmatprep.mubr.msk.bf16.mxu1 %vm2876_vm1, %v2875_v0 }
 0x22a   : > { %v2560_v1 = vpop.f32.mrb[0].mxu1 }
 0x22b   : > { %v709_v7 = vpop.f32.mrb[1].mxu1  ;;  %v718_v9 = vadd.f32 %v2560_v1, %v2422_v6 }
 0x22c   : > { %v2561_v8 = vpop.f32.mrb[2].mxu1  ;;  %v710_v12 = vadd.f32 %v2422_v6, %v709_v7 }
 0x22d   : > { %v721_v10 = vadd.f32 %v2561_v8, %v2422_v6  ;;  %v712_v11 = vpop.f32.mrb[3].mxu1 }
 0x22e   : > { %v713_v13 = vadd.f32 %v2422_v6, %v712_v11 }
 0x22f   : > { %v3041_v14 = vpack.c.bf16 %v721_v10, %v718_v9 }
 0x230   : > { %v3043_v15 = vpack.c.bf16 %v713_v13, %v710_v12 }
 0x231   : > { %784 = vrot.lane.b32.xlu0 %v3041_v14, %s2877_s26 }
 0x232   : > { %733 = vrot.lane.b32.xlu1 %v3043_v15, %s2877_s26  ;;  %s2879_s26 = smov 64  }
 0x2a3   : > { %v785_v16 = vpop.permute.xlu0 %784 }
 0x2a4   : > { %v734_v17 = vpop.permute.xlu1 %733  ;;  %v790_v18 = vsel %vm735_vm2, %v785_v16, 0 }
 0x2a5   : > { %v740_v19 = vsel %vm735_vm2, %v734_v17, 0  ;;  %2569 = vmatpush3.bf16.xpose.msra.mxu0 %v790_v18 }
 0x2a6   : > { %2563 = vmatpush3.bf16.xpose.msra.mxu1 %v740_v19  ;;  %2580 = vmatprep.subr.bf16.mxu0 %v2875_v0 }
 0x2a7   : > { %2574 = vmatprep.subr.bf16.mxu1 %v2875_v0 }
 0x2ac   : > { %2571 = vmatmul.mubr.msk.bf16.vlgmr.msra.gmra.mrb[0].mxu0 %vm735_vm2, %v3041_v14 }
 0x2ad   : > { %2565 = vmatmul.mubr.msk.bf16.vlgmr.msra.gmra.mrb[4].mxu1 %vm735_vm2, %v3043_v15  ;;  %2582 = vmatprep.mubr.msk.bf16.mxu0 %vm2876_vm1, %v2875_v0 }
 0x2ae   : > { %2576 = vmatprep.mubr.msk.bf16.mxu1 %vm2876_vm1, %v2875_v0 }
 0x37f   : > { %v826_v21 = vpop.f32.mrb[0].mxu0 }
 0x380   : > { %v827_v24 = vadd.f32 %v826_v21, %v730_v20  ;;  %v776_v25 = vpop.f32.mrb[4].mxu1  ;;  %v2572_v26 = vpop.f32.mrb[1].mxu0 }
 0x381   : > { %v777_v27 = vadd.f32 %v776_v25, %v730_v20  ;;  %v2566_v28 = vpop.f32.mrb[5].mxu1  ;;  %v829_v29 = vpop.f32.mrb[2].mxu0 }
 0x382   : > { %v830_v31 = vadd.f32 %v829_v29, %v731_v22  ;;  %v779_v32 = vpop.f32.mrb[6].mxu1  ;;  %v2573_v33 = vpop.f32.mrb[3].mxu0  ;;  %v835_v34 = vadd.f32 %v827_v24, %v3068_v23 }
 0x383   : > { %v780_v35 = vadd.f32 %v779_v32, %v731_v22  ;;  %v2567_v36 = vpop.f32.mrb[7].mxu1  ;;  %v833_v54 = vadd.f32 %v777_v27, %v3094_v52 }
 0x384   : > { %v844_v37 = vsel %vm837_vm3, %v835_v34, -inf  ;;  %v836_v38 = vadd.f32 %v830_v31, %v3073_v30  ;;  %v2431_v36 = vld [vmem:[%s3366_s1 + $0x10] sm:$0xff] }
 0x385   : > { %845 = vmax.xlane.f32.xlu1 %v844_v37  ;;  %v834_v51 = vadd.f32 %v780_v35, %v3088_v50  ;;  %v838_v55 = vsel %vm837_vm3, %v833_v54, -inf }
 0x386   : > { %v847_v39 = vsel %vm837_vm3, %v836_v38, -inf }
 0x387   : > { %848 = vmax.xlane.f32.xlu0 %v847_v39  ;;  %v841_v53 = vsel %vm837_vm3, %v834_v51, -inf  ;;  %v2432_v39 = vld [vmem:[%s3366_s1 + $0x18] sm:$0xff] }
 0x412   : > { %v846_v40 = vpop.xlane.xlu1 %845 }
 0x413   : > { %v852_v41 = vsub.f32 %v835_v34, %v846_v40 }
 0x414   : > { %v849_v42 = vpop.xlane.xlu0 %848 }
 0x415   : > { %v858_v43 = vmul.f32 1.442695, %v852_v41  ;;  %v853_v44 = vsub.f32 %v836_v38, %v849_v42 }
 0x417   : > { %2771 = vpow2.f32 %v858_v43  ;;  %v860_v45 = vmul.f32 1.442695, %v853_v44 }
 0x419   : > { %2773 = vpow2.f32 %v860_v45 }
 0x421   : > { %v2772_v46 = vpop.eup %2771 }
 0x422   : > { %v868_v47 = vsel %vm837_vm3, %v2772_v46, 0.0 }
 0x423   : > { %v2774_v48 = vpop.eup %2773  ;;  %869 = vadd.xlane.f32.xlu0 %v868_v47 }
 0x424   : > { %v871_v49 = vsel %vm837_vm3, %v2774_v48, 0.0 }
 0x425   : > { %872 = vadd.xlane.f32.xlu1 %v871_v49 }
 0x436   : > { %1037 = vrot.lane.b32.xlu1 %v3041_v14, %s2878_s25 }
 0x439   : > { %931 = vrot.lane.b32.xlu0 %v3041_v14, %s2879_s26 }
 0x43a   : > { %1035 = vrot.lane.b32.xlu1 %v3041_v14, %s2880_s27 }
 0x458   : > { %842 = vmax.xlane.f32.xlu0 %v841_v53 }
 0x45e   : > { %839 = vmax.xlane.f32.xlu1 %v838_v55 }
 0x46f   : > { %884 = vrot.lane.b32.xlu1 %v3043_v15, %s2879_s26  ;;  %s2881_s26 = smov 80  }
 0x473   : > { %984 = vrot.lane.b32.xlu1 %v3043_v15, %s2880_s27  ;;  %s2882_s27 = smov 112  }
 0x4b0   : > { %v870_v56 = vpop.xlane.xlu0 %869 }
 0x4b1   : > { %2775 = vrcp.f32 %v870_v56 }
 0x4b2   : > { %v873_v57 = vpop.xlane.xlu1 %872 }
 0x4b3   : > { %2777 = vrcp.f32 %v873_v57 }
 0x4b4   : > { %v932_v58 = vpop.permute.xlu0 %931 }
 0x4b5   : > { %2581 = vmatpush3.bf16.msra.mxu0 %v932_v58 }
 0x4b6   : > { %2592 = vmatprep.subr.bf16.mxu0 %v2875_v0  ;;  %v1038_v63 = vpop.permute.xlu1 %1037 }
 0x4b7   : > { %v1043_v6 = vsel %vm735_vm2, %v1038_v63, 0 }
 0x4ba   : > { %v1036_v7 = vpop.permute.xlu1 %1035 }
 0x4bb   : > { %v2776_v59 = vpop.eup %2775 }
 0x4bc   : > { %v880_v61 = vmul.f32 %v2776_v59, %v2772_v46 }
 0x4bd   : > { %v2778_v60 = vpop.eup %2777 }
 0x4be   : > { %v881_v62 = vmul.f32 %v2778_v60, %v2774_v48 }
 0x4c0   : > { %v883_v1 = vpack.c.bf16 %v881_v62, %v880_v61 }
 0x4c2   : > { %2583 = vmatmul.mubr.msk.bf16.vlgmr.msra.gmra.mrb[4].mxu0 %vm837_vm3, %v883_v1 }
 0x4c3   : > { %2593 = vmatpush3.bf16.xpose.msra.mxu0 %v1043_v6  ;;  %2594 = vmatprep.mubr.msk.bf16.mxu0 %vm2876_vm1, %v2875_v0 }
 0x4c4   : > { %2604 = vmatprep.subr.bf16.mxu0 %v2875_v0 }
 0x4ca   : > { %2595 = vmatmul.mubr.msk.bf16.vlgmr.msra.gmra.mrb[8].mxu0 %vm735_vm2, %v1036_v7 }
 0x4cb   : > { %2606 = vmatprep.mubr.msk.bf16.mxu0 %vm2876_vm1, %v2875_v0 }
 0x4e5   : > { %v843_v8 = vpop.xlane.xlu0 %842 }
 0x4e6   : > { %v851_v9 = vsub.f32 %v834_v51, %v843_v8 }
 0x4e8   : > { %v856_v12 = vmul.f32 1.442695, %v851_v9 }
 0x4eb   : > { %v840_v10 = vpop.xlane.xlu1 %839 }
 0x4ec   : > { %v850_v11 = vsub.f32 %v833_v54, %v840_v10 }
 0x4ee   : > { %v854_v13 = vmul.f32 1.442695, %v850_v11 }
 0x4ef   : > { %v885_v16 = vpop.permute.xlu1 %884 }
 0x4f0   : > { %2779 = vpow2.f32 %v854_v13  ;;  %2575 = vmatpush3.bf16.msra.mxu1 %v885_v16 }
 0x4f1   : > { %2586 = vmatprep.subr.bf16.mxu1 %v2875_v0  ;;  %2781 = vpow2.f32 %v856_v12 }
 0x4f3   : > { %v985_v48 = vpop.permute.xlu1 %984 }
 0x4fa   : > { %v2780_v17 = vpop.eup %2779 }
 0x4fb   : > { %v862_v18 = vsel %vm837_vm3, %v2780_v17, 0.0  ;;  %v2782_v19 = vpop.eup %2781 }
 0x4fc   : > { %863 = vadd.xlane.f32.xlu0 %v862_v18  ;;  %v865_v20 = vsel %vm837_vm3, %v2782_v19, 0.0 }
 0x500   : > { %866 = vadd.xlane.f32.xlu0 %v865_v20 }
 0x516   : > { %986 = vrot.lane.b32.xlu0 %v3043_v15, %s2878_s25 }
 0x589   : > { %v864_v21 = vpop.xlane.xlu0 %863 }
 0x58a   : > { %2783 = vrcp.f32 %v864_v21 }
 0x58d   : > { %v867_v22 = vpop.xlane.xlu0 %866 }
 0x58e   : > { %2785 = vrcp.f32 %v867_v22 }
 0x591   : > { %v987_v34 = vpop.permute.xlu0 %986 }
 0x592   : > { %v992_v37 = vsel %vm735_vm2, %v987_v34, 0 }
 0x594   : > { %v2784_v25 = vpop.eup %2783 }
 0x595   : > { %v3115_v24 = vpop.f32.mrb[4].mxu0  ;;  %v878_v32 = vmul.f32 %v2784_v25, %v2780_v17 }
 0x596   : > { %v2584_v26 = vpop.f32.mrb[5].mxu0 }
 0x597   : > { %v3117_v27 = vpop.f32.mrb[6].mxu0 }
 0x598   : > { %v2786_v28 = vpop.eup %2785  ;;  %v980_v29 = vpack.c.bf16 %v3117_v27, %v3115_v24  ;;  %v2585_v31 = vpop.f32.mrb[7].mxu0 }
 0x599   : > { %v879_v33 = vmul.f32 %v2786_v28, %v2782_v19 }
 0x59b   : > { %v882_v35 = vpack.c.bf16 %v879_v33, %v878_v32 }
 0x59d   : > { %2577 = vmatmul.mubr.msk.bf16.vlgmr.msra.gmra.mrb[8].mxu1 %vm837_vm3, %v882_v35  ;;  %v1079_v38 = vpop.f32.mrb[8].mxu0 }
 0x59e   : > { %2587 = vmatpush3.bf16.xpose.msra.mxu1 %v992_v37  ;;  %v1080_v40 = vadd.f32 %v2431_v36, %v1079_v38  ;;  %v2596_v41 = vpop.f32.mrb[9].mxu0  ;;  %2588 = vmatprep.mubr.msk.bf16.mxu1 %vm2876_vm1, %v2875_v0 }
 0x59f   : > { %v1082_v42 = vpop.f32.mrb[10].mxu0  ;;  %2598 = vmatprep.subr.bf16.mxu1 %v2875_v0 }
 0x5a0   : > { %v1083_v43 = vadd.f32 %v2432_v39, %v1082_v42  ;;  %v2597_v44 = vpop.f32.mrb[11].mxu0  ;;  %v1088_v45 = vadd.f32 %v1080_v40, %v3068_v23 }
 0x5a2   : > { %v1096_v46 = vsel %vm837_vm3, %v1088_v45, -inf  ;;  %v1089_v47 = vadd.f32 %v1083_v43, %v3073_v30 }
 0x5a3   : > { %1097 = vmax.xlane.f32.xlu1 %v1096_v46 }
 0x5a4   : > { %v1099_v49 = vsel %vm837_vm3, %v1089_v47, -inf }
 0x5a5   : > { %1100 = vmax.xlane.f32.xlu0 %v1099_v49  ;;  %2589 = vmatmul.mubr.msk.bf16.vlgmr.msra.gmra.mrb[12].mxu1 %vm735_vm2, %v985_v48 }
 0x5a6   : > { %2600 = vmatprep.mubr.msk.bf16.mxu1 %vm2876_vm1, %v2875_v0 }
 0x5b4   : > { %1356 = vrot.lane.b32.xlu1 %v3043_v15, %s2881_s26 }
 0x630   : > { %v1098_v51 = vpop.xlane.xlu1 %1097 }
 0x631   : > { %v1104_v53 = vsub.f32 %v1088_v45, %v1098_v51 }
 0x632   : > { %v1101_v54 = vpop.xlane.xlu0 %1100 }
 0x633   : > { %v1110_v55 = vmul.f32 1.442695, %v1104_v53  ;;  %v1105_v56 = vsub.f32 %v1089_v47, %v1101_v54 }
 0x634   : > { %v1357_v20 = vpop.permute.xlu1 %1356 }
 0x635   : > { %2787 = vpow2.f32 %v1110_v55  ;;  %v1112_v57 = vmul.f32 1.442695, %v1105_v56  ;;  %v1362_v35 = vsel %vm735_vm2, %v1357_v20, 0 }
 0x637   : > { %2789 = vpow2.f32 %v1112_v57 }
 0x63f   : > { %v2788_v58 = vpop.eup %2787 }
 0x640   : > { %v1120_v59 = vsel %vm837_vm3, %v2788_v58, 0.0 }
 0x641   : > { %v2790_v60 = vpop.eup %2789  ;;  %1121 = vadd.xlane.f32.xlu0 %v1120_v59 }
 0x642   : > { %v1123_v61 = vsel %vm837_vm3, %v2790_v60, 0.0 }
 0x643   : > { %1124 = vadd.xlane.f32.xlu1 %v1123_v61 }
 0x654   : > { %1354 = vrot.lane.b32.xlu1 %v3043_v15, %s2882_s27 }
 0x657   : > { %1183 = vrot.lane.b32.xlu0 %v3041_v14, %s2883_s28 }
 0x658   : > { %1407 = vrot.lane.b32.xlu1 %v3041_v14, %s2881_s26  ;;  %s2887_s26 = smov 40  }
 0x65b   : > { %1405 = vrot.lane.b32.xlu0 %v3041_v14, %s2882_s27  ;;  %s2884_s27 = smov 48  }
 0x670   : > { %v3146_v62 = vpop.f32.mrb[8].mxu1 }
 0x671   : > { %v2578_v63 = vpop.f32.mrb[9].mxu1 }
 0x672   : > { %v3148_v1 = vpop.f32.mrb[10].mxu1 }
 0x673   : > { %v979_v6 = vpack.c.bf16 %v3148_v1, %v3146_v62  ;;  %v2579_v7 = vpop.f32.mrb[11].mxu1 }
 0x674   : > { %v2442_v7 = vld [vmem:[%s3366_s1 + $0x20] sm:$0xff] }
 0x678   : > { %v1028_v8 = vpop.f32.mrb[12].mxu1 }
 0x679   : > { %v1029_v9 = vadd.f32 %v2431_v36, %v1028_v8  ;;  %v2590_v10 = vpop.f32.mrb[13].mxu1 }
 0x67a   : > { %v1031_v11 = vpop.f32.mrb[14].mxu1  ;;  %v2443_v10 = vld [vmem:[%s3366_s1 + $0x28] sm:$0xff] }
 0x67b   : > { %v1032_v12 = vadd.f32 %v2432_v39, %v1031_v11  ;;  %v2591_v13 = vpop.f32.mrb[15].mxu1  ;;  %v1086_v16 = vadd.f32 %v1029_v9, %v3094_v52 }
 0x67d   : > { %v1090_v17 = vsel %vm837_vm3, %v1086_v16, -inf  ;;  %v1087_v18 = vadd.f32 %v1032_v12, %v3088_v50 }
 0x67e   : > { %1091 = vmax.xlane.f32.xlu1 %v1090_v17 }
 0x67f   : > { %v1093_v19 = vsel %vm837_vm3, %v1087_v18, -inf }
 0x680   : > { %1094 = vmax.xlane.f32.xlu0 %v1093_v19 }
 0x68f   : > { %1136 = vrot.lane.b32.xlu1 %v3043_v15, %s2883_s28  ;;  %s2885_s28 = smov 72  }
 0x6ce   : > { %v1122_v21 = vpop.xlane.xlu0 %1121 }
 0x6cf   : > { %2791 = vrcp.f32 %v1122_v21 }
 0x6d0   : > { %v1125_v22 = vpop.xlane.xlu1 %1124 }
 0x6d1   : > { %2793 = vrcp.f32 %v1125_v22 }
 0x6d2   : > { %v1184_v25 = vpop.permute.xlu0 %1183 }
 0x6d3   : > { %2605 = vmatpush3.bf16.msra.mxu0 %v1184_v25 }
 0x6d4   : > { %2622 = vmatprep.subr.bf16.mxu0 %v2875_v0  ;;  %v1355_v34 = vpop.permute.xlu1 %1354 }
 0x6d6   : > { %v1406_v38 = vpop.permute.xlu0 %1405 }
 0x6d8   : > { %v1408_v36 = vpop.permute.xlu1 %1407 }
 0x6d9   : > { %v2792_v26 = vpop.eup %2791  ;;  %v1413_v37 = vsel %vm735_vm2, %v1408_v36, 0 }
 0x6da   : > { %v1132_v31 = vmul.f32 %v2792_v26, %v2788_v58 }
 0x6db   : > { %v2794_v28 = vpop.eup %2793 }
 0x6dc   : > { %v1133_v32 = vmul.f32 %v2794_v28, %v2790_v60 }
 0x6de   : > { %v1135_v33 = vpack.c.bf16 %v1133_v32, %v1132_v31 }
 0x6e0   : > { %2607 = vmatmul.mubr.msk.bf16.vlgmr.msra.gmra.mrb[12].mxu0 %vm837_vm3, %v1135_v33 }
 0x6e1   : > { %2623 = vmatpush3.bf16.xpose.msra.mxu0 %v1362_v35  ;;  %2624 = vmatprep.mubr.msk.bf16.mxu0 %vm2876_vm1, %v2875_v0 }
 0x6e2   : > { %2628 = vmatprep.subr.bf16.mxu0 %v2875_v0 }
 0x6e8   : > { %2625 = vmatmul.mubr.msk.bf16.vlgmr.msra.gmra.mrb[16].mxu0 %vm735_vm2, %v1355_v34 }
 0x6e9   : > { %2629 = vmatpush3.bf16.xpose.msra.mxu0 %v1413_v37  ;;  %2630 = vmatprep.mubr.msk.bf16.mxu0 %vm2876_vm1, %v2875_v0  ;;  %v2437_v37 = vld [vmem:[%s3372_s7 + $0x4] sm:$0xf] }
 0x6ea   : > { %2640 = vmatprep.subr.bf16.mxu0 %v2875_v0 }
 0x6f0   : > { %2631 = vmatmul.mubr.msk.bf16.vlgmr.msra.gmra.mrb[20].mxu0 %vm735_vm2, %v1406_v38  ;;  %v1242_v38 = vsel %vm1240_vm4, %v2437_v37, 0 }
 0x6f1   : > { %2642 = vmatprep.mubr.msk.bf16.mxu0 %vm2876_vm1, %v2875_v0 }
 0x70b   : > { %v1092_v39 = vpop.xlane.xlu1 %1091 }
 0x70c   : > { %v1102_v40 = vsub.f32 %v1086_v16, %v1092_v39  ;;  %v978_v39 = vld [vmem:[%s3372_s7] sm:$0xf] }
 0x70d   : > { %v1095_v41 = vpop.xlane.xlu0 %1094 }
 0x70e   : > { %v1106_v42 = vmul.f32 1.442695, %v1102_v40  ;;  %v1103_v43 = vsub.f32 %v1087_v18, %v1095_v41 }
 0x70f   : > { %v1137_v44 = vpop.permute.xlu1 %1136 }
 0x710   : > { %2795 = vpow2.f32 %v1106_v42  ;;  %v1108_v45 = vmul.f32 1.442695, %v1103_v43  ;;  %2599 = vmatpush3.bf16.msra.mxu1 %v1137_v44 }
 0x711   : > { %2714 = vmatprep.subr.msk.bf16.mxu1 %vm1240_vm4, %v2437_v37 }
 0x712   : > { %2797 = vpow2.f32 %v1108_v45 }
 0x71a   : > { %v2796_v46 = vpop.eup %2795 }
 0x71b   : > { %v1114_v47 = vsel %vm837_vm3, %v2796_v46, 0.0 }
 0x71c   : > { %v2798_v48 = vpop.eup %2797  ;;  %1115 = vadd.xlane.f32.xlu0 %v1114_v47 }
 0x71d   : > { %v1117_v49 = vsel %vm837_vm3, %v2798_v48, 0.0 }
 0x720   : > { %1118 = vadd.xlane.f32.xlu0 %v1117_v49 }
 0x7a9   : > { %v1116_v51 = vpop.xlane.xlu0 %1115 }
 0x7aa   : > { %2799 = vrcp.f32 %v1116_v51 }
 0x7ad   : > { %v1119_v53 = vpop.xlane.xlu0 %1118 }
 0x7ae   : > { %2801 = vrcp.f32 %v1119_v53 }
 0x7b3   : > { %v3173_v54 = vpop.f32.mrb[12].mxu0 }
 0x7b4   : > { %v2608_v55 = vpop.f32.mrb[13].mxu0  ;;  %v2800_v57 = vpop.eup %2799 }
 0x7b5   : > { %v3175_v56 = vpop.f32.mrb[14].mxu0  ;;  %v1130_v61 = vmul.f32 %v2800_v57, %v2796_v46 }
 0x7b6   : > { %v1233_v58 = vpack.c.bf16 %v3175_v56, %v3173_v54  ;;  %v2609_v59 = vpop.f32.mrb[15].mxu0 }
 0x7b8   : > { %v2802_v60 = vpop.eup %2801 }
 0x7b9   : > { %v1131_v63 = vmul.f32 %v2802_v60, %v2798_v48 }
 0x7bb   : > { %v1398_v8 = vpop.f32.mrb[16].mxu0  ;;  %v1134_v9 = vpack.c.bf16 %v1131_v63, %v1130_v61 }
 0x7bc   : > { %v1399_v11 = vadd.f32 %v2442_v7, %v1398_v8  ;;  %v2626_v12 = vpop.f32.mrb[17].mxu0 }
 0x7bd   : > { %2601 = vmatmul.mubr.msk.bf16.vlgmr.msra.gmra.mrb[16].mxu1 %vm837_vm3, %v1134_v9  ;;  %v1401_v13 = vpop.f32.mrb[18].mxu0 }
 0x7be   : > { %v1402_v16 = vadd.f32 %v2443_v10, %v1401_v13  ;;  %v2627_v17 = vpop.f32.mrb[19].mxu0  ;;  %v1456_v18 = vadd.f32 %v1399_v11, %v3094_v52  ;;  %2611 = vmatpush3.bf16.msra.mxu1 %v1242_v38 }
 0x7bf   : > { %2715 = vmatprep.subr.msk.bf16.mxu1 %vm1240_vm4, %v978_v39 }
 0x7c0   : > { %v1460_v19 = vsel %vm837_vm3, %v1456_v18, -inf  ;;  %v1457_v20 = vadd.f32 %v1402_v16, %v3088_v50  ;;  %v1300_v16 = vsel %vm1240_vm4, %v978_v39, 0 }
 0x7c1   : > { %1461 = vmax.xlane.f32.xlu0 %v1460_v19 }
 0x7c2   : > { %v1463_v26 = vsel %vm837_vm3, %v1457_v20, -inf }
 0x7c3   : > { %v1449_v21 = vpop.f32.mrb[20].mxu0 }
 0x7c4   : > { %v1450_v22 = vadd.f32 %v2442_v7, %v1449_v21  ;;  %v2632_v25 = vpop.f32.mrb[21].mxu0 }
 0x7c5   : > { %v1452_v28 = vpop.f32.mrb[22].mxu0  ;;  %1464 = vmax.xlane.f32.xlu0 %v1463_v26 }
 0x7c6   : > { %v1453_v31 = vadd.f32 %v2443_v10, %v1452_v28  ;;  %v2633_v32 = vpop.f32.mrb[23].mxu0  ;;  %v1458_v33 = vadd.f32 %v1450_v22, %v3068_v23 }
 0x7c8   : > { %v1466_v34 = vsel %vm837_vm3, %v1458_v33, -inf  ;;  %v1459_v35 = vadd.f32 %v1453_v31, %v3073_v30 }
 0x7c9   : > { %1467 = vmax.xlane.f32.xlu0 %v1466_v34 }
 0x7ca   : > { %v1469_v36 = vsel %vm837_vm3, %v1459_v35, -inf }
 0x7cd   : > { %1470 = vmax.xlane.f32.xlu0 %v1469_v36 }
 0x84e   : > { %v1462_v40 = vpop.xlane.xlu0 %1461 }
 0x84f   : > { %v1472_v41 = vsub.f32 %v1456_v18, %v1462_v40 }
 0x851   : > { %v1476_v42 = vmul.f32 1.442695, %v1472_v41 }
 0x852   : > { %v1465_v43 = vpop.xlane.xlu0 %1464 }
 0x853   : > { %2803 = vpow2.f32 %v1476_v42  ;;  %v1473_v44 = vsub.f32 %v1457_v20, %v1465_v43 }
 0x855   : > { %v1478_v45 = vmul.f32 1.442695, %v1473_v44 }
 0x856   : > { %v1468_v46 = vpop.xlane.xlu0 %1467 }
 0x857   : > { %2805 = vpow2.f32 %v1478_v45  ;;  %v1474_v47 = vsub.f32 %v1458_v33, %v1468_v46  ;;  %v2448_v33 = vld [vmem:[%s3372_s7 + $0x8] sm:$0xf]  ;;  %v2451_v46 = vld [vmem:[%s3366_s1 + $0x30] sm:$0xff] }
 0x858   : > { %v1611_v34 = vsel %vm1240_vm4, %v2448_v33, 0 }
 0x859   : > { %v1480_v48 = vmul.f32 1.442695, %v1474_v47 }
 0x85a   : > { %v1471_v49 = vpop.xlane.xlu0 %1470 }
 0x85b   : > { %2807 = vpow2.f32 %v1480_v48  ;;  %v1475_v51 = vsub.f32 %v1459_v35, %v1471_v49  ;;  %v2452_v48 = vld [vmem:[%s3366_s1 + $0x38] sm:$0xff] }
 0x85d   : > { %v2804_v53 = vpop.eup %2803  ;;  %v1482_v55 = vmul.f32 1.442695, %v1475_v51 }
 0x85e   : > { %v1484_v57 = vsel %vm837_vm3, %v2804_v53, 0.0 }
 0x85f   : > { %2809 = vpow2.f32 %v1482_v55  ;;  %1485 = vadd.xlane.f32.xlu1 %v1484_v57 }
 0x861   : > { %v2806_v59 = vpop.eup %2805 }
 0x862   : > { %v1487_v60 = vsel %vm837_vm3, %v2806_v59, 0.0 }
 0x863   : > { %1488 = vadd.xlane.f32.xlu0 %v1487_v60 }
 0x865   : > { %v2808_v61 = vpop.eup %2807 }
 0x866   : > { %v1490_v63 = vsel %vm837_vm3, %v2808_v61, 0.0 }
 0x867   : > { %1491 = vadd.xlane.f32.xlu0 %v1490_v63 }
 0x869   : > { %v2810_v7 = vpop.eup %2809 }
 0x86a   : > { %v1493_v8 = vsel %vm837_vm3, %v2810_v7, 0.0 }
 0x86b   : > { %1494 = vadd.xlane.f32.xlu0 %v1493_v8 }
 0x870   : > { %1553 = vrot.lane.b32.xlu1 %v3041_v14, %s2884_s27 }
 0x881   : > { %1506 = vrot.lane.b32.xlu0 %v3043_v15, %s2884_s27 }
 0x885   : > { %1671 = vrot.lane.b32.xlu0 %v3043_v15, %s2885_s28 }
 0x889   : > { %1722 = vrot.lane.b32.xlu0 %v3041_v14, %s2885_s28 }
 0x88d   : > { %1669 = vrot.lane.b32.xlu0 %v3043_v15, %s2886_s29 }
 0x890   : > { %v1176_v9 = vpop.f32.mrb[16].mxu1 }
 0x891   : > { %1720 = vrot.lane.b32.xlu0 %v3041_v14, %s2886_s29  ;;  %v2602_v10 = vpop.f32.mrb[17].mxu1 }
 0x892   : > { %v1179_v11 = vpop.f32.mrb[18].mxu1 }
 0x893   : > { %v1232_v12 = vpack.c.bf16 %v1179_v11, %v1176_v9  ;;  %v2603_v13 = vpop.f32.mrb[19].mxu1 }
 0x895   : > { %2612 = vmatprep.mubr.msk.bf16.mxu1 %vm735_vm2, %v1232_v12 }
 0x896   : > { %2613 = vmatmul.mubr.msk.bf16.vlgmr.msra.gmra.mrb[20].mxu1 %vm735_vm2, %v1233_v58 }
 0x897   : > { %2618 = vmatprep.mubr.msk.bf16.mxu1 %vm735_vm2, %v979_v6  ;;  %2617 = vmatpush3.bf16.msra.mxu1 %v1300_v16 }
 0x898   : > { %2634 = vmatprep.subr.bf16.mxu1 %v2875_v0 }
 0x8a2   : > { %2619 = vmatmul.mubr.msk.bf16.vlgmr.msra.gmra.mrb[20].mxu1 %vm735_vm2, %v980_v29 }
 0x8a3   : > { %2636 = vmatprep.mubr.msk.bf16.mxu1 %vm2876_vm1, %v2875_v0 }
 0x8ec   : > { %v1486_v17 = vpop.xlane.xlu1 %1485 }
 0x8ed   : > { %2811 = vrcp.f32 %v1486_v17 }
 0x8f0   : > { %v1489_v54 = vpop.xlane.xlu0 %1488  ;;  %v1554_v56 = vpop.permute.xlu1 %1553 }
 0x8f1   : > { %2813 = vrcp.f32 %v1489_v54  ;;  %2641 = vmatpush3.bf16.msra.mxu0 %v1554_v56 }
 0x8f2   : > { %2652 = vmatprep.subr.bf16.mxu0 %v2875_v0 }
 0x8f4   : > { %v1492_v62 = vpop.xlane.xlu0 %1491 }
 0x8f5   : > { %2815 = vrcp.f32 %v1492_v62 }
 0x8f7   : > { %v2812_v6 = vpop.eup %2811 }
 0x8f8   : > { %v1495_v1 = vpop.xlane.xlu0 %1494  ;;  %v1500_v24 = vmul.f32 %v2812_v6, %v2804_v53 }
 0x8f9   : > { %2817 = vrcp.f32 %v1495_v1 }
 0x8fb   : > { %v2814_v58 = vpop.eup %2813 }
 0x8fc   : > { %v1501_v27 = vmul.f32 %v2814_v58, %v2806_v59  ;;  %v1507_v29 = vpop.permute.xlu0 %1506 }
 0x8fd   : > { %2635 = vmatpush3.bf16.msra.mxu1 %v1507_v29 }
 0x8fe   : > { %v1504_v18 = vpack.c.bf16 %v1501_v27, %v1500_v24  ;;  %2716 = vmatprep.subr.msk.bf16.mxu1 %vm1240_vm4, %v2448_v33 }
 0x8ff   : > { %v2816_v19 = vpop.eup %2815 }
 0x900   : > { %2637 = vmatmul.mubr.msk.bf16.vlgmr.msra.gmra.mrb[24].mxu1 %vm837_vm3, %v1504_v18  ;;  %v1672_v21 = vpop.permute.xlu0 %1671  ;;  %v1502_v22 = vmul.f32 %v2816_v19, %v2808_v61 }
 0x901   : > { %v1677_v28 = vsel %vm735_vm2, %v1672_v21, 0  ;;  %2647 = vmatpush3.bf16.msra.mxu1 %v1611_v34 }
 0x902   : > { %2658 = vmatprep.subr.bf16.mxu1 %v2875_v0 }
 0x903   : > { %v2818_v20 = vpop.eup %2817 }
 0x904   : > { %v1503_v25 = vmul.f32 %v2818_v20, %v2810_v7  ;;  %v1723_v31 = vpop.permute.xlu0 %1722 }
 0x905   : > { %v1728_v45 = vsel %vm735_vm2, %v1723_v31, 0 }
 0x906   : > { %v1505_v26 = vpack.c.bf16 %v1503_v25, %v1502_v22 }
 0x908   : > { %2643 = vmatmul.mubr.msk.bf16.vlgmr.msra.gmra.mrb[24].mxu0 %vm837_vm3, %v1505_v26  ;;  %v1670_v32 = vpop.permute.xlu0 %1669 }
 0x909   : > { %2653 = vmatpush3.bf16.xpose.msra.mxu0 %v1677_v28  ;;  %2654 = vmatprep.mubr.msk.bf16.mxu0 %vm2876_vm1, %v2875_v0 }
 0x90a   : > { %2664 = vmatprep.subr.bf16.mxu0 %v2875_v0 }
 0x90c   : > { %v1721_v60 = vpop.permute.xlu0 %1720 }
 0x910   : > { %2655 = vmatmul.mubr.msk.bf16.vlgmr.msra.gmra.mrb[28].mxu0 %vm735_vm2, %v1670_v32 }
 0x911   : > { %2666 = vmatprep.mubr.msk.bf16.mxu0 %vm2876_vm1, %v2875_v0 }
 0x9d3   : > { %v1546_v35 = vpop.f32.mrb[24].mxu1 }
 0x9d4   : > { %v2638_v36 = vpop.f32.mrb[25].mxu1 }
 0x9d5   : > { %v1549_v37 = vpop.f32.mrb[26].mxu1 }
 0x9d6   : > { %v1602_v38 = vpack.c.bf16 %v1549_v37, %v1546_v35  ;;  %v2639_v39 = vpop.f32.mrb[27].mxu1 }
 0x9d8   : > { %2648 = vmatprep.mubr.msk.bf16.mxu1 %vm735_vm2, %v1602_v38 }
 0x9db   : > { %v1593_v40 = vpop.f32.mrb[24].mxu0 }
 0x9dc   : > { %v2644_v41 = vpop.f32.mrb[25].mxu0 }
 0x9dd   : > { %v1596_v42 = vpop.f32.mrb[26].mxu0 }
 0x9de   : > { %v1603_v43 = vpack.c.bf16 %v1596_v42, %v1593_v40  ;;  %v2645_v44 = vpop.f32.mrb[27].mxu0 }
 0x9e0   : > { %2649 = vmatmul.mubr.msk.bf16.vlgmr.msra.gmra.mrb[20].mxu1 %vm735_vm2, %v1603_v43 }
 0x9e1   : > { %2659 = vmatpush3.bf16.xpose.msra.mxu1 %v1728_v45  ;;  %2660 = vmatprep.mubr.msk.bf16.mxu1 %vm2876_vm1, %v2875_v0  ;;  %v2457_v45 = vld [vmem:[%s3372_s7 + $0xc] sm:$0xf] }
 0x9e2   : > { %2670 = vmatprep.subr.bf16.mxu1 %v2875_v0 }
 0x9e3   : > { %v1713_v47 = vpop.f32.mrb[28].mxu0 }
 0x9e4   : > { %v1714_v49 = vadd.f32 %v2451_v46, %v1713_v47  ;;  %v2656_v51 = vpop.f32.mrb[29].mxu0 }
 0x9e5   : > { %v1716_v53 = vpop.f32.mrb[30].mxu0 }
 0x9e6   : > { %v1717_v55 = vadd.f32 %v2452_v48, %v1716_v53  ;;  %v2657_v57 = vpop.f32.mrb[31].mxu0  ;;  %v1771_v59 = vadd.f32 %v1714_v49, %v3094_v52 }
 0x9e8   : > { %2661 = vmatmul.mubr.msk.bf16.vlgmr.msra.gmra.mrb[28].mxu1 %vm735_vm2, %v1721_v60  ;;  %v1775_v61 = vsel %vm837_vm3, %v1771_v59, -inf  ;;  %v1772_v63 = vadd.f32 %v1717_v55, %v3088_v50 }
 0x9e9   : > { %1776 = vmax.xlane.f32.xlu0 %v1775_v61  ;;  %2672 = vmatprep.mubr.msk.bf16.mxu1 %vm2876_vm1, %v2875_v0 }
 0x9ea   : > { %v1778_v7 = vsel %vm837_vm3, %v1772_v63, -inf }
 0x9eb   : > { %1779 = vmax.xlane.f32.xlu1 %v1778_v7  ;;  %v2460_v7 = vld [vmem:[%s3373_s8] ss:$0 sm:$0xff] }
 0xa76   : > { %v1777_v8 = vpop.xlane.xlu0 %1776 }
 0xa77   : > { %v1787_v9 = vsub.f32 %v1771_v59, %v1777_v8 }
 0xa78   : > { %v1780_v12 = vpop.xlane.xlu1 %1779 }
 0xa79   : > { %v1791_v10 = vmul.f32 1.442695, %v1787_v9  ;;  %v1788_v13 = vsub.f32 %v1772_v63, %v1780_v12 }
 0xa7b   : > { %2819 = vpow2.f32 %v1791_v10  ;;  %v1793_v16 = vmul.f32 1.442695, %v1788_v13 }
 0xa7d   : > { %2821 = vpow2.f32 %v1793_v16 }
 0xa85   : > { %v2820_v11 = vpop.eup %2819 }
 0xa86   : > { %v1799_v52 = vsel %vm837_vm3, %v2820_v11, 0.0 }
 0xa87   : > { %1800 = vadd.xlane.f32.xlu1 %v1799_v52  ;;  %v2822_v27 = vpop.eup %2821 }
 0xa88   : > { %v1802_v29 = vsel %vm837_vm3, %v2822_v27, 0.0 }
 0xabb   : > { %v1764_v50 = vpop.f32.mrb[28].mxu1 }
 0xabc   : > { %v1765_v17 = vadd.f32 %v2451_v46, %v1764_v50  ;;  %v2662_v54 = vpop.f32.mrb[29].mxu1  ;;  %v1926_v46 = vsel %vm1240_vm4, %v2457_v45, 0 }
 0xabd   : > { %v1767_v56 = vpop.f32.mrb[30].mxu1 }
 0xabe   : > { %v1768_v0 = vadd.f32 %v2452_v48, %v1767_v56  ;;  %v2663_v62 = vpop.f32.mrb[31].mxu1  ;;  %v1773_v1 = vadd.f32 %v1765_v17, %v3068_v23 }
 0xac0   : > { %v1781_v6 = vsel %vm837_vm3, %v1773_v1, -inf  ;;  %v1774_v58 = vadd.f32 %v1768_v0, %v3073_v30 }
 0xac1   : > { %1782 = vmax.xlane.f32.xlu0 %v1781_v6 }
 0xac2   : > { %v1784_v24 = vsel %vm837_vm3, %v1774_v58, -inf }
 0xac5   : > { %1785 = vmax.xlane.f32.xlu0 %v1784_v24 }
 0xac9   : > { %1803 = vadd.xlane.f32.xlu0 %v1802_v29 }
 0xb14   : > { %v1801_v32 = vpop.xlane.xlu1 %1800 }
 0xb4e   : > { %v1783_v18 = vpop.xlane.xlu0 %1782 }
 0xb4f   : > { %v1789_v19 = vsub.f32 %v1773_v1, %v1783_v18 }
 0xb51   : > { %v1795_v20 = vmul.f32 1.442695, %v1789_v19 }
 0xb52   : > { %v1786_v21 = vpop.xlane.xlu0 %1785 }
 0xb53   : > { %2823 = vpow2.f32 %v1795_v20  ;;  %v1790_v22 = vsub.f32 %v1774_v58, %v1786_v21 }
 0xb55   : > { %v1797_v25 = vmul.f32 1.442695, %v1790_v22 }
 0xb56   : > { %v1804_v31 = vpop.xlane.xlu0 %1803 }
 0xb57   : > { %2825 = vpow2.f32 %v1797_v25 }
 0xb58   : > { %2827 = vrcp.f32 %v1804_v31 }
 0xb59   : > { %2829 = vrcp.f32 %v1801_v32  ;;  %v2757_v32 = vld [vmem:[%s3376_s11] sm:$0xff]  }
 0xb5d   : > { %v2824_v23 = vpop.eup %2823 }
 0xb5e   : > { %v1805_v26 = vsel %vm837_vm3, %v2824_v23, 0.0 }
 0xb5f   : > { %1806 = vadd.xlane.f32.xlu1 %v1805_v26 }
 0xb61   : > { %v2826_v30 = vpop.eup %2825 }
 0xb62   : > { %v1808_v28 = vsel %vm837_vm3, %v2826_v30, 0.0  ;;  %v2828_v33 = vpop.eup %2827 }
 0xb63   : > { %1809 = vadd.xlane.f32.xlu0 %v1808_v28  ;;  %v2830_v35 = vpop.eup %2829  ;;  %v1816_v36 = vmul.f32 %v2828_v33, %v2822_v27  ;;  %v2758_v33 = vld [vmem:[%s3376_s11 + $0x8] sm:$0xff]  }
 0xb64   : > { %v1815_v37 = vmul.f32 %v2830_v35, %v2820_v11 }
 0xb66   : > { %v1819_v40 = vpack.c.bf16 %v1816_v36, %v1815_v37 }
 0xb70   : > { %1821 = vrot.lane.b32.xlu1 %v3043_v15, %s2887_s26 }
 0xb79   : > { %1868 = vrot.lane.b32.xlu0 %v3041_v14, %s2887_s26 }
 0xbec   : > { %v1807_v34 = vpop.xlane.xlu1 %1806 }
 0xbed   : > { %2831 = vrcp.f32 %v1807_v34 }
 0xbf0   : > { %v1810_v38 = vpop.xlane.xlu0 %1809  ;;  %v1822_v39 = vpop.permute.xlu1 %1821 }
 0xbf1   : > { %2833 = vrcp.f32 %v1810_v38  ;;  %2665 = vmatpush3.bf16.msra.mxu0 %v1822_v39 }
 0xbf2   : > { %2682 = vmatprep.subr.bf16.mxu0 %v2757_v32 }
 0xbf4   : > { %v1869_v41 = vpop.permute.xlu0 %1868  ;;  %2667 = vmatmul.mubr.msk.bf16.vlgmr.msra.gmra.mrb[32].mxu0 %vm837_vm3, %v1819_v40 }
 0xbf5   : > { %2671 = vmatpush3.bf16.msra.mxu1 %v1869_v41  ;;  %2683 = vmatpush3.bf16.msra.mxu0 %v2757_v32 }
 0xbf6   : > { %2717 = vmatprep.subr.msk.bf16.mxu1 %vm1240_vm4, %v2457_v45  ;;  %2684 = vmatprep.subr.bf16.mxu0 %v2758_v33  ;;  %v2461_v45 = vld [vmem:[%s3374_s9] ss:$0 sm:$0xff] }
 0xbf7   : > { %v2832_v14 = vpop.eup %2831 }
 0xbf8   : > { %v1817_v42 = vmul.f32 %v2832_v14, %v2824_v23 }
 0xbf9   : > { %2685 = vmatpush3.bf16.msra.mxu0 %v2758_v33 }
 0xbfb   : > { %v2834_v15 = vpop.eup %2833 }
 0xbfc   : > { %v1818_v43 = vmul.f32 %v2834_v15, %v2826_v30 }
 0xbfe   : > { %v1820_v44 = vpack.c.bf16 %v1818_v43, %v1817_v42 }
 0xc00   : > { %2673 = vmatmul.mubr.msk.bf16.vlgmr.msra.gmra.mrb[32].mxu1 %vm837_vm3, %v1820_v44 }
 0xc01   : > { %2677 = vmatpush3.bf16.msra.mxu1 %v1926_v46 }
 0xcc7   : > { %v1861_v47 = vpop.f32.mrb[32].mxu0 }
 0xcc8   : > { %v2668_v48 = vpop.f32.mrb[33].mxu0 }
 0xcc9   : > { %v1864_v49 = vpop.f32.mrb[34].mxu0 }
 0xcca   : > { %v1917_v51 = vpack.c.bf16 %v1864_v49, %v1861_v47  ;;  %v2669_v53 = vpop.f32.mrb[35].mxu0 }
 0xccb   : > { %v2462_v53 = vld [vmem:[%s3375_s10] ss:$0 sm:$0xff] }
 0xccc   : > { %2678 = vmatprep.mubr.msk.bf16.mxu1 %vm735_vm2, %v1917_v51 }
 0xcd3   : > { %v1908_v55 = vpop.f32.mrb[32].mxu1 }
 0xcd4   : > { %v2674_v57 = vpop.f32.mrb[33].mxu1 }
 0xcd5   : > { %v1911_v59 = vpop.f32.mrb[34].mxu1 }
 0xcd6   : > { %v1918_v60 = vpack.c.bf16 %v1911_v59, %v1908_v55  ;;  %v2675_v61 = vpop.f32.mrb[35].mxu1 }
 0xcd8   : > { %2679 = vmatmul.mubr.msk.bf16.vlgmr.msra.gmra.mrb[20].mxu1 %vm735_vm2, %v1918_v60 }
 0xdab   : > { %v2680_v63 = vpop.f32.mrb[20].mxu1 }
 0xdac   : > { %v1962_v8 = vpop.f32.mrb[21].mxu1  ;;  %v1983_v9 = vadd.f32 %v2680_v63, %v2996_v3 }
 0xdad   : > { %v1981_v10 = vadd.f32 %v2994_v2, %v1962_v8  ;;  %v2681_v11 = vpop.f32.mrb[22].mxu1 }
 0xdae   : > { %v1965_v52 = vpop.f32.mrb[23].mxu1  ;;  %v1984_v13 = vadd.f32 %v2681_v11, %v3000_v5  ;;  %v3293_v50 = vadd.f32 %v2460_v7, %v1983_v9 }
 0xdaf   : > { %v3289_v12 = vadd.f32 %v2460_v7, %v1981_v10  ;;  %v1982_v16 = vadd.f32 %v2998_v4, %v1965_v52 }
 0xdb0   : > { %v3299_v56 = vadd.f32 %v2460_v7, %v1984_v13  ;;  %v2002_v3 = vsel %vm568_vm0, %v3293_v50, 0.0  ;;  %v2759_v13 = vld [vmem:[%s3378_s13] sm:$0xff]  }
 0xdb1   : > { %v3295_v17 = vadd.f32 %v2460_v7, %v1982_v16  ;;  %v1996_v54 = vsel %vm568_vm0, %v3289_v12, 0.0  ;;  %v2760_v16 = vld [vmem:[%s3378_s13 + $0x8] sm:$0xff]   ;;  %2690 = vmatprep.subr.bf16.mxu0 %v2759_v13 }
 0xdb2   : > { %1997 = vadd.xlane.f32.xlu1 %v1996_v54  ;;  %v2005_v4 = vsel %vm568_vm0, %v3299_v56, 0.0  ;;  %v2761_v54 = vld [vmem:[%s3378_s13 + $0x10] sm:$0xff]  }
 0xdb3   : > { %v1999_v2 = vsel %vm568_vm0, %v3295_v17, 0.0 }
 0xdb4   : > { %2000 = vadd.xlane.f32.xlu0 %v1999_v2  ;;  %v2762_v2 = vld [vmem:[%s3378_s13 + $0x18] sm:$0xff]  }
 0xdb6   : > { %2003 = vadd.xlane.f32.xlu1 %v2002_v3  ;;  %v2463_v3 = vld [vmem:[%s3377_s12] ss:$0 sm:$0xff] }
 0xdb8   : > { %2006 = vadd.xlane.f32.xlu0 %v2005_v4 }
 0xe3f   : > { %v1998_v5 = vpop.xlane.xlu1 %1997 }
 0xe40   : > { %v2008_v0 = vmul.f32 0.03125, %v1998_v5 }
 0xe41   : > { %v2001_v62 = vpop.xlane.xlu0 %2000 }
 0xe42   : > { %v2012_v1 = vsub.f32 %v3289_v12, %v2008_v0  ;;  %v2009_v6 = vmul.f32 0.03125, %v2001_v62 }
 0xe43   : > { %v2004_v58 = vpop.xlane.xlu1 %2003 }
 0xe44   : > { %v2013_v24 = vsub.f32 %v3295_v17, %v2009_v6  ;;  %v2010_v27 = vmul.f32 0.03125, %v2004_v58  ;;  %v2016_v29 = vmul.f32 %v2012_v1, %v2012_v1 }
 0xe45   : > { %v2007_v18 = vpop.xlane.xlu0 %2006 }
 0xe46   : > { %v2014_v19 = vsub.f32 %v3293_v50, %v2010_v27  ;;  %v2011_v20 = vmul.f32 0.03125, %v2007_v18  ;;  %v2020_v21 = vsel %vm568_vm0, %v2016_v29, 0.0  ;;  %v2017_v22 = vmul.f32 %v2013_v24, %v2013_v24 }
 0xe47   : > { %2021 = vadd.xlane.f32.xlu1 %v2020_v21 }
 0xe48   : > { %v2015_v25 = vsub.f32 %v3299_v56, %v2011_v20  ;;  %v2023_v23 = vsel %vm568_vm0, %v2017_v22, 0.0  ;;  %v2018_v26 = vmul.f32 %v2014_v19, %v2014_v19 }
 0xe49   : > { %2024 = vadd.xlane.f32.xlu0 %v2023_v23 }
 0xe4a   : > { %v2026_v30 = vsel %vm568_vm0, %v2018_v26, 0.0  ;;  %v2019_v28 = vmul.f32 %v2015_v25, %v2015_v25 }
 0xe4b   : > { %2027 = vadd.xlane.f32.xlu1 %v2026_v30 }
 0xe4c   : > { %v2029_v31 = vsel %vm568_vm0, %v2019_v28, 0.0 }
 0xe4d   : > { %2030 = vadd.xlane.f32.xlu0 %v2029_v31 }
 0xed4   : > { %v2022_v34 = vpop.xlane.xlu1 %2021 }
 0xed5   : > { %v2032_v35 = vmul.f32 0.03125, %v2022_v34 }
 0xed6   : > { %v2025_v36 = vpop.xlane.xlu0 %2024 }
 0xed7   : > { %v2036_v37 = vadd.f32 1e-05, %v2032_v35  ;;  %v2033_v38 = vmul.f32 0.03125, %v2025_v36 }
 0xed8   : > { %v2028_v39 = vpop.xlane.xlu1 %2027 }
 0xed9   : > { %2835 = vrsqrt.f32 %v2036_v37  ;;  %v2037_v40 = vadd.f32 1e-05, %v2033_v38  ;;  %v2034_v41 = vmul.f32 0.03125, %v2028_v39 }
 0xeda   : > { %v2031_v14 = vpop.xlane.xlu0 %2030 }
 0xedb   : > { %2837 = vrsqrt.f32 %v2037_v40  ;;  %v2038_v15 = vadd.f32 1e-05, %v2034_v41  ;;  %v2035_v42 = vmul.f32 0.03125, %v2031_v14 }
 0xedd   : > { %2839 = vrsqrt.f32 %v2038_v15  ;;  %v2039_v43 = vadd.f32 1e-05, %v2035_v42 }
 0xedf   : > { %2841 = vrsqrt.f32 %v2039_v43 }
 0xee3   : > { %v2836_v44 = vpop.eup %2835 }
 0xee4   : > { %v2044_v46 = vmul.f32 %v2836_v44, %v2012_v1 }
 0xee5   : > { %v2838_v47 = vpop.eup %2837 }
 0xee6   : > { %v2045_v48 = vmul.f32 %v2838_v47, %v2013_v24  ;;  %v2055_v49 = vmul.f32 %v2461_v45, %v2044_v46 }
 0xee7   : > { %v2840_v51 = vpop.eup %2839 }
 0xee8   : > { %v2046_v55 = vmul.f32 %v2840_v51, %v2014_v19  ;;  %v2056_v57 = vmul.f32 %v2461_v45, %v2045_v48  ;;  %v2066_v63 = vadd.f32 %v2462_v53, %v2055_v49 }
 0xee9   : > { %v2842_v59 = vpop.eup %2841 }
 0xeea   : > { %v2057_v60 = vmul.f32 %v2461_v45, %v2046_v55  ;;  %v2047_v61 = vmul.f32 %v2842_v59, %v2015_v25  ;;  %v2067_v7 = vadd.f32 %v2462_v53, %v2056_v57 }
 0xeec   : > { %v2058_v8 = vmul.f32 %v2461_v45, %v2047_v61  ;;  %v2074_v9 = vpack.c.bf16 %v2067_v7, %v2066_v63  ;;  %v2068_v10 = vadd.f32 %v2462_v53, %v2057_v60  ;;  %v2468_v60 = vld [vmem:[%s3379_s14] ss:$0 sm:$0xff] }
 0xeee   : > { %2686 = vmatprep.mubr.msk.bf16.mxu0 %vm568_vm0, %v2074_v9  ;;  %v2069_v11 = vadd.f32 %v2462_v53, %v2058_v8 }
 0xef0   : > { %v2075_v52 = vpack.c.bf16 %v2069_v11, %v2068_v10 }
 0xef2   : > { %2687 = vmatmul.mubr.msk.bf16.vlgmr.msra.gmra.mrb[36].mxu0 %vm568_vm0, %v2075_v52 }
 0xef3   : > { %2691 = vmatpush3.bf16.msra.mxu0 %v2759_v13 }
 0xef4   : > { %2692 = vmatprep.subr.bf16.mxu0 %v2760_v16 }
 0xef7   : > { %2693 = vmatpush3.bf16.msra.mxu0 %v2760_v16 }
 0xef8   : > { %2694 = vmatprep.subr.bf16.mxu0 %v2761_v54 }
 0xefb   : > { %2695 = vmatpush3.bf16.msra.mxu0 %v2761_v54 }
 0xefc   : > { %2696 = vmatprep.subr.bf16.mxu0 %v2762_v2 }
 0xeff   : > { %2697 = vmatpush3.bf16.msra.mxu0 %v2762_v2 }
 0xfc5   : > { %v2688_v4 = vpop.f32.mrb[36].mxu0 }
 0xfc6   : > { %v2144_v5 = vadd.f32 %v2688_v4, %v2463_v3  ;;  %v2135_v0 = vpop.f32.mrb[37].mxu0 }
 0xfc7   : > { %v2136_v62 = vadd.f32 %v2463_v3, %v2135_v0  ;;  %v2689_v1 = vpop.f32.mrb[38].mxu0 }
 0xfc8   : > { %v2156_v6 = vmul.f32 0.044715, %v2144_v5  ;;  %v2147_v58 = vadd.f32 %v2689_v1, %v2463_v3  ;;  %v2138_v24 = vpop.f32.mrb[39].mxu0  ;;  %v2152_v43 = vmul.f32 0.5, %v2144_v5 }
 0xfc9   : > { %v2154_v27 = vmul.f32 0.044715, %v2136_v62  ;;  %v2139_v29 = vadd.f32 %v2463_v3, %v2138_v24  ;;  %v2150_v46 = vmul.f32 0.5, %v2136_v62 }
 0xfca   : > { %v2160_v18 = vmul.f32 %v2156_v6, %v2144_v5  ;;  %v2157_v19 = vmul.f32 0.044715, %v2147_v58  ;;  %v2153_v44 = vmul.f32 0.5, %v2147_v58 }
 0xfcb   : > { %v2158_v20 = vmul.f32 %v2154_v27, %v2136_v62  ;;  %v2155_v21 = vmul.f32 0.044715, %v2139_v29  ;;  %v2151_v47 = vmul.f32 0.5, %v2139_v29 }
 0xfcc   : > { %v2164_v22 = vmul.f32 %v2160_v18, %v2144_v5  ;;  %v2161_v25 = vmul.f32 %v2157_v19, %v2147_v58 }
 0xfcd   : > { %v2162_v23 = vmul.f32 %v2158_v20, %v2136_v62  ;;  %v2159_v26 = vmul.f32 %v2155_v21, %v2139_v29 }
 0xfce   : > { %v2168_v30 = vadd.f32 %v2164_v22, %v2144_v5  ;;  %v2165_v28 = vmul.f32 %v2161_v25, %v2147_v58 }
 0xfcf   : > { %v2166_v31 = vadd.f32 %v2162_v23, %v2136_v62  ;;  %v2163_v32 = vmul.f32 %v2159_v26, %v2139_v29 }
 0xfd0   : > { %v2172_v33 = vmul.f32 0.7978846, %v2168_v30  ;;  %v2169_v34 = vadd.f32 %v2165_v28, %v2147_v58 }
 0xfd1   : > { %v2170_v35 = vmul.f32 0.7978846, %v2166_v31  ;;  %v2167_v36 = vadd.f32 %v2163_v32, %v2139_v29 }
 0xfd2   : > { %2843 = vtanh.f32 %v2172_v33  ;;  %v2173_v37 = vmul.f32 0.7978846, %v2169_v34 }
 0xfd3   : > { %2845 = vtanh.f32 %v2170_v35  ;;  %v2171_v38 = vmul.f32 0.7978846, %v2167_v36 }
 0xfd4   : > { %2847 = vtanh.f32 %v2173_v37 }
 0xfd5   : > { %2849 = vtanh.f32 %v2171_v38 }
 0xfdc   : > { %v2844_v39 = vpop.eup %2843 }
 0xfdd   : > { %v2846_v40 = vpop.eup %2845  ;;  %v2180_v41 = vadd.f32 1.0, %v2844_v39 }
 0xfde   : > { %v2848_v14 = vpop.eup %2847  ;;  %v2178_v15 = vadd.f32 1.0, %v2846_v40 }
 0xfdf   : > { %v2850_v42 = vpop.eup %2849  ;;  %v2181_v45 = vadd.f32 1.0, %v2848_v14  ;;  %v2184_v49 = vmul.f32 %v2180_v41, %v2152_v43 }
 0xfe0   : > { %v2179_v48 = vadd.f32 1.0, %v2850_v42  ;;  %v2182_v53 = vmul.f32 %v2178_v15, %v2150_v46 }
 0xfe1   : > { %v2185_v51 = vmul.f32 %v2181_v45, %v2153_v44 }
 0xfe2   : > { %v2183_v55 = vmul.f32 %v2179_v48, %v2151_v47 }
 0xfe3   : > { %v2195_v57 = vpack.c.bf16 %v2185_v51, %v2184_v49 }
 0xfe4   : > { %v2194_v59 = vpack.c.bf16 %v2183_v55, %v2182_v53 }
 0xfe6   : > { %2698 = vmatprep.mubr.msk.bf16.mxu0 %vm2227_vm5, %v2194_v59 }
 0xfe7   : > { %2699 = vmatmul.mubr.msk.bf16.vlgmr.msra.gmra.mrb[40].mxu0 %vm2227_vm5, %v2195_v57 }
0x10ba   : > { %v2700_v61 = vpop.f32.mrb[40].mxu0 }
0x10bb   : > { %v2277_v63 = vadd.f32 %v2700_v61, %v2468_v60  ;;  %v2268_v7 = vpop.f32.mrb[41].mxu0 }
0x10bc   : > { %v2269_v8 = vadd.f32 %v2468_v60, %v2268_v7  ;;  %v2701_v9 = vpop.f32.mrb[42].mxu0 }
0x10bd   : > { %v2285_v10 = vadd.f32 %v2277_v63, %v3293_v50  ;;  %v2280_v11 = vadd.f32 %v2701_v9, %v2468_v60  ;;  %v2271_v52 = vpop.f32.mrb[43].mxu0 }
0x10be   : > { %v2283_v13 = vadd.f32 %v2269_v8, %v3289_v12  ;;  %v2272_v16 = vadd.f32 %v2468_v60, %v2271_v52 }
0x10bf   : > { %v2485_v54 = vpack.c.bf16 %v2285_v10, %v2285_v10  ;;  %v2286_v2 = vadd.f32 %v2280_v11, %v3299_v56 }
0x10c0   : > { %v2483_v3 = vpack.c.bf16 %v2283_v13, %v2283_v13  ;;  %v2284_v4 = vadd.f32 %v2272_v16, %v3295_v17 }
0x10c1   : > { %2306 = vst.msk [vmem:[%s557_s23 + $0x8] sm:$0xf] %vm2303_vm6, %v2485_v54  ;;  %v2486_v5 = vpack.c.bf16 %v2286_v2, %v2286_v2 }
0x10c2   : > { %2304 = vst.msk [vmem:[%s557_s23] sm:$0xf] %vm2303_vm6, %v2483_v3  ;;  %v2484_v50 = vpack.c.bf16 %v2284_v4, %v2284_v4 }
0x10c3   : > { %2307 = vst.msk [vmem:[%s557_s23 + $0xc] sm:$0xf] %vm2303_vm6, %v2486_v5 }
0x10c4   : > { %2305 = vst.msk [vmem:[%s557_s23 + $0x4] sm:$0xf] %vm2303_vm6, %v2484_v50 }
0x10c5 PF: > { %s25_s20 = sadd.s32 1, %s2873_s20   ;;  %s3381_s18 = smov %s2869_s19 }
0x10c6   : > { %p22_p5 = scmp.ge.s32.totalorder %s25_s20, 4   ;;  %s3382_s19 = smov %s3384_s21 }
0x10c8   :  { %24 = sbr.rel (!%p22_p5) target bundleno = 2 (0x2), region = 119 }

// kernel: _lambda_.9
= control target key start
LH: loop header
LB: loop body
LE: loop exit
PB: predicated region body
PF: predicated region fallthrough
CT: control target
= control target key end

     0   :  { %s3133_s18 = smov 0   ;;  %s3135_s19 = smov 0   ;;  %s3755_s0 = inlined_call_operand.vmem [shape: bf16[2,64,16], index: 0, kind: input, shape index: {}]   ;;  %s3756_s1 = inlined_call_operand.vmem [shape: f32[2,16,16], index: 1, kind: input, shape index: {}]   ;;  %s3757_s2 = inlined_call_operand.vmem [shape: f32[4,16,16], index: 2, kind: input, shape index: {}]   ;;  %s3758_s3 = inlined_call_operand.vmem [shape: f32[1,16], index: 3, kind: input, shape index: {}, may-alias: {3,9}]   ;;  %s3759_s4 = inlined_call_operand.vmem [shape: f32[1,16], index: 4, kind: input, shape index: {}, may-alias: {4,8,10,14}]   ;;  %s3760_s5 = inlined_call_operand.vmem [shape: bf16[16,48], index: 5, kind: input, shape index: {}]   ;;  %s3761_s6 = inlined_call_operand.vmem [shape: f32[1,48], index: 6, kind: input, shape index: {}]   ;;  %s3762_s7 = inlined_call_operand.vmem [shape: bf16[2,8,16], index: 7, kind: input, shape index: {}]   ;;  %s3763_s8 = inlined_call_operand.vmem [shape: f32[1,16], index: 8, kind: input, shape index: {}, may-alias: {4,8,10,14}]   ;;  %s3764_s9 = inlined_call_operand.vmem [shape: f32[1,16], index: 9, kind: input, shape index: {}, may-alias: {3,9}]   ;;  %s3765_s10 = inlined_call_operand.vmem [shape: f32[1,16], index: 10, kind: input, shape index: {}, may-alias: {4,8,10,14}]   ;;  %s3766_s11 = inlined_call_operand.vmem [shape: bf16[16,32], index: 11, kind: input, shape index: {}]   ;;  %s3767_s12 = inlined_call_operand.vmem [shape: f32[1,32], index: 12, kind: input, shape index: {}]   ;;  %s3768_s13 = inlined_call_operand.vmem [shape: bf16[32,16], index: 13, kind: input, shape index: {}]   ;;  %s3769_s14 = inlined_call_operand.vmem [shape: f32[1,16], index: 14, kind: input, shape index: {}, may-alias: {4,8,10,14}]   ;;  %s3770_s15 = inlined_call_operand.vmem [shape: bf16[2,64,16], index: 15, kind: output, shape index: {}]  }
   0x1   :  { %s3137_s20 = smov 0  }
   0x2 LB: > { %s37_s21 = sadd.s32 1, %s3040_s19  ;;  %p2564_p0 = scmp.ge.s32.totalorder %s3044_s20, 1  ;;  %s3044_s20 = sphi %s3137_s20, %s25_s20   ;;  %s3040_s19 = sphi %s3135_s19, %s3772_s19   ;;  %s3036_s18 = sphi %s3133_s18, %s3771_s18  }
   0x3   : > { %p39_p1 = scmp.ge.s32.totalorder %s37_s21, 2  ;;  %p470_p2 = scmp.lt.s32.totalorder %s3044_s20, 3 }
   0x5   : > { %s3774_s21 = smov (%p39_p1, %s37_s21), 0  ;;  %p471_p3 = pnand %p2564_p0, %p470_p2 }
   0x6   : > { %p533_p4 = scmp.lt.s32.totalorder (!%p471_p3), %s3036_s18, 1  ;;  %vm576_vm0 = vcmask (!%p471_p3), 130048   ;;  %v2906_v60 = vld [vmem:[%s3760_s5] sm:$0xff] (!%p471_p3)   ;;  %vm3047_vm1 = vmmov (!%p471_p3), 0   ;;  %s3048_s24 = smov (!%p471_p3), 112   ;;  %vm825_vm2 = vcmask (!%p471_p3), 64512  }
   0x7   : > { %474 = sbr.rel (%p471_p3) target bundleno = 3131 (0xc3b), region = 80  ;;  %2717 = vmatprep.subr.bf16.mxu0 (!%p471_p3), %v2906_v60  ;;  %s3049_s23 = smov (!%p471_p3), 96   ;;  %vm1829_vm3 = vcmask (!%p471_p3), 1043456   ;;  %vm2330_vm4 = vcmask (!%p471_p3), 261120   ;;  %vm2448_vm5 = vcmask (!%p471_p3), 125952  }
   0x8   : > { %2718 = vmatpush3.bf16.msra.mxu0 (!%p471_p3), %v2906_v60  ;;  %s3050_s26 = smov (!%p471_p3), 104   ;;  %s3051_s27 = smov (!%p471_p3), 120  }
   0x9   : > { %s3052_s17 = smov (!%p471_p3), 88  }
   0xe   : > { %s3776_s18 = smov (!%p533_p4, %s3036_s18), 1 }
   0xf   : > { %s2630_s22 = sshll.u32 %s3776_s18, 5 }
  0x10   : > { %s540_s25 = scalar_lea.vmem %s3755_s0, %s2630_s22 }
  0x11   : > { %v2641_v0 = vld [vmem:[%s540_s25] sm:$0xff]   ;;  %v2656_v1 = vld [vmem:[%s540_s25 + $0x8] sm:$0xff]   ;;  %v2657_v6 = vld [vmem:[%s540_s25 + $0x10] sm:$0xff]  }
  0x12   : > { %v3159_v2 = vunpack.c.l.bf16 %v2641_v0  ;;  %v3161_v3 = vunpack.c.l.bf16 %v2656_v1  ;;  %v3163_v4 = vunpack.c.h.bf16 %v2641_v0  ;;  %v3165_v5 = vunpack.c.h.bf16 %v2656_v1  ;;  %v2658_v13 = vld [vmem:[%s540_s25 + $0x18] sm:$0xff]   ;;  %s3721_s25 = scalar_lea.vmem %s3770_s15, %s2630_s22 }
  0x13   : > { %v3175_v11 = vunpack.c.l.bf16 %v2657_v6  ;;  %v3177_v12 = vunpack.c.h.bf16 %v2657_v6  ;;  %v3183_v16 = vunpack.c.l.bf16 %v2658_v13  ;;  %v3185_v17 = vunpack.c.h.bf16 %v2658_v13 }
  0x14   : > { %v577_v7 = vsel %vm576_vm0, %v3159_v2, 0.0  ;;  %v583_v8 = vsel %vm576_vm0, %v3161_v3, 0.0  ;;  %v580_v9 = vsel %vm576_vm0, %v3163_v4, 0.0  ;;  %v586_v10 = vsel %vm576_vm0, %v3165_v5, 0.0 }
  0x15   : > { %578 = vadd.xlane.f32.xlu0 %v577_v7  ;;  %584 = vadd.xlane.f32.xlu1 %v583_v8  ;;  %v589_v14 = vsel %vm576_vm0, %v3175_v11, 0.0  ;;  %v592_v15 = vsel %vm576_vm0, %v3177_v12, 0.0  ;;  %v595_v18 = vsel %vm576_vm0, %v3183_v16, 0.0  ;;  %v598_v19 = vsel %vm576_vm0, %v3185_v17, 0.0 }
  0x19   : > { %581 = vadd.xlane.f32.xlu0 %v580_v9  ;;  %587 = vadd.xlane.f32.xlu1 %v586_v10 }
  0x1d   : > { %590 = vadd.xlane.f32.xlu0 %v589_v14  ;;  %593 = vadd.xlane.f32.xlu1 %v592_v15 }
  0x21   : > { %596 = vadd.xlane.f32.xlu0 %v595_v18  ;;  %599 = vadd.xlane.f32.xlu1 %v598_v19 }
  0xa2   : > { %v579_v20 = vpop.xlane.xlu0 %578  ;;  %v585_v21 = vpop.xlane.xlu1 %584 }
  0xa3   : > { %v602_v22 = vmul.f32 0.0625, %v579_v20  ;;  %v604_v23 = vmul.f32 0.0625, %v585_v21 }
  0xa5   : > { %v3192_v24 = vsub.f32 %v3159_v2, %v602_v22  ;;  %v3195_v25 = vsub.f32 %v3161_v3, %v604_v23 }
  0xa6   : > { %v582_v26 = vpop.xlane.xlu0 %581  ;;  %v588_v27 = vpop.xlane.xlu1 %587 }
  0xa7   : > { %v603_v28 = vmul.f32 0.0625, %v582_v26  ;;  %v605_v29 = vmul.f32 0.0625, %v588_v27  ;;  %v618_v30 = vmul.f32 %v3192_v24, %v3192_v24  ;;  %v620_v31 = vmul.f32 %v3195_v25, %v3195_v25 }
  0xa9   : > { %v3202_v32 = vsub.f32 %v3163_v4, %v603_v28  ;;  %v3205_v33 = vsub.f32 %v3165_v5, %v605_v29  ;;  %v626_v34 = vsel %vm576_vm0, %v618_v30, 0.0  ;;  %v632_v37 = vsel %vm576_vm0, %v620_v31, 0.0 }
  0xaa   : > { %627 = vadd.xlane.f32.xlu0 %v626_v34  ;;  %v591_v35 = vpop.xlane.xlu0 %590  ;;  %v594_v36 = vpop.xlane.xlu1 %593  ;;  %v2569_v34 = vld [vmem:[%s3758_s3] ss:$0 sm:$0xff] }
  0xab   : > { %v606_v38 = vmul.f32 0.0625, %v591_v35  ;;  %v607_v39 = vmul.f32 0.0625, %v594_v36  ;;  %v619_v40 = vmul.f32 %v3202_v32, %v3202_v32  ;;  %v621_v41 = vmul.f32 %v3205_v33, %v3205_v33 }
  0xad   : > { %v3214_v42 = vsub.f32 %v3175_v11, %v606_v38  ;;  %v3217_v43 = vsub.f32 %v3177_v12, %v607_v39  ;;  %v629_v44 = vsel %vm576_vm0, %v619_v40, 0.0  ;;  %v635_v47 = vsel %vm576_vm0, %v621_v41, 0.0 }
  0xae   : > { %633 = vadd.xlane.f32.xlu0 %v632_v37  ;;  %630 = vadd.xlane.f32.xlu1 %v629_v44  ;;  %v597_v45 = vpop.xlane.xlu0 %596  ;;  %v600_v46 = vpop.xlane.xlu1 %599 }
  0xaf   : > { %v608_v48 = vmul.f32 0.0625, %v597_v45  ;;  %v609_v49 = vmul.f32 0.0625, %v600_v46  ;;  %v622_v50 = vmul.f32 %v3214_v42, %v3214_v42  ;;  %v623_v51 = vmul.f32 %v3217_v43, %v3217_v43 }
  0xb1   : > { %v3226_v52 = vsub.f32 %v3183_v16, %v608_v48  ;;  %v3229_v53 = vsub.f32 %v3185_v17, %v609_v49  ;;  %v638_v54 = vsel %vm576_vm0, %v622_v50, 0.0  ;;  %v641_v55 = vsel %vm576_vm0, %v623_v51, 0.0 }
  0xb2   : > { %636 = vadd.xlane.f32.xlu1 %v635_v47  ;;  %639 = vadd.xlane.f32.xlu0 %v638_v54 }
  0xb3   : > { %v624_v56 = vmul.f32 %v3226_v52, %v3226_v52  ;;  %v625_v57 = vmul.f32 %v3229_v53, %v3229_v53 }
  0xb5   : > { %v644_v58 = vsel %vm576_vm0, %v624_v56, 0.0  ;;  %v647_v59 = vsel %vm576_vm0, %v625_v57, 0.0 }
  0xb6   : > { %642 = vadd.xlane.f32.xlu1 %v641_v55  ;;  %645 = vadd.xlane.f32.xlu0 %v644_v58 }
  0xba   : > { %648 = vadd.xlane.f32.xlu1 %v647_v59 }
 0x137   : > { %v628_v61 = vpop.xlane.xlu0 %627 }
 0x138   : > { %v650_v62 = vmul.f32 0.0625, %v628_v61 }
 0x13a   : > { %v658_v63 = vadd.f32 1e-05, %v650_v62 }
 0x13b   : > { %v631_v0 = vpop.xlane.xlu1 %630  ;;  %v634_v1 = vpop.xlane.xlu0 %633 }
 0x13c   : > { %2910 = vrsqrt.f32 %v658_v63  ;;  %v651_v6 = vmul.f32 0.0625, %v631_v0  ;;  %v652_v7 = vmul.f32 0.0625, %v634_v1 }
 0x13e   : > { %v659_v8 = vadd.f32 1e-05, %v651_v6  ;;  %v660_v9 = vadd.f32 1e-05, %v652_v7 }
 0x13f   : > { %v637_v10 = vpop.xlane.xlu1 %636  ;;  %v640_v13 = vpop.xlane.xlu0 %639 }
 0x140   : > { %2912 = vrsqrt.f32 %v659_v8  ;;  %v653_v14 = vmul.f32 0.0625, %v637_v10  ;;  %v654_v15 = vmul.f32 0.0625, %v640_v13 }
 0x141   : > { %2914 = vrsqrt.f32 %v660_v9  ;;  %v2571_v9 = vld [vmem:[%s3761_s6] ss:$0 sm:$0xff] }
 0x142   : > { %v661_v18 = vadd.f32 1e-05, %v653_v14  ;;  %v662_v19 = vadd.f32 1e-05, %v654_v15 }
 0x143   : > { %v643_v20 = vpop.xlane.xlu1 %642  ;;  %v646_v21 = vpop.xlane.xlu0 %645 }
 0x144   : > { %2916 = vrsqrt.f32 %v661_v18  ;;  %v655_v22 = vmul.f32 0.0625, %v643_v20  ;;  %v656_v23 = vmul.f32 0.0625, %v646_v21 }
 0x145   : > { %2918 = vrsqrt.f32 %v662_v19 }
 0x146   : > { %v2911_v26 = vpop.eup %2910  ;;  %v663_v27 = vadd.f32 1e-05, %v655_v22  ;;  %v664_v28 = vadd.f32 1e-05, %v656_v23 }
 0x147   : > { %v649_v29 = vpop.xlane.xlu1 %648  ;;  %v674_v30 = vmul.f32 %v2911_v26, %v3192_v24  ;;  %v2570_v24 = vld [vmem:[%s3759_s4] ss:$0 sm:$0xff] }
 0x148   : > { %2920 = vrsqrt.f32 %v663_v27  ;;  %v657_v31 = vmul.f32 0.0625, %v649_v29 }
 0x149   : > { %2922 = vrsqrt.f32 %v664_v28  ;;  %v689_v39 = vmul.f32 %v2569_v34, %v674_v30 }
 0x14a   : > { %v2913_v35 = vpop.eup %2912  ;;  %v665_v36 = vadd.f32 1e-05, %v657_v31 }
 0x14b   : > { %v2915_v37 = vpop.eup %2914  ;;  %v675_v38 = vmul.f32 %v2913_v35, %v3202_v32  ;;  %v704_v47 = vadd.f32 %v2570_v24, %v689_v39 }
 0x14c   : > { %v676_v40 = vmul.f32 %v2915_v37, %v3195_v25  ;;  %2924 = vrsqrt.f32 %v665_v36 }
 0x14d   : > { %v690_v41 = vmul.f32 %v2569_v34, %v675_v38 }
 0x14e   : > { %v2917_v44 = vpop.eup %2916  ;;  %v691_v49 = vmul.f32 %v2569_v34, %v676_v40 }
 0x14f   : > { %v2919_v45 = vpop.eup %2918  ;;  %v677_v46 = vmul.f32 %v2917_v44, %v3205_v33  ;;  %v705_v48 = vadd.f32 %v2570_v24, %v690_v41 }
 0x150   : > { %v678_v50 = vmul.f32 %v2919_v45, %v3214_v42  ;;  %v706_v56 = vadd.f32 %v2570_v24, %v691_v49  ;;  %v3314_v49 = vld [vmem:[%s3757_s2] sm:$0xff] }
 0x151   : > { %v714_v51 = vpack.c.bf16 %v705_v48, %v704_v47  ;;  %v692_v32 = vmul.f32 %v2569_v34, %v677_v46  ;;  %v820_v46 = vld [vmem:[%s3756_s1] sm:$0xff]  ;;  %v821_v48 = vld [vmem:[%s3756_s1 + $0x8] sm:$0xff] }
 0x152   : > { %v2921_v54 = vpop.eup %2920  ;;  %v693_v58 = vmul.f32 %v2569_v34, %v678_v50 }
 0x153   : > { %v2923_v55 = vpop.eup %2922  ;;  %v679_v25 = vmul.f32 %v2921_v54, %v3217_v43  ;;  %2719 = vmatprep.mubr.msk.bf16.mxu0 %vm576_vm0, %v714_v51  ;;  %v707_v57 = vadd.f32 %v2570_v24, %v692_v32  ;;  %v3319_v54 = vld [vmem:[%s3757_s2 + $0x8] sm:$0xff] }
 0x154   : > { %v680_v59 = vmul.f32 %v2923_v55, %v3226_v52  ;;  %v708_v42 = vadd.f32 %v2570_v24, %v693_v58  ;;  %v3046_v52 = vmov 0.0  }
 0x155   : > { %v715_v60 = vpack.c.bf16 %v707_v57, %v706_v56  ;;  %v694_v33 = vmul.f32 %v2569_v34, %v679_v25  ;;  %2727 = vmatprep.subr.bf16.mxu1 %v3046_v52  ;;  %2739 = vmatprep.subr.bf16.mxu0 %v3046_v52 }
 0x156   : > { %v2925_v61 = vpop.eup %2924  ;;  %v695_v0 = vmul.f32 %v2569_v34, %v680_v59  ;;  %2729 = vmatprep.mubr.msk.bf16.mxu1 %vm3047_vm1, %v3046_v52 }
 0x157   : > { %v681_v62 = vmul.f32 %v2925_v61, %v3229_v53  ;;  %2720 = vmatmul.mubr.msk.bf16.vlgmr.msra.gmra.mrb[0].mxu0 %vm576_vm0, %v715_v60  ;;  %v709_v63 = vadd.f32 %v2570_v24, %v694_v33  ;;  %v3328_v61 = vld [vmem:[%s3757_s2 + $0x10] sm:$0xff] }
 0x158   : > { %v710_v43 = vadd.f32 %v2570_v24, %v695_v0 }
 0x159   : > { %v716_v1 = vpack.c.bf16 %v709_v63, %v708_v42  ;;  %v696_v6 = vmul.f32 %v2569_v34, %v681_v62 }
 0x15b   : > { %2723 = vmatprep.mubr.msk.bf16.mxu0 %vm576_vm0, %v716_v1  ;;  %v711_v7 = vadd.f32 %v2570_v24, %v696_v6  ;;  %v3333_v6 = vld [vmem:[%s3757_s2 + $0x28] sm:$0xff] }
 0x15d   : > { %v717_v8 = vpack.c.bf16 %v711_v7, %v710_v43  ;;  %v3338_v43 = vld [vmem:[%s3757_s2 + $0x18] sm:$0xff] }
 0x15f   : > { %2724 = vmatmul.mubr.msk.bf16.gmra.mrb[4].mxu0 %vm576_vm0, %v717_v8 }
 0x160   : > { %2741 = vmatprep.mubr.msk.bf16.mxu0 %vm3047_vm1, %v3046_v52 }
 0x22a   : > { %v2721_v53 = vpop.f32.mrb[0].mxu0 }
 0x22b   : > { %v777_v10 = vpop.f32.mrb[1].mxu0  ;;  %v786_v14 = vadd.f32 %v2721_v53, %v2571_v9 }
 0x22c   : > { %v2722_v13 = vpop.f32.mrb[2].mxu0  ;;  %v778_v19 = vadd.f32 %v2571_v9, %v777_v10 }
 0x22d   : > { %v789_v15 = vadd.f32 %v2722_v13, %v2571_v9  ;;  %v780_v18 = vpop.f32.mrb[3].mxu0 }
 0x22e   : > { %v781_v20 = vadd.f32 %v2571_v9, %v780_v18 }
 0x22f   : > { %v3269_v21 = vpack.c.bf16 %v789_v15, %v786_v14 }
 0x230   : > { %v3271_v22 = vpack.c.bf16 %v781_v20, %v778_v19  ;;  %v3347_v19 = vld [vmem:[%s3757_s2 + $0x20] sm:$0xff] }
 0x231   : > { %874 = vrot.lane.b32.xlu1 %v3269_v21, %s3048_s24 }
 0x232   : > { %823 = vrot.lane.b32.xlu0 %v3271_v22, %s3048_s24  ;;  %v2725_v23 = vpop.f32.mrb[4].mxu0 }
 0x233   : > { %v793_v26 = vpop.f32.mrb[5].mxu0  ;;  %v802_v28 = vadd.f32 %v2725_v23, %v2571_v9 }
 0x234   : > { %v2726_v27 = vpop.f32.mrb[6].mxu0  ;;  %v794_v31 = vadd.f32 %v2571_v9, %v793_v26 }
 0x235   : > { %v805_v29 = vadd.f32 %v2726_v27, %v2571_v9  ;;  %v796_v30 = vpop.f32.mrb[7].mxu0 }
 0x236   : > { %v797_v34 = vadd.f32 %v2571_v9, %v796_v30 }
 0x237   : > { %v3275_v35 = vpack.c.bf16 %v805_v29, %v802_v28 }
 0x238   : > { %v3277_v36 = vpack.c.bf16 %v797_v34, %v794_v31  ;;  %v3355_v31 = vld [vmem:[%s3757_s2 + $0x30] sm:$0xff] }
 0x23a   : > { %924 = vrot.lane.b32.xlu1 %v3277_v36, %s3048_s24 }
 0x23e   : > { %974 = vrot.lane.b32.xlu1 %v3275_v35, %s3048_s24 }
 0x2a3   : > { %v875_v39 = vpop.permute.xlu1 %874 }
 0x2a4   : > { %v824_v37 = vpop.permute.xlu0 %823  ;;  %v880_v24 = vsel %vm825_vm2, %v875_v39, 0 }
 0x2a5   : > { %v830_v38 = vsel %vm825_vm2, %v824_v37, 0 }
 0x2a6   : > { %2728 = vmatpush3.bf16.xpose.msra.mxu1 %v830_v38 }
 0x2a7   : > { %2733 = vmatprep.subr.bf16.mxu1 %v3046_v52 }
 0x2ac   : > { %v925_v40 = vpop.permute.xlu1 %924 }
 0x2ad   : > { %v930_v41 = vsel %vm825_vm2, %v925_v40, 0  ;;  %2730 = vmatmul.mubr.msk.bf16.vlgmr.msra.gmra.mrb[0].mxu1 %vm825_vm2, %v3271_v22 }
 0x2ae   : > { %2734 = vmatpush3.bf16.xpose.msra.mxu1 %v880_v24  ;;  %2740 = vmatpush3.bf16.xpose.msra.mxu0 %v930_v41  ;;  %v3366_v24 = vld [vmem:[%s3757_s2 + $0x38] sm:$0xff] }
 0x2af   : > { %2735 = vmatprep.mubr.msk.bf16.mxu1 %vm3047_vm1, %v3046_v52  ;;  %2745 = vmatprep.subr.bf16.mxu1 %v3046_v52 }
 0x2b0   : > { %2751 = vmatprep.subr.bf16.mxu0 %v3046_v52  ;;  %v975_v44 = vpop.permute.xlu1 %974 }
 0x2b1   : > { %v980_v45 = vsel %vm825_vm2, %v975_v44, 0 }
 0x2b5   : > { %2736 = vmatmul.mubr.msk.bf16.vlgmr.msra.gmra.mrb[4].mxu1 %vm825_vm2, %v3269_v21  ;;  %2742 = vmatmul.mubr.msk.bf16.vlgmr.msra.gmra.mrb[8].mxu0 %vm825_vm2, %v3277_v36 }
 0x2b6   : > { %2746 = vmatpush3.bf16.xpose.msra.mxu1 %v980_v45  ;;  %2747 = vmatprep.mubr.msk.bf16.mxu1 %vm3047_vm1, %v3046_v52 }
 0x2b7   : > { %2757 = vmatprep.subr.bf16.mxu1 %v3046_v52  ;;  %2753 = vmatprep.mubr.msk.bf16.mxu0 %vm3047_vm1, %v3046_v52 }
 0x2bd   : > { %2748 = vmatmul.mubr.msk.bf16.vlgmr.msra.gmra.mrb[8].mxu1 %vm825_vm2, %v3275_v35 }
 0x2be   : > { %2759 = vmatprep.mubr.msk.bf16.mxu1 %vm3047_vm1, %v3046_v52 }
 0x380   : > { %v866_v47 = vpop.f32.mrb[0].mxu1 }
 0x381   : > { %v867_v50 = vadd.f32 %v866_v47, %v820_v46  ;;  %v2731_v51 = vpop.f32.mrb[1].mxu1 }
 0x382   : > { %v869_v32 = vpop.f32.mrb[2].mxu1 }
 0x383   : > { %v870_v55 = vadd.f32 %v869_v32, %v821_v48  ;;  %v2732_v25 = vpop.f32.mrb[3].mxu1  ;;  %v1023_v56 = vadd.f32 %v867_v50, %v3314_v49 }
 0x385   : > { %v1031_v57 = vsel %vm576_vm0, %v1023_v56, -inf  ;;  %v1024_v58 = vadd.f32 %v870_v55, %v3319_v54 }
 0x386   : > { %1032 = vmax.xlane.f32.xlu0 %v1031_v57 }
 0x387   : > { %v1034_v59 = vsel %vm576_vm0, %v1024_v58, -inf }
 0x388   : > { %v966_v60 = vpop.f32.mrb[8].mxu0  ;;  %1035 = vmax.xlane.f32.xlu1 %v1034_v59  ;;  %v916_v33 = vpop.f32.mrb[4].mxu1 }
 0x389   : > { %v917_v62 = vadd.f32 %v916_v33, %v820_v46  ;;  %v2737_v42 = vpop.f32.mrb[5].mxu1  ;;  %v2743_v63 = vpop.f32.mrb[9].mxu0  ;;  %v967_v13 = vadd.f32 %v966_v60, %v820_v46 }
 0x38a   : > { %v919_v0 = vpop.f32.mrb[6].mxu1  ;;  %v969_v1 = vpop.f32.mrb[10].mxu0 }
 0x38b   : > { %v920_v7 = vadd.f32 %v919_v0, %v821_v48  ;;  %v970_v8 = vadd.f32 %v969_v1, %v821_v48  ;;  %v2738_v53 = vpop.f32.mrb[7].mxu1  ;;  %v2744_v9 = vpop.f32.mrb[11].mxu0  ;;  %v1025_v10 = vadd.f32 %v917_v62, %v3328_v61  ;;  %v1027_v29 = vadd.f32 %v967_v13, %v3347_v19 }
 0x38d   : > { %v1037_v14 = vsel %vm576_vm0, %v1025_v10, -inf  ;;  %v1028_v15 = vadd.f32 %v970_v8, %v3333_v6  ;;  %v1026_v18 = vadd.f32 %v920_v7, %v3338_v43  ;;  %v1043_v38 = vsel %vm576_vm0, %v1027_v29, -inf }
 0x38e   : > { %1038 = vmax.xlane.f32.xlu0 %v1037_v14 }
 0x38f   : > { %v1046_v20 = vsel %vm576_vm0, %v1028_v15, -inf  ;;  %v1040_v28 = vsel %vm576_vm0, %v1026_v18, -inf }
 0x390   : > { %1047 = vmax.xlane.f32.xlu1 %v1046_v20  ;;  %v1016_v23 = vpop.f32.mrb[8].mxu1 }
 0x391   : > { %v1017_v26 = vadd.f32 %v1016_v23, %v820_v46  ;;  %v2749_v27 = vpop.f32.mrb[9].mxu1 }
 0x392   : > { %1041 = vmax.xlane.f32.xlu0 %v1040_v28  ;;  %v1019_v30 = vpop.f32.mrb[10].mxu1 }
 0x393   : > { %v1020_v34 = vadd.f32 %v1019_v30, %v821_v48  ;;  %v2750_v37 = vpop.f32.mrb[11].mxu1  ;;  %v1029_v39 = vadd.f32 %v1017_v26, %v3355_v31 }
 0x395   : > { %v1049_v40 = vsel %vm576_vm0, %v1029_v39, -inf  ;;  %v3369_v41 = vadd.f32 %v1020_v34, %v3366_v24 }
 0x396   : > { %1044 = vmax.xlane.f32.xlu0 %v1043_v38 }
 0x397   : > { %v1052_v44 = vsel %vm576_vm0, %v3369_v41, -inf }
 0x39a   : > { %1050 = vmax.xlane.f32.xlu0 %v1049_v40 }
 0x3a1   : > { %1170 = vrot.lane.b32.xlu1 %v3269_v21, %s3049_s23 }
 0x3a5   : > { %1217 = vrot.lane.b32.xlu1 %v3277_v36, %s3049_s23 }
 0x3b0   : > { %1123 = vrot.lane.b32.xlu0 %v3271_v22, %s3049_s23 }
 0x3c9   : > { %1053 = vmax.xlane.f32.xlu1 %v1052_v44 }
 0x3da   : > { %1264 = vrot.lane.b32.xlu1 %v3275_v35, %s3049_s23 }
 0x413   : > { %v1033_v45 = vpop.xlane.xlu0 %1032 }
 0x414   : > { %v1055_v46 = vsub.f32 %v1023_v56, %v1033_v45 }
 0x415   : > { %v1036_v47 = vpop.xlane.xlu1 %1035 }
 0x416   : > { %v1063_v48 = vmul.f32 1.442695, %v1055_v46  ;;  %v1056_v50 = vsub.f32 %v1024_v58, %v1036_v47 }
 0x418   : > { %2926 = vpow2.f32 %v1063_v48  ;;  %v1065_v51 = vmul.f32 1.442695, %v1056_v50 }
 0x41a   : > { %2928 = vpow2.f32 %v1065_v51 }
 0x41b   : > { %v1039_v32 = vpop.xlane.xlu0 %1038 }
 0x41c   : > { %v1057_v55 = vsub.f32 %v1025_v10, %v1039_v32 }
 0x41d   : > { %v1048_v25 = vpop.xlane.xlu1 %1047 }
 0x41e   : > { %v1067_v57 = vmul.f32 1.442695, %v1057_v55  ;;  %v1060_v59 = vsub.f32 %v1028_v15, %v1048_v25 }
 0x41f   : > { %v1042_v60 = vpop.xlane.xlu0 %1041 }
 0x420   : > { %2930 = vpow2.f32 %v1067_v57  ;;  %v1058_v33 = vsub.f32 %v1026_v18, %v1042_v60  ;;  %v1073_v63 = vmul.f32 1.442695, %v1060_v59 }
 0x421   : > { %v1171_v62 = vpop.permute.xlu1 %1170 }
 0x422   : > { %v3374_v42 = vpop.eup %2926  ;;  %v1069_v0 = vmul.f32 1.442695, %v1058_v33  ;;  %2758 = vmatpush3.bf16.msra.mxu1 %v1171_v62 }
 0x423   : > { %v1045_v56 = vpop.xlane.xlu0 %1044  ;;  %v1079_v58 = vsel %vm576_vm0, %v3374_v42, 0.0  ;;  %2769 = vmatprep.subr.bf16.mxu1 %v3046_v52 }
 0x424   : > { %v2929_v1 = vpop.eup %2928  ;;  %2932 = vpow2.f32 %v1069_v0  ;;  %v1059_v7 = vsub.f32 %v1027_v29, %v1045_v56  ;;  %1080 = vadd.xlane.f32.xlu0 %v1079_v58 }
 0x425   : > { %v1082_v8 = vsel %vm576_vm0, %v2929_v1, 0.0  ;;  %2934 = vpow2.f32 %v1073_v63  ;;  %v1218_v37 = vpop.permute.xlu1 %1217 }
 0x426   : > { %v1071_v53 = vmul.f32 1.442695, %v1059_v7  ;;  %1083 = vadd.xlane.f32.xlu1 %v1082_v8 }
 0x427   : > { %v1051_v9 = vpop.xlane.xlu0 %1050 }
 0x428   : > { %2936 = vpow2.f32 %v1071_v53  ;;  %v1061_v10 = vsub.f32 %v1029_v39, %v1051_v9 }
 0x42a   : > { %v2931_v13 = vpop.eup %2930  ;;  %v1075_v14 = vmul.f32 1.442695, %v1061_v10 }
 0x42b   : > { %v1124_v15 = vpop.permute.xlu0 %1123  ;;  %v1085_v18 = vsel %vm576_vm0, %v2931_v13, 0.0 }
 0x42c   : > { %2938 = vpow2.f32 %v1075_v14  ;;  %1086 = vadd.xlane.f32.xlu0 %v1085_v18  ;;  %2752 = vmatpush3.bf16.msra.mxu0 %v1124_v15 }
 0x42d   : > { %2763 = vmatprep.subr.bf16.mxu0 %v3046_v52 }
 0x42e   : > { %v2933_v20 = vpop.eup %2932 }
 0x42f   : > { %v1088_v23 = vsel %vm576_vm0, %v2933_v20, 0.0  ;;  %v2935_v26 = vpop.eup %2934 }
 0x430   : > { %1089 = vadd.xlane.f32.xlu1 %v1088_v23  ;;  %v1094_v29 = vsel %vm576_vm0, %v2935_v26, 0.0 }
 0x432   : > { %v2937_v27 = vpop.eup %2936 }
 0x433   : > { %v1091_v28 = vsel %vm576_vm0, %v2937_v27, 0.0 }
 0x434   : > { %1092 = vadd.xlane.f32.xlu0 %v1091_v28  ;;  %1095 = vadd.xlane.f32.xlu1 %v1094_v29 }
 0x436   : > { %v3385_v30 = vpop.eup %2938 }
 0x437   : > { %v1097_v34 = vsel %vm576_vm0, %v3385_v30, 0.0 }
 0x438   : > { %1098 = vadd.xlane.f32.xlu0 %v1097_v34 }
 0x445   : > { %1372 = vrot.lane.b32.xlu1 %v3269_v21, %s3050_s26 }
 0x44e   : > { %1321 = vrot.lane.b32.xlu0 %v3271_v22, %s3050_s26 }
 0x452   : > { %1319 = vrot.lane.b32.xlu0 %v3271_v22, %s3051_s27 }
 0x456   : > { %1370 = vrot.lane.b32.xlu0 %v3269_v21, %s3051_s27  ;;  %v1054_v38 = vpop.xlane.xlu1 %1053 }
 0x457   : > { %v1062_v39 = vsub.f32 %v3369_v41, %v1054_v38 }
 0x459   : > { %v1077_v40 = vmul.f32 1.442695, %v1062_v39 }
 0x45a   : > { %1421 = vrot.lane.b32.xlu0 %v3277_v36, %s3051_s27  ;;  %v1265_v46 = vpop.permute.xlu1 %1264 }
 0x45b   : > { %2940 = vpow2.f32 %v1077_v40 }
 0x465   : > { %v3395_v44 = vpop.eup %2940 }
 0x466   : > { %v1100_v45 = vsel %vm576_vm0, %v3395_v44, 0.0 }
 0x469   : > { %1101 = vadd.xlane.f32.xlu1 %v1100_v45 }
 0x47a   : > { %1423 = vrot.lane.b32.xlu1 %v3277_v36, %s3050_s26 }
 0x47e   : > { %1474 = vrot.lane.b32.xlu1 %v3275_v35, %s3050_s26 }
 0x482   : > { %1472 = vrot.lane.b32.xlu1 %v3275_v35, %s3051_s27 }
 0x4b1   : > { %v1081_v47 = vpop.xlane.xlu0 %1080 }
 0x4b2   : > { %2942 = vrcp.f32 %v1081_v47 }
 0x4b3   : > { %v1084_v41 = vpop.xlane.xlu1 %1083 }
 0x4b4   : > { %2944 = vrcp.f32 %v1084_v41 }
 0x4b9   : > { %v1087_v48 = vpop.xlane.xlu0 %1086 }
 0x4ba   : > { %2946 = vrcp.f32 %v1087_v48 }
 0x4bc   : > { %v2943_v50 = vpop.eup %2942 }
 0x4bd   : > { %v1090_v51 = vpop.xlane.xlu1 %1089  ;;  %v1111_v55 = vmul.f32 %v2943_v50, %v3374_v42 }
 0x4be   : > { %v2945_v32 = vpop.eup %2944  ;;  %2948 = vrcp.f32 %v1090_v51 }
 0x4bf   : > { %v1112_v25 = vmul.f32 %v2945_v32, %v2929_v1 }
 0x4c1   : > { %v1093_v57 = vpop.xlane.xlu0 %1092  ;;  %v1096_v59 = vpop.xlane.xlu1 %1095  ;;  %v1119_v60 = vpack.c.bf16 %v1112_v25, %v1111_v55 }
 0x4c2   : > { %2950 = vrcp.f32 %v1093_v57 }
 0x4c3   : > { %2952 = vrcp.f32 %v1096_v59  ;;  %2754 = vmatmul.mubr.msk.bf16.vlgmr.msra.gmra.mrb[12].mxu0 %vm576_vm0, %v1119_v60 }
 0x4c4   : > { %2764 = vmatpush3.bf16.msra.mxu0 %v1218_v37  ;;  %2765 = vmatprep.mubr.msk.bf16.mxu0 %vm3047_vm1, %v3046_v52  ;;  %v2947_v33 = vpop.eup %2946 }
 0x4c5   : > { %2775 = vmatprep.subr.bf16.mxu0 %v3046_v52  ;;  %v1113_v63 = vmul.f32 %v2947_v33, %v2931_v13  ;;  %v1099_v56 = vpop.xlane.xlu0 %1098  ;;  %v1373_v14 = vpop.permute.xlu1 %1372 }
 0x4c6   : > { %2954 = vrcp.f32 %v1099_v56  ;;  %v1378_v38 = vsel %vm825_vm2, %v1373_v14, 0 }
 0x4c8   : > { %v2949_v62 = vpop.eup %2948 }
 0x4c9   : > { %v1114_v0 = vmul.f32 %v2949_v62, %v2933_v20  ;;  %v1322_v53 = vpop.permute.xlu0 %1321  ;;  %v2585_v62 = vld [vmem:[%s3756_s1 + $0x10] sm:$0xff] }
 0x4ca   : > { %v1327_v10 = vsel %vm825_vm2, %v1322_v53, 0 }
 0x4cb   : > { %v1120_v42 = vpack.c.bf16 %v1114_v0, %v1113_v63  ;;  %v2586_v0 = vld [vmem:[%s3756_s1 + $0x18] sm:$0xff] }
 0x4cc   : > { %v2951_v58 = vpop.eup %2950 }
 0x4cd   : > { %v2953_v1 = vpop.eup %2952  ;;  %v1115_v7 = vmul.f32 %v2951_v58, %v2937_v27  ;;  %2760 = vmatmul.mubr.msk.bf16.vlgmr.msra.gmra.mrb[12].mxu1 %vm576_vm0, %v1120_v42  ;;  %v1320_v13 = vpop.permute.xlu0 %1319 }
 0x4ce   : > { %v1116_v8 = vmul.f32 %v2953_v1, %v2935_v26  ;;  %2770 = vmatpush3.bf16.msra.mxu1 %v1265_v46  ;;  %2771 = vmatprep.mubr.msk.bf16.mxu1 %vm3047_vm1, %v3046_v52 }
 0x4cf   : > { %2781 = vmatprep.subr.bf16.mxu1 %v3046_v52 }
 0x4d0   : > { %v1121_v9 = vpack.c.bf16 %v1116_v8, %v1115_v7  ;;  %v2955_v26 = vpop.eup %2954 }
 0x4d1   : > { %v1371_v23 = vpop.permute.xlu0 %1370  ;;  %v1117_v28 = vmul.f32 %v2955_v26, %v3385_v30 }
 0x4d2   : > { %2766 = vmatmul.mubr.msk.bf16.vlgmr.msra.gmra.mrb[16].mxu0 %vm576_vm0, %v1121_v9 }
 0x4d3   : > { %2776 = vmatpush3.bf16.xpose.msra.mxu0 %v1327_v10  ;;  %2777 = vmatprep.mubr.msk.bf16.mxu0 %vm3047_vm1, %v3046_v52 }
 0x4d4   : > { %2787 = vmatprep.subr.bf16.mxu0 %v3046_v52 }
 0x4d5   : > { %v1422_v29 = vpop.permute.xlu0 %1421 }
 0x4da   : > { %2778 = vmatmul.mubr.msk.bf16.vlgmr.msra.gmra.mrb[20].mxu0 %vm825_vm2, %v1320_v13 }
 0x4db   : > { %2789 = vmatprep.mubr.msk.bf16.mxu0 %vm3047_vm1, %v3046_v52 }
 0x4f6   : > { %v1102_v15 = vpop.xlane.xlu1 %1101 }
 0x4f7   : > { %2956 = vrcp.f32 %v1102_v15 }
 0x4fa   : > { %v1424_v18 = vpop.permute.xlu1 %1423 }
 0x4fb   : > { %v1429_v20 = vsel %vm825_vm2, %v1424_v18, 0 }
 0x4fc   : > { %2788 = vmatpush3.bf16.xpose.msra.mxu0 %v1429_v20 }
 0x4fd   : > { %2799 = vmatprep.subr.bf16.mxu0 %v3046_v52 }
 0x4fe   : > { %v1475_v30 = vpop.permute.xlu1 %1474 }
 0x4ff   : > { %v1480_v39 = vsel %vm825_vm2, %v1475_v30, 0 }
 0x501   : > { %v2957_v27 = vpop.eup %2956 }
 0x502   : > { %v1118_v34 = vmul.f32 %v2957_v27, %v3395_v44  ;;  %v1473_v40 = vpop.permute.xlu1 %1472 }
 0x503   : > { %2790 = vmatmul.mubr.msk.bf16.vlgmr.msra.gmra.mrb[24].mxu0 %vm825_vm2, %v1422_v29 }
 0x504   : > { %v1122_v37 = vpack.c.bf16 %v1118_v34, %v1117_v28  ;;  %2801 = vmatprep.mubr.msk.bf16.mxu0 %vm3047_vm1, %v3046_v52 }
 0x506   : > { %2772 = vmatmul.mubr.msk.bf16.vlgmr.msra.gmra.mrb[16].mxu1 %vm576_vm0, %v1122_v37 }
 0x507   : > { %2782 = vmatpush3.bf16.xpose.msra.mxu1 %v1378_v38  ;;  %2783 = vmatprep.mubr.msk.bf16.mxu1 %vm3047_vm1, %v3046_v52 }
 0x508   : > { %2793 = vmatprep.subr.bf16.mxu1 %v3046_v52 }
 0x50e   : > { %2784 = vmatmul.mubr.msk.bf16.vlgmr.msra.gmra.mrb[20].mxu1 %vm825_vm2, %v1371_v23 }
 0x50f   : > { %2794 = vmatpush3.bf16.xpose.msra.mxu1 %v1480_v39  ;;  %2795 = vmatprep.mubr.msk.bf16.mxu1 %vm3047_vm1, %v3046_v52 }
 0x510   : > { %2805 = vmatprep.subr.bf16.mxu1 %v3046_v52 }
 0x516   : > { %2796 = vmatmul.mubr.msk.bf16.vlgmr.msra.gmra.mrb[24].mxu1 %vm825_vm2, %v1473_v40 }
 0x517   : > { %2807 = vmatprep.mubr.msk.bf16.mxu1 %vm3047_vm1, %v3046_v52 }
 0x596   : > { %v3439_v44 = vpop.f32.mrb[12].mxu0 }
 0x597   : > { %v2755_v45 = vpop.f32.mrb[13].mxu0 }
 0x598   : > { %v3441_v46 = vpop.f32.mrb[14].mxu0 }
 0x599   : > { %v1312_v47 = vpack.c.bf16 %v3441_v46, %v3439_v44  ;;  %v2756_v41 = vpop.f32.mrb[15].mxu0  ;;  %v2604_v44 = vld [vmem:[%s3763_s8] ss:$0 sm:$0xff] }
 0x5a0   : > { %v3445_v48 = vpop.f32.mrb[12].mxu1 }
 0x5a1   : > { %v2761_v50 = vpop.f32.mrb[13].mxu1 }
 0x5a2   : > { %v3447_v51 = vpop.f32.mrb[14].mxu1 }
 0x5a3   : > { %v1313_v32 = vpack.c.bf16 %v3447_v51, %v3445_v48  ;;  %v2762_v55 = vpop.f32.mrb[15].mxu1 }
 0x5a5   : > { %v3451_v25 = vpop.f32.mrb[16].mxu0 }
 0x5a6   : > { %v2767_v57 = vpop.f32.mrb[17].mxu0 }
 0x5a7   : > { %v3453_v59 = vpop.f32.mrb[18].mxu0 }
 0x5a8   : > { %v1314_v60 = vpack.c.bf16 %v3453_v59, %v3451_v25  ;;  %v2768_v33 = vpop.f32.mrb[19].mxu0 }
 0x5ad   : > { %v1363_v63 = vpop.f32.mrb[20].mxu0 }
 0x5ae   : > { %v1364_v56 = vadd.f32 %v2585_v62, %v1363_v63  ;;  %v2779_v42 = vpop.f32.mrb[21].mxu0 }
 0x5af   : > { %v1366_v58 = vpop.f32.mrb[22].mxu0 }
 0x5b0   : > { %v1367_v1 = vadd.f32 %v2586_v0, %v1366_v58  ;;  %v2780_v7 = vpop.f32.mrb[23].mxu0  ;;  %v1523_v8 = vadd.f32 %v1364_v56, %v3314_v49 }
 0x5b2   : > { %v1531_v53 = vsel %vm576_vm0, %v1523_v8, -inf  ;;  %v1524_v9 = vadd.f32 %v1367_v1, %v3319_v54 }
 0x5b3   : > { %1532 = vmax.xlane.f32.xlu0 %v1531_v53 }
 0x5b4   : > { %v1534_v10 = vsel %vm576_vm0, %v1524_v9, -inf }
 0x5b5   : > { %1535 = vmax.xlane.f32.xlu1 %v1534_v10 }
 0x5d6   : > { %v1465_v13 = vpop.f32.mrb[24].mxu0 }
 0x5d7   : > { %v2791_v14 = vpop.f32.mrb[25].mxu0  ;;  %v1466_v41 = vadd.f32 %v2585_v62, %v1465_v13 }
 0x5d8   : > { %v1468_v15 = vpop.f32.mrb[26].mxu0 }
 0x5d9   : > { %v1469_v18 = vadd.f32 %v2586_v0, %v1468_v15  ;;  %v3467_v20 = vpop.f32.mrb[16].mxu1  ;;  %v2792_v23 = vpop.f32.mrb[27].mxu0  ;;  %v1527_v56 = vadd.f32 %v1466_v41, %v3347_v19 }
 0x5da   : > { %v2773_v26 = vpop.f32.mrb[17].mxu1 }
 0x5db   : > { %v3469_v27 = vpop.f32.mrb[18].mxu1  ;;  %v1528_v49 = vadd.f32 %v1469_v18, %v3333_v6  ;;  %v1543_v7 = vsel %vm576_vm0, %v1527_v56, -inf }
 0x5dc   : > { %v1315_v28 = vpack.c.bf16 %v3469_v27, %v3467_v20  ;;  %v2774_v54 = vpop.f32.mrb[19].mxu1 }
 0x5dd   : > { %v1546_v29 = vsel %vm576_vm0, %v1528_v49, -inf }
 0x5de   : > { %1547 = vmax.xlane.f32.xlu1 %v1546_v29 }
 0x5e1   : > { %v1414_v34 = vpop.f32.mrb[20].mxu1 }
 0x5e2   : > { %v1415_v37 = vadd.f32 %v2585_v62, %v1414_v34  ;;  %v2785_v38 = vpop.f32.mrb[21].mxu1 }
 0x5e3   : > { %v1417_v30 = vpop.f32.mrb[22].mxu1 }
 0x5e4   : > { %v1418_v39 = vadd.f32 %v2586_v0, %v1417_v30  ;;  %v2786_v40 = vpop.f32.mrb[23].mxu1  ;;  %v1525_v45 = vadd.f32 %v1415_v37, %v3328_v61 }
 0x5e6   : > { %v1537_v50 = vsel %vm576_vm0, %v1525_v45, -inf  ;;  %v1526_v6 = vadd.f32 %v1418_v39, %v3338_v43 }
 0x5e7   : > { %1538 = vmax.xlane.f32.xlu0 %v1537_v50 }
 0x5e8   : > { %v1540_v63 = vsel %vm576_vm0, %v1526_v6, -inf }
 0x5e9   : > { %v1516_v55 = vpop.f32.mrb[24].mxu1 }
 0x5ea   : > { %v1517_v57 = vadd.f32 %v2585_v62, %v1516_v55  ;;  %v2797_v33 = vpop.f32.mrb[25].mxu1 }
 0x5eb   : > { %1541 = vmax.xlane.f32.xlu0 %v1540_v63  ;;  %v1519_v42 = vpop.f32.mrb[26].mxu1 }
 0x5ec   : > { %v1520_v58 = vadd.f32 %v2586_v0, %v1519_v42  ;;  %v2798_v1 = vpop.f32.mrb[27].mxu1  ;;  %v1529_v53 = vadd.f32 %v1517_v57, %v3355_v31 }
 0x5ee   : > { %v1530_v61 = vadd.f32 %v1520_v58, %v3366_v24  ;;  %v1549_v62 = vsel %vm576_vm0, %v1529_v53, -inf }
 0x5ef   : > { %1544 = vmax.xlane.f32.xlu0 %v1543_v7 }
 0x5f0   : > { %v1552_v43 = vsel %vm576_vm0, %v1530_v61, -inf }
 0x5f1   : > { %1553 = vmax.xlane.f32.xlu1 %v1552_v43 }
 0x5f3   : > { %1550 = vmax.xlane.f32.xlu0 %v1549_v62 }
 0x640   : > { %v1533_v10 = vpop.xlane.xlu0 %1532 }
 0x641   : > { %v1555_v13 = vsub.f32 %v1523_v8, %v1533_v10 }
 0x642   : > { %v1536_v19 = vpop.xlane.xlu1 %1535 }
 0x643   : > { %v1563_v14 = vmul.f32 1.442695, %v1555_v13  ;;  %v1556_v15 = vsub.f32 %v1524_v9, %v1536_v19 }
 0x645   : > { %2958 = vpow2.f32 %v1563_v14  ;;  %v1565_v0 = vmul.f32 1.442695, %v1556_v15 }
 0x647   : > { %2960 = vpow2.f32 %v1565_v0 }
 0x64f   : > { %v3485_v18 = vpop.eup %2958 }
 0x650   : > { %v1579_v31 = vsel %vm576_vm0, %v3485_v18, 0.0 }
 0x651   : > { %v3489_v24 = vpop.eup %2960  ;;  %1580 = vadd.xlane.f32.xlu0 %v1579_v31 }
 0x652   : > { %v1582_v23 = vsel %vm576_vm0, %v3489_v24, 0.0 }
 0x653   : > { %1583 = vadd.xlane.f32.xlu1 %v1582_v23 }
 0x66b   : > { %v1548_v26 = vpop.xlane.xlu1 %1547 }
 0x66c   : > { %v1560_v29 = vsub.f32 %v1528_v49, %v1548_v26 }
 0x66e   : > { %v1573_v38 = vmul.f32 1.442695, %v1560_v29 }
 0x674   : > { %v1539_v8 = vpop.xlane.xlu0 %1538 }
 0x675   : > { %v1557_v54 = vsub.f32 %v1525_v45, %v1539_v8 }
 0x677   : > { %v1567_v9 = vmul.f32 1.442695, %v1557_v54 }
 0x678   : > { %v1542_v34 = vpop.xlane.xlu0 %1541 }
 0x679   : > { %2962 = vpow2.f32 %v1567_v9  ;;  %v1558_v37 = vsub.f32 %v1526_v6, %v1542_v34 }
 0x67b   : > { %v1569_v30 = vmul.f32 1.442695, %v1558_v37 }
 0x67c   : > { %v1545_v39 = vpop.xlane.xlu0 %1544 }
 0x67d   : > { %2964 = vpow2.f32 %v1569_v30  ;;  %v1559_v40 = vsub.f32 %v1527_v56, %v1545_v39 }
 0x67e   : > { %2966 = vpow2.f32 %v1573_v38 }
 0x67f   : > { %v1571_v41 = vmul.f32 1.442695, %v1559_v40 }
 0x680   : > { %v1551_v50 = vpop.xlane.xlu0 %1550 }
 0x681   : > { %2968 = vpow2.f32 %v1571_v41  ;;  %v1561_v55 = vsub.f32 %v1529_v53, %v1551_v50  ;;  %v1554_v53 = vpop.xlane.xlu1 %1553 }
 0x682   : > { %v1562_v43 = vsub.f32 %v1530_v61, %v1554_v53 }
 0x683   : > { %v2963_v57 = vpop.eup %2962  ;;  %v1575_v33 = vmul.f32 1.442695, %v1561_v55 }
 0x684   : > { %v1585_v63 = vsel %vm576_vm0, %v2963_v57, 0.0  ;;  %v1577_v62 = vmul.f32 1.442695, %v1562_v43 }
 0x685   : > { %2970 = vpow2.f32 %v1575_v33  ;;  %1586 = vadd.xlane.f32.xlu0 %v1585_v63 }
 0x686   : > { %2972 = vpow2.f32 %v1577_v62 }
 0x687   : > { %v2965_v49 = vpop.eup %2964 }
 0x688   : > { %v1588_v45 = vsel %vm576_vm0, %v2965_v49, 0.0  ;;  %v2967_v6 = vpop.eup %2966 }
 0x689   : > { %1589 = vadd.xlane.f32.xlu1 %v1588_v45  ;;  %v1594_v56 = vsel %vm576_vm0, %v2967_v6, 0.0 }
 0x68b   : > { %v2969_v42 = vpop.eup %2968 }
 0x68c   : > { %v1591_v58 = vsel %vm576_vm0, %v2969_v42, 0.0 }
 0x68d   : > { %1592 = vadd.xlane.f32.xlu0 %v1591_v58  ;;  %1595 = vadd.xlane.f32.xlu1 %v1594_v56 }
 0x68f   : > { %v3497_v1 = vpop.eup %2970 }
 0x690   : > { %v1597_v7 = vsel %vm576_vm0, %v3497_v1, 0.0  ;;  %v2973_v10 = vpop.eup %2972 }
 0x691   : > { %1598 = vadd.xlane.f32.xlu0 %v1597_v7  ;;  %v1600_v13 = vsel %vm576_vm0, %v2973_v10, 0.0 }
 0x69e   : > { %1670 = vrot.lane.b32.xlu1 %v3269_v21, %s3052_s17 }
 0x6a2   : > { %1717 = vrot.lane.b32.xlu1 %v3277_v36, %s3052_s17 }
 0x6a7   : > { %1623 = vrot.lane.b32.xlu0 %v3271_v22, %s3052_s17 }
 0x6c6   : > { %1601 = vadd.xlane.f32.xlu1 %v1600_v13 }
 0x6d7   : > { %1764 = vrot.lane.b32.xlu1 %v3275_v35, %s3052_s17 }
 0x6de   : > { %v1581_v19 = vpop.xlane.xlu0 %1580 }
 0x6e0   : > { %v1584_v14 = vpop.xlane.xlu1 %1583 }
 0x6e1   : > { %2974 = vrcp.f32 %v1584_v14 }
 0x6e2   : > { %2976 = vrcp.f32 %v1581_v19 }
 0x6eb   : > { %v2975_v61 = vpop.eup %2974 }
 0x6ec   : > { %v2977_v0 = vpop.eup %2976  ;;  %v1612_v35 = vmul.f32 %v2975_v61, %v3489_v24 }
 0x6ed   : > { %v1611_v54 = vmul.f32 %v2977_v0, %v3485_v18 }
 0x6ef   : > { %v1619_v37 = vpack.c.bf16 %v1612_v35, %v1611_v54 }
 0x712   : > { %v1587_v15 = vpop.xlane.xlu0 %1586 }
 0x713   : > { %2978 = vrcp.f32 %v1587_v15 }
 0x716   : > { %v1590_v21 = vpop.xlane.xlu1 %1589 }
 0x717   : > { %2980 = vrcp.f32 %v1590_v21 }
 0x71a   : > { %v1593_v36 = vpop.xlane.xlu0 %1592  ;;  %v1596_v22 = vpop.xlane.xlu1 %1595 }
 0x71b   : > { %2982 = vrcp.f32 %v1593_v36 }
 0x71c   : > { %2984 = vrcp.f32 %v1596_v22 }
 0x71d   : > { %v2979_v26 = vpop.eup %2978 }
 0x71e   : > { %v1599_v31 = vpop.xlane.xlu0 %1598  ;;  %v1671_v23 = vpop.permute.xlu1 %1670  ;;  %v1613_v29 = vmul.f32 %v2979_v26, %v2963_v57 }
 0x71f   : > { %2806 = vmatpush3.bf16.msra.mxu1 %v1671_v23  ;;  %2986 = vrcp.f32 %v1599_v31 }
 0x720   : > { %2817 = vmatprep.subr.bf16.mxu1 %v3046_v52 }
 0x721   : > { %v2981_v8 = vpop.eup %2980 }
 0x722   : > { %v1614_v9 = vmul.f32 %v2981_v8, %v2965_v49  ;;  %v1624_v34 = vpop.permute.xlu0 %1623  ;;  %v1718_v40 = vpop.permute.xlu1 %1717 }
 0x723   : > { %2800 = vmatpush3.bf16.msra.mxu0 %v1624_v34 }
 0x724   : > { %v1620_v38 = vpack.c.bf16 %v1614_v9, %v1613_v29  ;;  %2811 = vmatprep.subr.bf16.mxu0 %v3046_v52 }
 0x725   : > { %v2983_v30 = vpop.eup %2982 }
 0x726   : > { %v2985_v39 = vpop.eup %2984  ;;  %2802 = vmatmul.mubr.msk.bf16.vlgmr.msra.gmra.mrb[28].mxu0 %vm576_vm0, %v1619_v37  ;;  %2808 = vmatmul.mubr.msk.bf16.vlgmr.msra.gmra.mrb[28].mxu1 %vm576_vm0, %v1620_v38  ;;  %v1615_v18 = vmul.f32 %v2983_v30, %v2969_v42  ;;  %v1311_v42 = vld [vmem:[%s3762_s7] sm:$0xf] }
 0x727   : > { %2812 = vmatpush3.bf16.msra.mxu0 %v1718_v40  ;;  %2813 = vmatprep.mubr.msk.bf16.mxu0 %vm3047_vm1, %v3046_v52  ;;  %v1616_v24 = vmul.f32 %v2985_v39, %v2967_v6  ;;  %v1911_v58 = vsel %vm1829_vm3, %v1311_v42, 0 }
 0x728   : > { %2819 = vmatprep.mubr.msk.bf16.mxu1 %vm3047_vm1, %v3046_v52  ;;  %v2595_v52 = vld [vmem:[%s3762_s7 + $0x4] sm:$0xf] }
 0x729   : > { %v1621_v41 = vpack.c.bf16 %v1616_v24, %v1615_v18  ;;  %v2987_v57 = vpop.eup %2986  ;;  %2873 = vmatprep.subr.msk.bf16.mxu0 %vm1829_vm3, %v2595_v52  ;;  %v1831_v6 = vsel %vm1829_vm3, %v2595_v52, 0 }
 0x72a   : > { %v1617_v63 = vmul.f32 %v2987_v57, %v3497_v1 }
 0x72e   : > { %2814 = vmatmul.mubr.msk.bf16.vlgmr.msra.gmra.mrb[32].mxu0 %vm576_vm0, %v1621_v41 }
 0x72f   : > { %2824 = vmatpush3.bf16.msra.mxu0 %v1831_v6 }
 0x730   : > { %2874 = vmatprep.subr.msk.bf16.mxu0 %vm1829_vm3, %v1311_v42 }
 0x753   : > { %v1602_v50 = vpop.xlane.xlu1 %1601 }
 0x754   : > { %2988 = vrcp.f32 %v1602_v50 }
 0x757   : > { %v1765_v55 = vpop.permute.xlu1 %1764 }
 0x758   : > { %2818 = vmatpush3.bf16.msra.mxu1 %v1765_v55 }
 0x75e   : > { %v2989_v33 = vpop.eup %2988 }
 0x75f   : > { %v1618_v49 = vmul.f32 %v2989_v33, %v2973_v10 }
 0x761   : > { %v1622_v45 = vpack.c.bf16 %v1618_v49, %v1617_v63 }
 0x763   : > { %2820 = vmatmul.mubr.msk.bf16.vlgmr.msra.gmra.mrb[32].mxu1 %vm576_vm0, %v1622_v45 }
 0x7f9   : > { %v1663_v56 = vpop.f32.mrb[28].mxu0  ;;  %v1710_v1 = vpop.f32.mrb[28].mxu1 }
 0x7fa   : > { %v2803_v7 = vpop.f32.mrb[29].mxu0  ;;  %v2809_v53 = vpop.f32.mrb[29].mxu1 }
 0x7fb   : > { %v1666_v43 = vpop.f32.mrb[30].mxu0  ;;  %v1713_v62 = vpop.f32.mrb[30].mxu1 }
 0x7fc   : > { %v1813_v10 = vpack.c.bf16 %v1666_v43, %v1663_v56  ;;  %v1814_v13 = vpack.c.bf16 %v1713_v62, %v1710_v1  ;;  %v2804_v19 = vpop.f32.mrb[31].mxu0  ;;  %v2810_v14 = vpop.f32.mrb[31].mxu1 }
 0x7fe   : > { %2825 = vmatprep.mubr.msk.bf16.mxu0 %vm825_vm2, %v1813_v10 }
 0x7ff   : > { %2826 = vmatmul.mubr.msk.bf16.vlgmr.msra.gmra.mrb[36].mxu0 %vm825_vm2, %v1814_v13 }
 0x800   : > { %2834 = vmatpush3.bf16.msra.mxu0 %v1911_v58 }
 0x801   : > { %v1757_v15 = vpop.f32.mrb[32].mxu0 }
 0x802   : > { %v2815_v21 = vpop.f32.mrb[33].mxu0 }
 0x803   : > { %v1760_v36 = vpop.f32.mrb[34].mxu0 }
 0x804   : > { %v1815_v22 = vpack.c.bf16 %v1760_v36, %v1757_v15  ;;  %v2816_v61 = vpop.f32.mrb[35].mxu0 }
 0x806   : > { %2829 = vmatprep.mubr.msk.bf16.mxu0 %vm825_vm2, %v1815_v22 }
 0x836   : > { %v1804_v0 = vpop.f32.mrb[32].mxu1 }
 0x837   : > { %v2821_v31 = vpop.f32.mrb[33].mxu1 }
 0x838   : > { %v1807_v23 = vpop.f32.mrb[34].mxu1 }
 0x839   : > { %v1816_v26 = vpack.c.bf16 %v1807_v23, %v1804_v0  ;;  %v2822_v35 = vpop.f32.mrb[35].mxu1 }
 0x83b   : > { %2830 = vmatmul.mubr.msk.bf16.gmra.mrb[40].mxu0 %vm825_vm2, %v1816_v26 }
 0x83c   : > { %2835 = vmatprep.mubr.msk.bf16.mxu0 %vm825_vm2, %v1312_v47 }
 0x843   : > { %2836 = vmatmul.mubr.msk.bf16.vlgmr.msra.gmra.mrb[36].mxu0 %vm825_vm2, %v1313_v32 }
 0x844   : > { %2839 = vmatprep.mubr.msk.bf16.mxu0 %vm825_vm2, %v1314_v60 }
 0x84b   : > { %2840 = vmatmul.mubr.msk.bf16.gmra.mrb[40].mxu0 %vm825_vm2, %v1315_v28 }
 0x916   : > { %v2837_v8 = vpop.f32.mrb[36].mxu0 }
 0x917   : > { %v1947_v46 = vpop.f32.mrb[37].mxu0  ;;  %v1980_v47 = vadd.f32 %v2837_v8, %v3161_v3 }
 0x918   : > { %v1978_v48 = vadd.f32 %v3159_v2, %v1947_v46  ;;  %v2838_v51 = vpop.f32.mrb[38].mxu0 }
 0x919   : > { %v1950_v32 = vpop.f32.mrb[39].mxu0  ;;  %v3553_v60 = vadd.f32 %v2604_v44, %v1980_v47  ;;  %v1981_v20 = vadd.f32 %v2838_v51, %v3165_v5 }
 0x91a   : > { %v3550_v25 = vadd.f32 %v2604_v44, %v1978_v48  ;;  %v1979_v59 = vadd.f32 %v3163_v4, %v1950_v32 }
 0x91b   : > { %v3562_v29 = vadd.f32 %v2604_v44, %v1981_v20  ;;  %v2007_v5 = vsel %vm576_vm0, %v3553_v60, 0.0 }
 0x91c   : > { %v3556_v27 = vadd.f32 %v2604_v44, %v1979_v59  ;;  %v2001_v28 = vsel %vm576_vm0, %v3550_v25, 0.0 }
 0x91d   : > { %2002 = vadd.xlane.f32.xlu0 %v2001_v28  ;;  %v2010_v18 = vsel %vm576_vm0, %v3562_v29, 0.0  ;;  %v2907_v28 = vld [vmem:[%s3766_s11] sm:$0xff]  }
 0x91e   : > { %v2841_v54 = vpop.f32.mrb[40].mxu0  ;;  %v2004_v2 = vsel %vm576_vm0, %v3556_v27, 0.0  ;;  %2843 = vmatprep.subr.bf16.mxu1 %v2907_v28 }
 0x91f   : > { %2005 = vadd.xlane.f32.xlu1 %v2004_v2  ;;  %v1963_v3 = vpop.f32.mrb[41].mxu0  ;;  %v1984_v30 = vadd.f32 %v2841_v54, %v3183_v16  ;;  %2844 = vmatpush3.bf16.msra.mxu1 %v2907_v28 }
 0x920   : > { %v1982_v4 = vadd.f32 %v3175_v11, %v1963_v3  ;;  %v2842_v9 = vpop.f32.mrb[42].mxu0 }
 0x921   : > { %2008 = vadd.xlane.f32.xlu0 %v2007_v5  ;;  %v1966_v34 = vpop.f32.mrb[43].mxu0  ;;  %v1985_v37 = vadd.f32 %v2842_v9, %v3185_v17  ;;  %v3580_v41 = vadd.f32 %v2604_v44, %v1984_v30 }
 0x922   : > { %v1983_v38 = vadd.f32 %v3177_v12, %v1966_v34  ;;  %v3570_v39 = vadd.f32 %v2604_v44, %v1982_v4 }
 0x923   : > { %v3576_v11 = vadd.f32 %v2604_v44, %v1985_v37  ;;  %v2019_v17 = vsel %vm576_vm0, %v3580_v41, 0.0 }
 0x924   : > { %v3572_v40 = vadd.f32 %v2604_v44, %v1983_v38  ;;  %v2013_v12 = vsel %vm576_vm0, %v3570_v39, 0.0 }
 0x925   : > { %2011 = vadd.xlane.f32.xlu0 %v2010_v18  ;;  %v2022_v16 = vsel %vm576_vm0, %v3576_v11, 0.0 }
 0x926   : > { %v2016_v24 = vsel %vm576_vm0, %v3572_v40, 0.0 }
 0x927   : > { %2017 = vadd.xlane.f32.xlu1 %v2016_v24 }
 0x929   : > { %2014 = vadd.xlane.f32.xlu0 %v2013_v12 }
 0x92b   : > { %2023 = vadd.xlane.f32.xlu1 %v2022_v16 }
 0x92d   : > { %2020 = vadd.xlane.f32.xlu0 %v2019_v17 }
 0x9aa   : > { %v2003_v50 = vpop.xlane.xlu0 %2002 }
 0x9ab   : > { %v2025_v55 = vmul.f32 0.0625, %v2003_v50 }
 0x9ac   : > { %v2006_v57 = vpop.xlane.xlu1 %2005 }
 0x9ad   : > { %v3589_v33 = vsub.f32 %v3550_v25, %v2025_v55  ;;  %v2026_v63 = vmul.f32 0.0625, %v2006_v57  ;;  %v2605_v57 = vld [vmem:[%s3764_s9] ss:$0 sm:$0xff] }
 0x9ae   : > { %v2009_v49 = vpop.xlane.xlu0 %2008 }
 0x9af   : > { %v3592_v45 = vsub.f32 %v3556_v27, %v2026_v63  ;;  %v2027_v52 = vmul.f32 0.0625, %v2009_v49  ;;  %v2041_v6 = vmul.f32 %v3589_v33, %v3589_v33 }
 0x9b1   : > { %v3597_v42 = vsub.f32 %v3553_v60, %v2027_v52  ;;  %v2049_v58 = vsel %vm576_vm0, %v2041_v6, 0.0  ;;  %v2042_v56 = vmul.f32 %v3592_v45, %v3592_v45 }
 0x9b2   : > { %v2012_v1 = vpop.xlane.xlu0 %2011  ;;  %2050 = vadd.xlane.f32.xlu0 %v2049_v58 }
 0x9b3   : > { %v2028_v7 = vmul.f32 0.0625, %v2012_v1  ;;  %v2052_v53 = vsel %vm576_vm0, %v2042_v56, 0.0  ;;  %v2043_v43 = vmul.f32 %v3597_v42, %v3597_v42 }
 0x9b4   : > { %2053 = vadd.xlane.f32.xlu1 %v2052_v53  ;;  %v2018_v62 = vpop.xlane.xlu1 %2017 }
 0x9b5   : > { %v3606_v10 = vsub.f32 %v3562_v29, %v2028_v7  ;;  %v2030_v13 = vmul.f32 0.0625, %v2018_v62  ;;  %v2055_v19 = vsel %vm576_vm0, %v2043_v43, 0.0 }
 0x9b6   : > { %2056 = vadd.xlane.f32.xlu0 %v2055_v19  ;;  %v2015_v14 = vpop.xlane.xlu0 %2014 }
 0x9b7   : > { %v3610_v15 = vsub.f32 %v3572_v40, %v2030_v13  ;;  %v2029_v21 = vmul.f32 0.0625, %v2015_v14  ;;  %v2044_v36 = vmul.f32 %v3606_v10, %v3606_v10  ;;  %v2606_v14 = vld [vmem:[%s3765_s10] ss:$0 sm:$0xff] }
 0x9b8   : > { %v2024_v22 = vpop.xlane.xlu1 %2023 }
 0x9b9   : > { %v3615_v61 = vsub.f32 %v3570_v39, %v2029_v21  ;;  %v2032_v0 = vmul.f32 0.0625, %v2024_v22  ;;  %v2058_v31 = vsel %vm576_vm0, %v2044_v36, 0.0  ;;  %v2046_v23 = vmul.f32 %v3610_v15, %v3610_v15 }
 0x9ba   : > { %v2021_v26 = vpop.xlane.xlu0 %2020  ;;  %2059 = vadd.xlane.f32.xlu1 %v2058_v31 }
 0x9bb   : > { %v3621_v35 = vsub.f32 %v3576_v11, %v2032_v0  ;;  %v2031_v8 = vmul.f32 0.0625, %v2021_v26  ;;  %v2045_v44 = vmul.f32 %v3615_v61, %v3615_v61  ;;  %v2064_v48 = vsel %vm576_vm0, %v2046_v23, 0.0 }
 0x9bd   : > { %v3626_v46 = vsub.f32 %v3580_v41, %v2031_v8  ;;  %v2061_v47 = vsel %vm576_vm0, %v2045_v44, 0.0  ;;  %v2048_v51 = vmul.f32 %v3621_v35, %v3621_v35 }
 0x9be   : > { %2062 = vadd.xlane.f32.xlu0 %v2061_v47  ;;  %2065 = vadd.xlane.f32.xlu1 %v2064_v48 }
 0x9bf   : > { %v2047_v32 = vmul.f32 %v3626_v46, %v3626_v46  ;;  %v2070_v20 = vsel %vm576_vm0, %v2048_v51, 0.0 }
 0x9c1   : > { %v2067_v59 = vsel %vm576_vm0, %v2047_v32, 0.0 }
 0x9c2   : > { %2068 = vadd.xlane.f32.xlu0 %v2067_v59  ;;  %2071 = vadd.xlane.f32.xlu1 %v2070_v20 }
 0xa3f   : > { %v2051_v54 = vpop.xlane.xlu0 %2050 }
 0xa40   : > { %v2073_v2 = vmul.f32 0.0625, %v2051_v54 }
 0xa41   : > { %v2054_v3 = vpop.xlane.xlu1 %2053 }
 0xa42   : > { %v2081_v4 = vadd.f32 1e-05, %v2073_v2  ;;  %v2074_v9 = vmul.f32 0.0625, %v2054_v3 }
 0xa43   : > { %v2057_v5 = vpop.xlane.xlu0 %2056 }
 0xa44   : > { %2990 = vrsqrt.f32 %v2081_v4  ;;  %v2082_v34 = vadd.f32 1e-05, %v2074_v9  ;;  %v2075_v37 = vmul.f32 0.0625, %v2057_v5 }
 0xa46   : > { %2992 = vrsqrt.f32 %v2082_v34  ;;  %v2083_v38 = vadd.f32 1e-05, %v2075_v37 }
 0xa47   : > { %v2060_v30 = vpop.xlane.xlu1 %2059 }
 0xa48   : > { %2994 = vrsqrt.f32 %v2083_v38  ;;  %v2076_v18 = vmul.f32 0.0625, %v2060_v30  ;;  %v2607_v38 = vld [vmem:[%s3767_s12] ss:$0 sm:$0xff] }
 0xa4a   : > { %v2084_v24 = vadd.f32 1e-05, %v2076_v18 }
 0xa4b   : > { %v2063_v12 = vpop.xlane.xlu0 %2062  ;;  %v2066_v16 = vpop.xlane.xlu1 %2065 }
 0xa4c   : > { %2996 = vrsqrt.f32 %v2084_v24  ;;  %v2077_v17 = vmul.f32 0.0625, %v2063_v12  ;;  %v2078_v50 = vmul.f32 0.0625, %v2066_v16 }
 0xa4e   : > { %v2991_v55 = vpop.eup %2990  ;;  %v2085_v63 = vadd.f32 1e-05, %v2077_v17  ;;  %v2086_v49 = vadd.f32 1e-05, %v2078_v50 }
 0xa4f   : > { %v2097_v52 = vmul.f32 %v2991_v55, %v3589_v33  ;;  %v2069_v6 = vpop.xlane.xlu0 %2068  ;;  %v2072_v58 = vpop.xlane.xlu1 %2071 }
 0xa50   : > { %v2993_v56 = vpop.eup %2992  ;;  %2998 = vrsqrt.f32 %v2085_v63  ;;  %v2079_v1 = vmul.f32 0.0625, %v2069_v6  ;;  %v2080_v7 = vmul.f32 0.0625, %v2072_v58 }
 0xa51   : > { %v2098_v53 = vmul.f32 %v2993_v56, %v3592_v45  ;;  %3000 = vrsqrt.f32 %v2086_v49  ;;  %v2112_v43 = vmul.f32 %v2605_v57, %v2097_v52 }
 0xa52   : > { %v2995_v62 = vpop.eup %2994  ;;  %v2087_v13 = vadd.f32 1e-05, %v2079_v1  ;;  %v2088_v19 = vadd.f32 1e-05, %v2080_v7 }
 0xa53   : > { %v2099_v21 = vmul.f32 %v2995_v62, %v3597_v42  ;;  %v2113_v33 = vmul.f32 %v2605_v57, %v2098_v53  ;;  %v2127_v36 = vadd.f32 %v2606_v14, %v2112_v43 }
 0xa54   : > { %3002 = vrsqrt.f32 %v2087_v13 }
 0xa55   : > { %3004 = vrsqrt.f32 %v2088_v19  ;;  %v2128_v22 = vadd.f32 %v2606_v14, %v2113_v33  ;;  %v2114_v31 = vmul.f32 %v2605_v57, %v2099_v21 }
 0xa56   : > { %v2997_v0 = vpop.eup %2996 }
 0xa57   : > { %v2100_v45 = vmul.f32 %v2997_v0, %v3606_v10  ;;  %v2137_v23 = vpack.c.bf16 %v2128_v22, %v2127_v36  ;;  %v2129_v48 = vadd.f32 %v2606_v14, %v2114_v31 }
 0xa59   : > { %v2115_v26 = vmul.f32 %v2605_v57, %v2100_v45  ;;  %2845 = vmatprep.mubr.msk.bf16.mxu1 %vm576_vm0, %v2137_v23 }
 0xa5a   : > { %v2999_v8 = vpop.eup %2998 }
 0xa5b   : > { %v3001_v44 = vpop.eup %3000  ;;  %v2101_v47 = vmul.f32 %v2999_v8, %v3615_v61  ;;  %v2130_v51 = vadd.f32 %v2606_v14, %v2115_v26 }
 0xa5c   : > { %v2102_v42 = vmul.f32 %v3001_v44, %v3610_v15 }
 0xa5d   : > { %v2138_v32 = vpack.c.bf16 %v2130_v51, %v2129_v48  ;;  %v2116_v59 = vmul.f32 %v2605_v57, %v2101_v47 }
 0xa5e   : > { %v3003_v20 = vpop.eup %3002  ;;  %v2117_v28 = vmul.f32 %v2605_v57, %v2102_v42 }
 0xa5f   : > { %v3005_v54 = vpop.eup %3004  ;;  %v2103_v2 = vmul.f32 %v3003_v20, %v3626_v46  ;;  %2846 = vmatmul.mubr.msk.bf16.vlgmr.msra.gmra.mrb[36].mxu1 %vm576_vm0, %v2138_v32  ;;  %v2131_v10 = vadd.f32 %v2606_v14, %v2116_v59  ;;  %v2908_v46 = vld [vmem:[%s3768_s13] sm:$0xff]  }
 0xa60   : > { %v2104_v3 = vmul.f32 %v3005_v54, %v3621_v35  ;;  %v2132_v4 = vadd.f32 %v2606_v14, %v2117_v28  ;;  %2853 = vmatprep.subr.bf16.mxu1 %v2908_v46  ;;  %v2909_v35 = vld [vmem:[%s3768_s13 + $0x8] sm:$0xff]  }
 0xa61   : > { %v2118_v9 = vmul.f32 %v2605_v57, %v2103_v2  ;;  %2854 = vmatpush3.bf16.msra.mxu1 %v2908_v46 }
 0xa62   : > { %v2139_v5 = vpack.c.bf16 %v2132_v4, %v2131_v10  ;;  %v2119_v61 = vmul.f32 %v2605_v57, %v2104_v3  ;;  %2855 = vmatprep.subr.bf16.mxu1 %v2909_v35 }
 0xa63   : > { %v2133_v34 = vadd.f32 %v2606_v14, %v2118_v9 }
 0xa64   : > { %2849 = vmatprep.mubr.msk.bf16.mxu1 %vm576_vm0, %v2139_v5  ;;  %v2134_v15 = vadd.f32 %v2606_v14, %v2119_v61 }
 0xa65   : > { %2856 = vmatpush3.bf16.msra.mxu1 %v2909_v35 }
 0xa66   : > { %v2140_v37 = vpack.c.bf16 %v2134_v15, %v2133_v34 }
 0xa68   : > { %2850 = vmatmul.mubr.msk.bf16.gmra.mrb[40].mxu1 %vm576_vm0, %v2140_v37 }
 0xb32   : > { %v2847_v30 = vpop.f32.mrb[36].mxu1 }
 0xb33   : > { %v3666_v18 = vadd.f32 %v2847_v30, %v2607_v38  ;;  %v2200_v24 = vpop.f32.mrb[37].mxu1 }
 0xb34   : > { %v3668_v12 = vadd.f32 %v2607_v38, %v2200_v24  ;;  %v2848_v16 = vpop.f32.mrb[38].mxu1 }
 0xb35   : > { %v2241_v17 = vmul.f32 0.044715, %v3666_v18  ;;  %v3671_v50 = vadd.f32 %v2848_v16, %v2607_v38  ;;  %v2203_v55 = vpop.f32.mrb[39].mxu1 }
 0xb36   : > { %v2239_v57 = vmul.f32 0.044715, %v3668_v12  ;;  %v3674_v63 = vadd.f32 %v2607_v38, %v2203_v55 }
 0xb37   : > { %v2249_v49 = vmul.f32 %v2241_v17, %v3666_v18  ;;  %v2242_v52 = vmul.f32 0.044715, %v3671_v50 }
 0xb38   : > { %v2247_v6 = vmul.f32 %v2239_v57, %v3668_v12  ;;  %v2240_v58 = vmul.f32 0.044715, %v3674_v63 }
 0xb39   : > { %v2257_v56 = vmul.f32 %v2249_v49, %v3666_v18  ;;  %v2250_v1 = vmul.f32 %v2242_v52, %v3671_v50  ;;  %v2233_v49 = vmul.f32 0.5, %v3666_v18  ;;  %v2234_v52 = vmul.f32 0.5, %v3671_v50 }
 0xb3a   : > { %v2255_v7 = vmul.f32 %v2247_v6, %v3668_v12  ;;  %v2248_v53 = vmul.f32 %v2240_v58, %v3674_v63  ;;  %v2231_v58 = vmul.f32 0.5, %v3668_v12 }
 0xb3b   : > { %v2265_v43 = vadd.f32 %v2257_v56, %v3666_v18  ;;  %v2258_v62 = vmul.f32 %v2250_v1, %v3671_v50  ;;  %v2851_v13 = vpop.f32.mrb[40].mxu1  ;;  %v2232_v56 = vmul.f32 0.5, %v3674_v63 }
 0xb3c   : > { %v2263_v19 = vadd.f32 %v2255_v7, %v3668_v12  ;;  %v2256_v14 = vmul.f32 %v2248_v53, %v3674_v63  ;;  %v3688_v21 = vadd.f32 %v2851_v13, %v2607_v38  ;;  %v2216_v33 = vpop.f32.mrb[41].mxu1 }
 0xb3d   : > { %v2273_v36 = vmul.f32 0.7978846, %v2265_v43  ;;  %v2266_v22 = vadd.f32 %v2258_v62, %v3671_v50  ;;  %v3691_v0 = vadd.f32 %v2607_v38, %v2216_v33  ;;  %v2852_v31 = vpop.f32.mrb[42].mxu1 }
 0xb3e   : > { %v2271_v45 = vmul.f32 0.7978846, %v2263_v19  ;;  %v2264_v23 = vadd.f32 %v2256_v14, %v3674_v63  ;;  %v2245_v26 = vmul.f32 0.044715, %v3688_v21  ;;  %v2228_v8 = vadd.f32 %v2852_v31, %v2607_v38  ;;  %v2219_v44 = vpop.f32.mrb[43].mxu1 }
 0xb3f   : > { %3006 = vtanh.f32 %v2273_v36  ;;  %v2274_v47 = vmul.f32 0.7978846, %v2266_v22  ;;  %v2243_v48 = vmul.f32 0.044715, %v3691_v0  ;;  %v2220_v51 = vadd.f32 %v2607_v38, %v2219_v44 }
 0xb40   : > { %3008 = vtanh.f32 %v2271_v45  ;;  %v2272_v42 = vmul.f32 0.7978846, %v2264_v23  ;;  %v2253_v32 = vmul.f32 %v2245_v26, %v3688_v21  ;;  %v2246_v59 = vmul.f32 0.044715, %v2228_v8 }
 0xb41   : > { %3010 = vtanh.f32 %v2274_v47  ;;  %v2251_v20 = vmul.f32 %v2243_v48, %v3691_v0  ;;  %v2244_v28 = vmul.f32 0.044715, %v2220_v51  ;;  %v2237_v63 = vmul.f32 0.5, %v3688_v21 }
 0xb42   : > { %3012 = vtanh.f32 %v2272_v42  ;;  %v2261_v54 = vmul.f32 %v2253_v32, %v3688_v21  ;;  %v2254_v2 = vmul.f32 %v2246_v59, %v2228_v8  ;;  %v2238_v22 = vmul.f32 0.5, %v2228_v8 }
 0xb43   : > { %v2259_v10 = vmul.f32 %v2251_v20, %v3691_v0  ;;  %v2252_v3 = vmul.f32 %v2244_v28, %v2220_v51  ;;  %v2235_v45 = vmul.f32 0.5, %v3691_v0  ;;  %v2236_v23 = vmul.f32 0.5, %v2220_v51 }
 0xb44   : > { %v2269_v4 = vadd.f32 %v2261_v54, %v3688_v21  ;;  %v2262_v9 = vmul.f32 %v2254_v2, %v2228_v8  ;;  %v2613_v21 = vld [vmem:[%s3769_s14] ss:$0 sm:$0xff] }
 0xb45   : > { %v2267_v5 = vadd.f32 %v2259_v10, %v3691_v0  ;;  %v2260_v61 = vmul.f32 %v2252_v3, %v2220_v51 }
 0xb46   : > { %v2277_v34 = vmul.f32 0.7978846, %v2269_v4  ;;  %v2270_v15 = vadd.f32 %v2262_v9, %v2228_v8 }
 0xb47   : > { %v2275_v37 = vmul.f32 0.7978846, %v2267_v5  ;;  %v2268_v46 = vadd.f32 %v2260_v61, %v2220_v51 }
 0xb48   : > { %3014 = vtanh.f32 %v2277_v34  ;;  %v2278_v35 = vmul.f32 0.7978846, %v2270_v15 }
 0xb49   : > { %v3007_v38 = vpop.eup %3006  ;;  %3016 = vtanh.f32 %v2275_v37  ;;  %v2276_v30 = vmul.f32 0.7978846, %v2268_v46 }
 0xb4a   : > { %v3009_v24 = vpop.eup %3008  ;;  %v2289_v16 = vadd.f32 1.0, %v3007_v38  ;;  %3018 = vtanh.f32 %v2278_v35 }
 0xb4b   : > { %v3011_v17 = vpop.eup %3010  ;;  %3020 = vtanh.f32 %v2276_v30  ;;  %v2287_v55 = vadd.f32 1.0, %v3009_v24 }
 0xb4c   : > { %v3013_v57 = vpop.eup %3012  ;;  %v2290_v6 = vadd.f32 1.0, %v3011_v17  ;;  %v2297_v7 = vmul.f32 %v2289_v16, %v2233_v49 }
 0xb4d   : > { %v2288_v1 = vadd.f32 1.0, %v3013_v57  ;;  %v2295_v43 = vmul.f32 %v2287_v55, %v2231_v58 }
 0xb4e   : > { %v2298_v53 = vmul.f32 %v2290_v6, %v2234_v52 }
 0xb4f   : > { %v2296_v62 = vmul.f32 %v2288_v1, %v2232_v56 }
 0xb50   : > { %v2308_v13 = vpack.c.bf16 %v2298_v53, %v2297_v7 }
 0xb51   : > { %v2307_v19 = vpack.c.bf16 %v2296_v62, %v2295_v43 }
 0xb52   : > { %v3015_v14 = vpop.eup %3014 }
 0xb53   : > { %v3017_v33 = vpop.eup %3016  ;;  %2857 = vmatprep.mubr.msk.bf16.mxu1 %vm2330_vm4, %v2307_v19  ;;  %v2293_v18 = vadd.f32 1.0, %v3015_v14 }
 0xb54   : > { %v3019_v36 = vpop.eup %3018  ;;  %2858 = vmatmul.mubr.msk.bf16.vlgmr.msra.gmra.mrb[44].mxu1 %vm2330_vm4, %v2308_v13  ;;  %v2291_v50 = vadd.f32 1.0, %v3017_v33 }
 0xb55   : > { %v3021_v12 = vpop.eup %3020  ;;  %v2294_v31 = vadd.f32 1.0, %v3019_v36  ;;  %v2301_v44 = vmul.f32 %v2293_v18, %v2237_v63 }
 0xb56   : > { %v2292_v26 = vadd.f32 1.0, %v3021_v12  ;;  %v2299_v48 = vmul.f32 %v2291_v50, %v2235_v45 }
 0xb57   : > { %v2302_v47 = vmul.f32 %v2294_v31, %v2238_v22 }
 0xb58   : > { %v2300_v42 = vmul.f32 %v2292_v26, %v2236_v23 }
 0xb59   : > { %v2310_v32 = vpack.c.bf16 %v2302_v47, %v2301_v44 }
 0xb5a   : > { %v2309_v59 = vpack.c.bf16 %v2300_v42, %v2299_v48 }
 0xb5c   : > { %2861 = vmatprep.mubr.msk.bf16.mxu1 %vm2330_vm4, %v2309_v59 }
 0xb5d   : > { %2862 = vmatmul.mubr.msk.bf16.gmra.mrb[48].mxu1 %vm2330_vm4, %v2310_v32 }
 0xc27   : > { %v2859_v8 = vpop.f32.mrb[44].mxu1 }
 0xc28   : > { %v2386_v20 = vadd.f32 %v2859_v8, %v2613_v21  ;;  %v2377_v0 = vpop.f32.mrb[45].mxu1 }
 0xc29   : > { %v2378_v51 = vadd.f32 %v2613_v21, %v2377_v0  ;;  %v2860_v28 = vpop.f32.mrb[46].mxu1 }
 0xc2a   : > { %v2410_v54 = vadd.f32 %v2386_v20, %v3553_v60  ;;  %v2389_v2 = vadd.f32 %v2860_v28, %v2613_v21  ;;  %v2380_v10 = vpop.f32.mrb[47].mxu1 }
 0xc2b   : > { %v2408_v3 = vadd.f32 %v2378_v51, %v3550_v25  ;;  %v2381_v4 = vadd.f32 %v2613_v21, %v2380_v10 }
 0xc2c   : > { %v2634_v9 = vpack.c.bf16 %v2410_v54, %v2410_v54  ;;  %v2411_v5 = vadd.f32 %v2389_v2, %v3562_v29 }
 0xc2d   : > { %v2632_v60 = vpack.c.bf16 %v2408_v3, %v2408_v3  ;;  %v2409_v61 = vadd.f32 %v2381_v4, %v3556_v27 }
 0xc2e   : > { %2451 = vst.msk [vmem:[%s3721_s25 + $0x8] sm:$0xf] %vm2448_vm5, %v2634_v9  ;;  %v2635_v34 = vpack.c.bf16 %v2411_v5, %v2411_v5 }
 0xc2f   : > { %2449 = vst.msk [vmem:[%s3721_s25] sm:$0xf] %vm2448_vm5, %v2632_v60  ;;  %v2633_v15 = vpack.c.bf16 %v2409_v61, %v2409_v61 }
 0xc30   : > { %2452 = vst.msk [vmem:[%s3721_s25 + $0xc] sm:$0xf] %vm2448_vm5, %v2635_v34  ;;  %v2863_v37 = vpop.f32.mrb[48].mxu1 }
 0xc31   : > { %2450 = vst.msk [vmem:[%s3721_s25 + $0x4] sm:$0xf] %vm2448_vm5, %v2633_v15  ;;  %v2402_v25 = vadd.f32 %v2863_v37, %v2613_v21  ;;  %v2393_v46 = vpop.f32.mrb[49].mxu1 }
 0xc32   : > { %v2394_v29 = vadd.f32 %v2613_v21, %v2393_v46  ;;  %v2864_v35 = vpop.f32.mrb[50].mxu1 }
 0xc33   : > { %v2414_v27 = vadd.f32 %v2402_v25, %v3580_v41  ;;  %v2405_v38 = vadd.f32 %v2864_v35, %v2613_v21  ;;  %v2396_v30 = vpop.f32.mrb[51].mxu1 }
 0xc34   : > { %v2412_v24 = vadd.f32 %v2394_v29, %v3570_v39  ;;  %v2397_v16 = vadd.f32 %v2613_v21, %v2396_v30 }
 0xc35   : > { %v2638_v17 = vpack.c.bf16 %v2414_v27, %v2414_v27  ;;  %v2415_v55 = vadd.f32 %v2405_v38, %v3576_v11 }
 0xc36   : > { %v2636_v57 = vpack.c.bf16 %v2412_v24, %v2412_v24  ;;  %v2413_v49 = vadd.f32 %v2397_v16, %v3572_v40 }
 0xc37   : > { %2455 = vst.msk [vmem:[%s3721_s25 + $0x18] sm:$0xf] %vm2448_vm5, %v2638_v17  ;;  %v2639_v52 = vpack.c.bf16 %v2415_v55, %v2415_v55 }
 0xc38   : > { %2453 = vst.msk [vmem:[%s3721_s25 + $0x10] sm:$0xf] %vm2448_vm5, %v2636_v57  ;;  %v2637_v6 = vpack.c.bf16 %v2413_v49, %v2413_v49 }
 0xc39   : > { %2456 = vst.msk [vmem:[%s3721_s25 + $0x1c] sm:$0xf] %vm2448_vm5, %v2639_v52 }
 0xc3a   : > { %2454 = vst.msk [vmem:[%s3721_s25 + $0x14] sm:$0xf] %vm2448_vm5, %v2637_v6 }
 0xc3b PF: > { %s25_s20 = sadd.s32 1, %s3044_s20   ;;  %s3771_s18 = smov %s3040_s19 }
 0xc3c   : > { %p22_p5 = scmp.ge.s32.totalorder %s25_s20, 4   ;;  %s3772_s19 = smov %s3774_s21 }
 0xc3e   :  { %24 = sbr.rel (!%p22_p5) target bundleno = 2 (0x2), region = 115 }

</bundles_post_ra>
